<compile_context>
chip_gen: v5e
topology: v5e:2x2
jax: 0.10.0
libtpu: 0.0.40
codegen_flags: <defaults>
</compile_context>

<pallas_src>
import functools
import math

import jax
import jax.numpy as jnp
from jax import lax
from jax.experimental import pallas as pl
from jax.experimental.pallas import tpu as pltpu


# ---------------------------------------------------------------------------
# In-kernel building blocks (operate on loaded VMEM values, all shapes static)
# ---------------------------------------------------------------------------

def _layernorm(x, g, b, eps):
    mu = jnp.mean(x, axis=-1, keepdims=True)
    d = x - mu
    var = jnp.mean(d * d, axis=-1, keepdims=True)
    return (d * lax.rsqrt(var + eps)) * g + b


def _attend(q, k, v):
    """q: (Lq, hd) pre-scaled, k/v: (Lk, hd) -> (Lq, hd)."""
    # Contract the head dim of both operands: q @ k^T without an explicit
    # transpose (avoids an XLU transpose / VMEM copy of k).
    s = lax.dot_general(q, k, (((1,), (1,)), ((), ())),
                        preferred_element_type=jnp.float32)
    m = jnp.max(s, axis=-1, keepdims=True)
    e = jnp.exp(s - m)
    inv = pl.reciprocal(jnp.sum(e, axis=-1, keepdims=True), approx=True)
    return jnp.dot(e * inv, v, preferred_element_type=jnp.float32)


def _mha_self(x, wqkv, bqkv, wo, bo, B, L, nh, hd):
    """x: (B*L, H) batch-major. Fused QKV; scale pre-folded into q weights."""
    H = nh * hd
    qkv = jnp.dot(x, wqkv, preferred_element_type=jnp.float32) + bqkv  # (B*L, 3H)
    per_batch = []
    for b in range(B):                       # static unroll over batch*heads
        r0 = b * L
        heads = []
        for h in range(nh):
            c = h * hd
            q = qkv[r0:r0 + L, c:c + hd]
            k = qkv[r0:r0 + L, H + c:H + c + hd]
            v = qkv[r0:r0 + L, 2 * H + c:2 * H + c + hd]
            heads.append(_attend(q, k, v))
        per_batch.append(jnp.concatenate(heads, axis=-1))              # (L, H)
    o = jnp.concatenate(per_batch, axis=0)                             # (B*L, H)
    return jnp.dot(o, wo, preferred_element_type=jnp.float32) + bo


def _mha_cross(xq, xkv, wq, bq, wkv, bkv, wo, bo, B, Lq, Lk, nh, hd):
    """xq: (B*Lq, H) queries, xkv: (B*Lk, H) memory. Fused KV projection."""
    H = nh * hd
    qp = jnp.dot(xq, wq, preferred_element_type=jnp.float32) + bq      # (B*Lq, H)
    kvp = jnp.dot(xkv, wkv, preferred_element_type=jnp.float32) + bkv  # (B*Lk, 2H)
    per_batch = []
    for b in range(B):
        heads = []
        for h in range(nh):
            c = h * hd
            q = qp[b * Lq:(b + 1) * Lq, c:c + hd]
            k = kvp[b * Lk:(b + 1) * Lk, c:c + hd]
            v = kvp[b * Lk:(b + 1) * Lk, H + c:H + c + hd]
            heads.append(_attend(q, k, v))
        per_batch.append(jnp.concatenate(heads, axis=-1))
    o = jnp.concatenate(per_batch, axis=0)
    return jnp.dot(o, wo, preferred_element_type=jnp.float32) + bo


def _ffn(x, w1, b1, w2, b2):
    h = jnp.maximum(jnp.dot(x, w1, preferred_element_type=jnp.float32) + b1, 0.0)
    return jnp.dot(h, w2, preferred_element_type=jnp.float32) + b2


# ---------------------------------------------------------------------------
# Fused whole-forward Pallas kernel
# ---------------------------------------------------------------------------

def _forward_kernel(*refs, treedef, n_params, B, S, T, nh, hd, eps):
    enc_ref, tgt_ref = refs[0], refs[1]
    param_refs = refs[2:2 + n_params]
    out_ref = refs[2 + n_params]

    # Materialize all (tiny) parameters into VMEM/vregs once.
    p = jax.tree_util.tree_unflatten(treedef, [r[...] for r in param_refs])

    # ----- Encoder layer (post-norm) -----
    src = enc_ref[...].astype(jnp.float32)                       # (B*S, H)
    ep = p["encoder"]
    sa = _mha_self(src, ep["wqkv"], ep["bqkv"], ep["wo"], ep["bo"], B, S, nh, hd)
    x = _layernorm(src + sa, ep["ln1_g"], ep["ln1_b"], eps)
    x = _layernorm(x + _ffn(x, ep["w1"], ep["b1"], ep["w2"], ep["b2"]),
                   ep["ln2_g"], ep["ln2_b"], eps)
    memory = x                                                   # (B*S, H)

    # ----- Decoder stack (post-norm, no masks) -----
    dec = tgt_ref[...].astype(jnp.float32)                       # (B*T, H)
    for lp in p["decoder"]:
        sa = _mha_self(dec, lp["sa_wqkv"], lp["sa_bqkv"], lp["sa_wo"],
                       lp["sa_bo"], B, T, nh, hd)
        dec = _layernorm(dec + sa, lp["ln1_g"], lp["ln1_b"], eps)
        ca = _mha_cross(dec, memory, lp["ca_wq"], lp["ca_bq"], lp["ca_wkv"],
                        lp["ca_bkv"], lp["ca_wo"], lp["ca_bo"], B, T, S, nh, hd)
        dec = _layernorm(dec + ca, lp["ln2_g"], lp["ln2_b"], eps)
        dec = _layernorm(dec + _ffn(dec, lp["w1"], lp["b1"], lp["w2"], lp["b2"]),
                         lp["ln3_g"], lp["ln3_b"], eps)

    # ----- Output projection -----
    out = jnp.dot(dec, p["w_out"], preferred_element_type=jnp.float32) + p["b_out"]
    out_ref[...] = out.astype(out_ref.dtype)


def guide_rna_forward(params, tokens, tgt, num_heads):
    """tokens: (B, S) int32, tgt: (T, B, H) f32 -> (T, B, vocab_size)."""
    B, S = tokens.shape
    T, _, H = tgt.shape
    hd = H // num_heads

    # Frozen "ESM" stand-in: embedding lookup (XLA glue, not Pallas).
    # TODO(synk): real ESM2 encoder + batch_converter are untranslatable.
    enc_in = params["esm_embed"][tokens]                          # (B, S, H)
    enc2d = enc_in.reshape(B * S, H)                              # batch-major rows
    tgt2d = jnp.transpose(tgt, (1, 0, 2)).reshape(B * T, H)       # batch-major rows

    kparams = params["kernel"]
    leaves, treedef = jax.tree_util.tree_flatten(kparams)
    n_params = len(leaves)
    vocab = kparams["w_out"].shape[1]

    kernel = functools.partial(
        _forward_kernel, treedef=treedef, n_params=n_params,
        B=B, S=S, T=T, nh=num_heads, hd=hd, eps=1e-5)

    out2d = pl.pallas_call(
        kernel,
        out_shape=jax.ShapeDtypeStruct((B * T, vocab), jnp.float32),
    )(enc2d, tgt2d, *leaves)

    return jnp.transpose(out2d.reshape(B, T, vocab), (1, 0, 2))   # (T, B, vocab)


# ---------------------------------------------------------------------------
# Deterministic parameter init (QKV fused, softmax scale folded into q)
# ---------------------------------------------------------------------------

def init_params(key, hidden_dim, num_heads, ff_dim, num_decoder_layers,
                vocab_size, esm_vocab_size=33):
    kit = iter(jax.random.split(key, 512))
    H, F = hidden_dim, ff_dim
    hd = H // num_heads
    scale = 1.0 / math.sqrt(hd)

    def dense(fan_in, fan_out):
        lim = 1.0 / math.sqrt(fan_in)
        return jax.random.uniform(next(kit), (fan_in, fan_out), jnp.float32, -lim, lim)

    def bvec(n, fan_in):
        lim = 1.0 / math.sqrt(fan_in)
        return jax.random.uniform(next(kit), (1, n), jnp.float32, -lim, lim)

    def ones():
        return jnp.ones((1, H), jnp.float32)

    def zeros():
        return jnp.zeros((1, H), jnp.float32)

    def fused_qkv():
        wq, wk, wv = dense(H, H), dense(H, H), dense(H, H)
        bq, bk, bv = bvec(H, H), bvec(H, H), bvec(H, H)
        wqkv = jnp.concatenate([wq * scale, wk, wv], axis=1)      # (H, 3H)
        bqkv = jnp.concatenate([bq * scale, bk, bv], axis=1)      # (1, 3H)
        return wqkv, bqkv

    e_wqkv, e_bqkv = fused_qkv()
    encoder = dict(
        wqkv=e_wqkv, bqkv=e_bqkv, wo=dense(H, H), bo=bvec(H, H),
        ln1_g=ones(), ln1_b=zeros(),
        w1=dense(H, F), b1=bvec(F, H),
        w2=dense(F, H), b2=bvec(H, F),
        ln2_g=ones(), ln2_b=zeros())

    decoder = []
    for _ in range(num_decoder_layers):
        sa_wqkv, sa_bqkv = fused_qkv()
        ca_wq, ca_bq = dense(H, H) * scale, bvec(H, H) * scale
        ca_wkv = jnp.concatenate([dense(H, H), dense(H, H)], axis=1)  # (H, 2H)
        ca_bkv = jnp.concatenate([bvec(H, H), bvec(H, H)], axis=1)    # (1, 2H)
        decoder.append(dict(
            sa_wqkv=sa_wqkv, sa_bqkv=sa_bqkv, sa_wo=dense(H, H), sa_bo=bvec(H, H),
            ca_wq=ca_wq, ca_bq=ca_bq, ca_wkv=ca_wkv, ca_bkv=ca_bkv,
            ca_wo=dense(H, H), ca_bo=bvec(H, H),
            ln1_g=ones(), ln1_b=zeros(),
            ln2_g=ones(), ln2_b=zeros(),
            ln3_g=ones(), ln3_b=zeros(),
            w1=dense(H, F), b1=bvec(F, H),
            w2=dense(F, H), b2=bvec(H, F)))

    kernel_params = dict(encoder=encoder, decoder=decoder,
                         w_out=dense(H, vocab_size),
                         b_out=bvec(vocab_size, H))

    return dict(
        esm_embed=jax.random.normal(next(kit), (esm_vocab_size, H), jnp.float32) * 0.02,
        kernel=kernel_params)


# ---------------------------------------------------------------------------
# Main
# ---------------------------------------------------------------------------

if __name__ == "__main__":
    hidden_dim, num_heads, ff_dim, num_decoder_layers, vocab_size = 32, 4, 64, 2, 16
    B, S, T = 2, 8, 8

    key = jax.random.PRNGKey(0)
    kp, kt, kg = jax.random.split(key, 3)

    params = init_params(kp, hidden_dim, num_heads, ff_dim,
                         num_decoder_layers, vocab_size)
    tokens = jax.random.randint(kt, (B, S), 0, 33, dtype=jnp.int32)
    tgt = jax.random.normal(kg, (T, B, hidden_dim), jnp.float32)

    fwd = jax.jit(guide_rna_forward, static_argnums=(3,))
    out = fwd(params, tokens, tgt, num_heads)
    out = jax.block_until_ready(out)

    assert out.shape == (T, B, vocab_size), out.shape
    assert bool(jnp.all(jnp.isfinite(out)))
    print("KERNEL_OK")
</pallas_src>

<mosaic_0001>
module attributes {stable_mosaic.version = 11 : i64} {
  func.func @_forward_kernel(%arg0: memref<16x32xf32, #tpu.memory_space<vmem>>, %arg1: memref<16x32xf32, #tpu.memory_space<vmem>>, %arg2: memref<1x16xf32, #tpu.memory_space<vmem>>, %arg3: memref<1x64xf32, #tpu.memory_space<vmem>>, %arg4: memref<1x32xf32, #tpu.memory_space<vmem>>, %arg5: memref<1x64xf32, #tpu.memory_space<vmem>>, %arg6: memref<1x32xf32, #tpu.memory_space<vmem>>, %arg7: memref<1x32xf32, #tpu.memory_space<vmem>>, %arg8: memref<32x64xf32, #tpu.memory_space<vmem>>, %arg9: memref<32x32xf32, #tpu.memory_space<vmem>>, %arg10: memref<32x32xf32, #tpu.memory_space<vmem>>, %arg11: memref<1x32xf32, #tpu.memory_space<vmem>>, %arg12: memref<1x32xf32, #tpu.memory_space<vmem>>, %arg13: memref<1x32xf32, #tpu.memory_space<vmem>>, %arg14: memref<1x32xf32, #tpu.memory_space<vmem>>, %arg15: memref<1x32xf32, #tpu.memory_space<vmem>>, %arg16: memref<1x32xf32, #tpu.memory_space<vmem>>, %arg17: memref<1x32xf32, #tpu.memory_space<vmem>>, %arg18: memref<1x96xf32, #tpu.memory_space<vmem>>, %arg19: memref<32x32xf32, #tpu.memory_space<vmem>>, %arg20: memref<32x96xf32, #tpu.memory_space<vmem>>, %arg21: memref<32x64xf32, #tpu.memory_space<vmem>>, %arg22: memref<64x32xf32, #tpu.memory_space<vmem>>, %arg23: memref<1x64xf32, #tpu.memory_space<vmem>>, %arg24: memref<1x32xf32, #tpu.memory_space<vmem>>, %arg25: memref<1x64xf32, #tpu.memory_space<vmem>>, %arg26: memref<1x32xf32, #tpu.memory_space<vmem>>, %arg27: memref<1x32xf32, #tpu.memory_space<vmem>>, %arg28: memref<32x64xf32, #tpu.memory_space<vmem>>, %arg29: memref<32x32xf32, #tpu.memory_space<vmem>>, %arg30: memref<32x32xf32, #tpu.memory_space<vmem>>, %arg31: memref<1x32xf32, #tpu.memory_space<vmem>>, %arg32: memref<1x32xf32, #tpu.memory_space<vmem>>, %arg33: memref<1x32xf32, #tpu.memory_space<vmem>>, %arg34: memref<1x32xf32, #tpu.memory_space<vmem>>, %arg35: memref<1x32xf32, #tpu.memory_space<vmem>>, %arg36: memref<1x32xf32, #tpu.memory_space<vmem>>, %arg37: memref<1x32xf32, #tpu.memory_space<vmem>>, %arg38: memref<1x96xf32, #tpu.memory_space<vmem>>, %arg39: memref<32x32xf32, #tpu.memory_space<vmem>>, %arg40: memref<32x96xf32, #tpu.memory_space<vmem>>, %arg41: memref<32x64xf32, #tpu.memory_space<vmem>>, %arg42: memref<64x32xf32, #tpu.memory_space<vmem>>, %arg43: memref<1x64xf32, #tpu.memory_space<vmem>>, %arg44: memref<1x32xf32, #tpu.memory_space<vmem>>, %arg45: memref<1x32xf32, #tpu.memory_space<vmem>>, %arg46: memref<1x96xf32, #tpu.memory_space<vmem>>, %arg47: memref<1x32xf32, #tpu.memory_space<vmem>>, %arg48: memref<1x32xf32, #tpu.memory_space<vmem>>, %arg49: memref<1x32xf32, #tpu.memory_space<vmem>>, %arg50: memref<1x32xf32, #tpu.memory_space<vmem>>, %arg51: memref<32x64xf32, #tpu.memory_space<vmem>>, %arg52: memref<64x32xf32, #tpu.memory_space<vmem>>, %arg53: memref<32x32xf32, #tpu.memory_space<vmem>>, %arg54: memref<32x96xf32, #tpu.memory_space<vmem>>, %arg55: memref<32x16xf32, #tpu.memory_space<vmem>>, %arg56: memref<16x16xf32, #tpu.memory_space<vmem>>) attributes {dimension_semantics = [], scalar_prefetch = 0 : i64, scratch_operands = 0 : i64, tpu.core_type = #tpu.core_type<tc>} {
    %c0 = arith.constant 0 : index
    %c0_0 = arith.constant 0 : index
    %0 = vector.load %arg2[%c0, %c0_0] : memref<1x16xf32, #tpu.memory_space<vmem>>, vector<1x16xf32>
    %c0_1 = arith.constant 0 : index
    %c0_2 = arith.constant 0 : index
    %1 = vector.load %arg3[%c0_1, %c0_2] : memref<1x64xf32, #tpu.memory_space<vmem>>, vector<1x64xf32>
    %c0_3 = arith.constant 0 : index
    %c0_4 = arith.constant 0 : index
    %2 = vector.load %arg4[%c0_3, %c0_4] : memref<1x32xf32, #tpu.memory_space<vmem>>, vector<1x32xf32>
    %c0_5 = arith.constant 0 : index
    %c0_6 = arith.constant 0 : index
    %3 = vector.load %arg5[%c0_5, %c0_6] : memref<1x64xf32, #tpu.memory_space<vmem>>, vector<1x64xf32>
    %c0_7 = arith.constant 0 : index
    %c0_8 = arith.constant 0 : index
    %4 = vector.load %arg6[%c0_7, %c0_8] : memref<1x32xf32, #tpu.memory_space<vmem>>, vector<1x32xf32>
    %c0_9 = arith.constant 0 : index
    %c0_10 = arith.constant 0 : index
    %5 = vector.load %arg7[%c0_9, %c0_10] : memref<1x32xf32, #tpu.memory_space<vmem>>, vector<1x32xf32>
    %c0_11 = arith.constant 0 : index
    %c0_12 = arith.constant 0 : index
    %6 = vector.load %arg8[%c0_11, %c0_12] : memref<32x64xf32, #tpu.memory_space<vmem>>, vector<32x64xf32>
    %c0_13 = arith.constant 0 : index
    %c0_14 = arith.constant 0 : index
    %7 = vector.load %arg9[%c0_13, %c0_14] : memref<32x32xf32, #tpu.memory_space<vmem>>, vector<32x32xf32>
    %c0_15 = arith.constant 0 : index
    %c0_16 = arith.constant 0 : index
    %8 = vector.load %arg10[%c0_15, %c0_16] : memref<32x32xf32, #tpu.memory_space<vmem>>, vector<32x32xf32>
    %c0_17 = arith.constant 0 : index
    %c0_18 = arith.constant 0 : index
    %9 = vector.load %arg11[%c0_17, %c0_18] : memref<1x32xf32, #tpu.memory_space<vmem>>, vector<1x32xf32>
    %c0_19 = arith.constant 0 : index
    %c0_20 = arith.constant 0 : index
    %10 = vector.load %arg12[%c0_19, %c0_20] : memref<1x32xf32, #tpu.memory_space<vmem>>, vector<1x32xf32>
    %c0_21 = arith.constant 0 : index
    %c0_22 = arith.constant 0 : index
    %11 = vector.load %arg13[%c0_21, %c0_22] : memref<1x32xf32, #tpu.memory_space<vmem>>, vector<1x32xf32>
    %c0_23 = arith.constant 0 : index
    %c0_24 = arith.constant 0 : index
    %12 = vector.load %arg14[%c0_23, %c0_24] : memref<1x32xf32, #tpu.memory_space<vmem>>, vector<1x32xf32>
    %c0_25 = arith.constant 0 : index
    %c0_26 = arith.constant 0 : index
    %13 = vector.load %arg15[%c0_25, %c0_26] : memref<1x32xf32, #tpu.memory_space<vmem>>, vector<1x32xf32>
    %c0_27 = arith.constant 0 : index
    %c0_28 = arith.constant 0 : index
    %14 = vector.load %arg16[%c0_27, %c0_28] : memref<1x32xf32, #tpu.memory_space<vmem>>, vector<1x32xf32>
    %c0_29 = arith.constant 0 : index
    %c0_30 = arith.constant 0 : index
    %15 = vector.load %arg17[%c0_29, %c0_30] : memref<1x32xf32, #tpu.memory_space<vmem>>, vector<1x32xf32>
    %c0_31 = arith.constant 0 : index
    %c0_32 = arith.constant 0 : index
    %16 = vector.load %arg18[%c0_31, %c0_32] : memref<1x96xf32, #tpu.memory_space<vmem>>, vector<1x96xf32>
    %c0_33 = arith.constant 0 : index
    %c0_34 = arith.constant 0 : index
    %17 = vector.load %arg19[%c0_33, %c0_34] : memref<32x32xf32, #tpu.memory_space<vmem>>, vector<32x32xf32>
    %c0_35 = arith.constant 0 : index
    %c0_36 = arith.constant 0 : index
    %18 = vector.load %arg20[%c0_35, %c0_36] : memref<32x96xf32, #tpu.memory_space<vmem>>, vector<32x96xf32>
    %c0_37 = arith.constant 0 : index
    %c0_38 = arith.constant 0 : index
    %19 = vector.load %arg21[%c0_37, %c0_38] : memref<32x64xf32, #tpu.memory_space<vmem>>, vector<32x64xf32>
    %c0_39 = arith.constant 0 : index
    %c0_40 = arith.constant 0 : index
    %20 = vector.load %arg22[%c0_39, %c0_40] : memref<64x32xf32, #tpu.memory_space<vmem>>, vector<64x32xf32>
    %c0_41 = arith.constant 0 : index
    %c0_42 = arith.constant 0 : index
    %21 = vector.load %arg23[%c0_41, %c0_42] : memref<1x64xf32, #tpu.memory_space<vmem>>, vector<1x64xf32>
    %c0_43 = arith.constant 0 : index
    %c0_44 = arith.constant 0 : index
    %22 = vector.load %arg24[%c0_43, %c0_44] : memref<1x32xf32, #tpu.memory_space<vmem>>, vector<1x32xf32>
    %c0_45 = arith.constant 0 : index
    %c0_46 = arith.constant 0 : index
    %23 = vector.load %arg25[%c0_45, %c0_46] : memref<1x64xf32, #tpu.memory_space<vmem>>, vector<1x64xf32>
    %c0_47 = arith.constant 0 : index
    %c0_48 = arith.constant 0 : index
    %24 = vector.load %arg26[%c0_47, %c0_48] : memref<1x32xf32, #tpu.memory_space<vmem>>, vector<1x32xf32>
    %c0_49 = arith.constant 0 : index
    %c0_50 = arith.constant 0 : index
    %25 = vector.load %arg27[%c0_49, %c0_50] : memref<1x32xf32, #tpu.memory_space<vmem>>, vector<1x32xf32>
    %c0_51 = arith.constant 0 : index
    %c0_52 = arith.constant 0 : index
    %26 = vector.load %arg28[%c0_51, %c0_52] : memref<32x64xf32, #tpu.memory_space<vmem>>, vector<32x64xf32>
    %c0_53 = arith.constant 0 : index
    %c0_54 = arith.constant 0 : index
    %27 = vector.load %arg29[%c0_53, %c0_54] : memref<32x32xf32, #tpu.memory_space<vmem>>, vector<32x32xf32>
    %c0_55 = arith.constant 0 : index
    %c0_56 = arith.constant 0 : index
    %28 = vector.load %arg30[%c0_55, %c0_56] : memref<32x32xf32, #tpu.memory_space<vmem>>, vector<32x32xf32>
    %c0_57 = arith.constant 0 : index
    %c0_58 = arith.constant 0 : index
    %29 = vector.load %arg31[%c0_57, %c0_58] : memref<1x32xf32, #tpu.memory_space<vmem>>, vector<1x32xf32>
    %c0_59 = arith.constant 0 : index
    %c0_60 = arith.constant 0 : index
    %30 = vector.load %arg32[%c0_59, %c0_60] : memref<1x32xf32, #tpu.memory_space<vmem>>, vector<1x32xf32>
    %c0_61 = arith.constant 0 : index
    %c0_62 = arith.constant 0 : index
    %31 = vector.load %arg33[%c0_61, %c0_62] : memref<1x32xf32, #tpu.memory_space<vmem>>, vector<1x32xf32>
    %c0_63 = arith.constant 0 : index
    %c0_64 = arith.constant 0 : index
    %32 = vector.load %arg34[%c0_63, %c0_64] : memref<1x32xf32, #tpu.memory_space<vmem>>, vector<1x32xf32>
    %c0_65 = arith.constant 0 : index
    %c0_66 = arith.constant 0 : index
    %33 = vector.load %arg35[%c0_65, %c0_66] : memref<1x32xf32, #tpu.memory_space<vmem>>, vector<1x32xf32>
    %c0_67 = arith.constant 0 : index
    %c0_68 = arith.constant 0 : index
    %34 = vector.load %arg36[%c0_67, %c0_68] : memref<1x32xf32, #tpu.memory_space<vmem>>, vector<1x32xf32>
    %c0_69 = arith.constant 0 : index
    %c0_70 = arith.constant 0 : index
    %35 = vector.load %arg37[%c0_69, %c0_70] : memref<1x32xf32, #tpu.memory_space<vmem>>, vector<1x32xf32>
    %c0_71 = arith.constant 0 : index
    %c0_72 = arith.constant 0 : index
    %36 = vector.load %arg38[%c0_71, %c0_72] : memref<1x96xf32, #tpu.memory_space<vmem>>, vector<1x96xf32>
    %c0_73 = arith.constant 0 : index
    %c0_74 = arith.constant 0 : index
    %37 = vector.load %arg39[%c0_73, %c0_74] : memref<32x32xf32, #tpu.memory_space<vmem>>, vector<32x32xf32>
    %c0_75 = arith.constant 0 : index
    %c0_76 = arith.constant 0 : index
    %38 = vector.load %arg40[%c0_75, %c0_76] : memref<32x96xf32, #tpu.memory_space<vmem>>, vector<32x96xf32>
    %c0_77 = arith.constant 0 : index
    %c0_78 = arith.constant 0 : index
    %39 = vector.load %arg41[%c0_77, %c0_78] : memref<32x64xf32, #tpu.memory_space<vmem>>, vector<32x64xf32>
    %c0_79 = arith.constant 0 : index
    %c0_80 = arith.constant 0 : index
    %40 = vector.load %arg42[%c0_79, %c0_80] : memref<64x32xf32, #tpu.memory_space<vmem>>, vector<64x32xf32>
    %c0_81 = arith.constant 0 : index
    %c0_82 = arith.constant 0 : index
    %41 = vector.load %arg43[%c0_81, %c0_82] : memref<1x64xf32, #tpu.memory_space<vmem>>, vector<1x64xf32>
    %c0_83 = arith.constant 0 : index
    %c0_84 = arith.constant 0 : index
    %42 = vector.load %arg44[%c0_83, %c0_84] : memref<1x32xf32, #tpu.memory_space<vmem>>, vector<1x32xf32>
    %c0_85 = arith.constant 0 : index
    %c0_86 = arith.constant 0 : index
    %43 = vector.load %arg45[%c0_85, %c0_86] : memref<1x32xf32, #tpu.memory_space<vmem>>, vector<1x32xf32>
    %c0_87 = arith.constant 0 : index
    %c0_88 = arith.constant 0 : index
    %44 = vector.load %arg46[%c0_87, %c0_88] : memref<1x96xf32, #tpu.memory_space<vmem>>, vector<1x96xf32>
    %c0_89 = arith.constant 0 : index
    %c0_90 = arith.constant 0 : index
    %45 = vector.load %arg47[%c0_89, %c0_90] : memref<1x32xf32, #tpu.memory_space<vmem>>, vector<1x32xf32>
    %c0_91 = arith.constant 0 : index
    %c0_92 = arith.constant 0 : index
    %46 = vector.load %arg48[%c0_91, %c0_92] : memref<1x32xf32, #tpu.memory_space<vmem>>, vector<1x32xf32>
    %c0_93 = arith.constant 0 : index
    %c0_94 = arith.constant 0 : index
    %47 = vector.load %arg49[%c0_93, %c0_94] : memref<1x32xf32, #tpu.memory_space<vmem>>, vector<1x32xf32>
    %c0_95 = arith.constant 0 : index
    %c0_96 = arith.constant 0 : index
    %48 = vector.load %arg50[%c0_95, %c0_96] : memref<1x32xf32, #tpu.memory_space<vmem>>, vector<1x32xf32>
    %c0_97 = arith.constant 0 : index
    %c0_98 = arith.constant 0 : index
    %49 = vector.load %arg51[%c0_97, %c0_98] : memref<32x64xf32, #tpu.memory_space<vmem>>, vector<32x64xf32>
    %c0_99 = arith.constant 0 : index
    %c0_100 = arith.constant 0 : index
    %50 = vector.load %arg52[%c0_99, %c0_100] : memref<64x32xf32, #tpu.memory_space<vmem>>, vector<64x32xf32>
    %c0_101 = arith.constant 0 : index
    %c0_102 = arith.constant 0 : index
    %51 = vector.load %arg53[%c0_101, %c0_102] : memref<32x32xf32, #tpu.memory_space<vmem>>, vector<32x32xf32>
    %c0_103 = arith.constant 0 : index
    %c0_104 = arith.constant 0 : index
    %52 = vector.load %arg54[%c0_103, %c0_104] : memref<32x96xf32, #tpu.memory_space<vmem>>, vector<32x96xf32>
    %c0_105 = arith.constant 0 : index
    %c0_106 = arith.constant 0 : index
    %53 = vector.load %arg55[%c0_105, %c0_106] : memref<32x16xf32, #tpu.memory_space<vmem>>, vector<32x16xf32>
    %c0_107 = arith.constant 0 : index
    %c0_108 = arith.constant 0 : index
    %54 = vector.load %arg0[%c0_107, %c0_108] : memref<16x32xf32, #tpu.memory_space<vmem>>, vector<16x32xf32>
    %cst = arith.constant dense<0.000000e+00> : vector<16x96xf32>
    %55 = tpu.matmul %54, %52, %cst {dimension_numbers = #tpu.dot_dimension_numbers<[1], [0], [0], [1], [0, 0, 1, 1], [], []>} : vector<16x32xf32>, vector<32x96xf32>, vector<16x96xf32> -> vector<16x96xf32>
    %56 = vector.broadcast %44 : vector<1x96xf32> to vector<16x96xf32>
    %57 = arith.addf %55, %56 : vector<16x96xf32>
    %58 = vector.extract_strided_slice %57 {offsets = [0, 0], sizes = [8, 8], strides = [1, 1]} : vector<16x96xf32> to vector<8x8xf32>
    %59 = vector.extract_strided_slice %57 {offsets = [0, 32], sizes = [8, 8], strides = [1, 1]} : vector<16x96xf32> to vector<8x8xf32>
    %60 = vector.extract_strided_slice %57 {offsets = [0, 64], sizes = [8, 8], strides = [1, 1]} : vector<16x96xf32> to vector<8x8xf32>
    %cst_109 = arith.constant dense<0.000000e+00> : vector<8x8xf32>
    %61 = tpu.matmul %58, %59, %cst_109 {dimension_numbers = #tpu.dot_dimension_numbers<[1], [1], [0], [0], [0, 0, 1, 0], [], []>} : vector<8x8xf32>, vector<8x8xf32>, vector<8x8xf32> -> vector<8x8xf32>
    %cst_110 = arith.constant dense<0xFF800000> : vector<8xf32>
    %62 = vector.multi_reduction <maximumf>, %61, %cst_110 [1] : vector<8x8xf32> to vector<8xf32>
    %63 = vector.shape_cast %62 : vector<8xf32> to vector<8x1xf32>
    %64 = vector.broadcast %63 : vector<8x1xf32> to vector<8x8xf32>
    %65 = arith.subf %61, %64 : vector<8x8xf32>
    %66 = math.exp %65 : vector<8x8xf32>
    %cst_111 = arith.constant dense<0.000000e+00> : vector<8xf32>
    %67 = vector.multi_reduction <add>, %66, %cst_111 [1] : vector<8x8xf32> to vector<8xf32>
    %68 = vector.shape_cast %67 : vector<8xf32> to vector<8x1xf32>
    %69 = tpu.reciprocal %68 {approx = true} : vector<8x1xf32> -> vector<8x1xf32>
    %70 = vector.broadcast %69 : vector<8x1xf32> to vector<8x8xf32>
    %71 = arith.mulf %66, %70 : vector<8x8xf32>
    %cst_112 = arith.constant dense<0.000000e+00> : vector<8x8xf32>
    %72 = tpu.matmul %71, %60, %cst_112 {dimension_numbers = #tpu.dot_dimension_numbers<[1], [0], [0], [1], [0, 0, 1, 1], [], []>} : vector<8x8xf32>, vector<8x8xf32>, vector<8x8xf32> -> vector<8x8xf32>
    %73 = vector.extract_strided_slice %57 {offsets = [0, 8], sizes = [8, 8], strides = [1, 1]} : vector<16x96xf32> to vector<8x8xf32>
    %74 = vector.extract_strided_slice %57 {offsets = [0, 40], sizes = [8, 8], strides = [1, 1]} : vector<16x96xf32> to vector<8x8xf32>
    %75 = vector.extract_strided_slice %57 {offsets = [0, 72], sizes = [8, 8], strides = [1, 1]} : vector<16x96xf32> to vector<8x8xf32>
    %cst_113 = arith.constant dense<0.000000e+00> : vector<8x8xf32>
    %76 = tpu.matmul %73, %74, %cst_113 {dimension_numbers = #tpu.dot_dimension_numbers<[1], [1], [0], [0], [0, 0, 1, 0], [], []>} : vector<8x8xf32>, vector<8x8xf32>, vector<8x8xf32> -> vector<8x8xf32>
    %cst_114 = arith.constant dense<0xFF800000> : vector<8xf32>
    %77 = vector.multi_reduction <maximumf>, %76, %cst_114 [1] : vector<8x8xf32> to vector<8xf32>
    %78 = vector.shape_cast %77 : vector<8xf32> to vector<8x1xf32>
    %79 = vector.broadcast %78 : vector<8x1xf32> to vector<8x8xf32>
    %80 = arith.subf %76, %79 : vector<8x8xf32>
    %81 = math.exp %80 : vector<8x8xf32>
    %cst_115 = arith.constant dense<0.000000e+00> : vector<8xf32>
    %82 = vector.multi_reduction <add>, %81, %cst_115 [1] : vector<8x8xf32> to vector<8xf32>
    %83 = vector.shape_cast %82 : vector<8xf32> to vector<8x1xf32>
    %84 = tpu.reciprocal %83 {approx = true} : vector<8x1xf32> -> vector<8x1xf32>
    %85 = vector.broadcast %84 : vector<8x1xf32> to vector<8x8xf32>
    %86 = arith.mulf %81, %85 : vector<8x8xf32>
    %cst_116 = arith.constant dense<0.000000e+00> : vector<8x8xf32>
    %87 = tpu.matmul %86, %75, %cst_116 {dimension_numbers = #tpu.dot_dimension_numbers<[1], [0], [0], [1], [0, 0, 1, 1], [], []>} : vector<8x8xf32>, vector<8x8xf32>, vector<8x8xf32> -> vector<8x8xf32>
    %88 = vector.extract_strided_slice %57 {offsets = [0, 16], sizes = [8, 8], strides = [1, 1]} : vector<16x96xf32> to vector<8x8xf32>
    %89 = vector.extract_strided_slice %57 {offsets = [0, 48], sizes = [8, 8], strides = [1, 1]} : vector<16x96xf32> to vector<8x8xf32>
    %90 = vector.extract_strided_slice %57 {offsets = [0, 80], sizes = [8, 8], strides = [1, 1]} : vector<16x96xf32> to vector<8x8xf32>
    %cst_117 = arith.constant dense<0.000000e+00> : vector<8x8xf32>
    %91 = tpu.matmul %88, %89, %cst_117 {dimension_numbers = #tpu.dot_dimension_numbers<[1], [1], [0], [0], [0, 0, 1, 0], [], []>} : vector<8x8xf32>, vector<8x8xf32>, vector<8x8xf32> -> vector<8x8xf32>
    %cst_118 = arith.constant dense<0xFF800000> : vector<8xf32>
    %92 = vector.multi_reduction <maximumf>, %91, %cst_118 [1] : vector<8x8xf32> to vector<8xf32>
    %93 = vector.shape_cast %92 : vector<8xf32> to vector<8x1xf32>
    %94 = vector.broadcast %93 : vector<8x1xf32> to vector<8x8xf32>
    %95 = arith.subf %91, %94 : vector<8x8xf32>
    %96 = math.exp %95 : vector<8x8xf32>
    %cst_119 = arith.constant dense<0.000000e+00> : vector<8xf32>
    %97 = vector.multi_reduction <add>, %96, %cst_119 [1] : vector<8x8xf32> to vector<8xf32>
    %98 = vector.shape_cast %97 : vector<8xf32> to vector<8x1xf32>
    %99 = tpu.reciprocal %98 {approx = true} : vector<8x1xf32> -> vector<8x1xf32>
    %100 = vector.broadcast %99 : vector<8x1xf32> to vector<8x8xf32>
    %101 = arith.mulf %96, %100 : vector<8x8xf32>
    %cst_120 = arith.constant dense<0.000000e+00> : vector<8x8xf32>
    %102 = tpu.matmul %101, %90, %cst_120 {dimension_numbers = #tpu.dot_dimension_numbers<[1], [0], [0], [1], [0, 0, 1, 1], [], []>} : vector<8x8xf32>, vector<8x8xf32>, vector<8x8xf32> -> vector<8x8xf32>
    %103 = vector.extract_strided_slice %57 {offsets = [0, 24], sizes = [8, 8], strides = [1, 1]} : vector<16x96xf32> to vector<8x8xf32>
    %104 = vector.extract_strided_slice %57 {offsets = [0, 56], sizes = [8, 8], strides = [1, 1]} : vector<16x96xf32> to vector<8x8xf32>
    %105 = vector.extract_strided_slice %57 {offsets = [0, 88], sizes = [8, 8], strides = [1, 1]} : vector<16x96xf32> to vector<8x8xf32>
    %cst_121 = arith.constant dense<0.000000e+00> : vector<8x8xf32>
    %106 = tpu.matmul %103, %104, %cst_121 {dimension_numbers = #tpu.dot_dimension_numbers<[1], [1], [0], [0], [0, 0, 1, 0], [], []>} : vector<8x8xf32>, vector<8x8xf32>, vector<8x8xf32> -> vector<8x8xf32>
    %cst_122 = arith.constant dense<0xFF800000> : vector<8xf32>
    %107 = vector.multi_reduction <maximumf>, %106, %cst_122 [1] : vector<8x8xf32> to vector<8xf32>
    %108 = vector.shape_cast %107 : vector<8xf32> to vector<8x1xf32>
    %109 = vector.broadcast %108 : vector<8x1xf32> to vector<8x8xf32>
    %110 = arith.subf %106, %109 : vector<8x8xf32>
    %111 = math.exp %110 : vector<8x8xf32>
    %cst_123 = arith.constant dense<0.000000e+00> : vector<8xf32>
    %112 = vector.multi_reduction <add>, %111, %cst_123 [1] : vector<8x8xf32> to vector<8xf32>
    %113 = vector.shape_cast %112 : vector<8xf32> to vector<8x1xf32>
    %114 = tpu.reciprocal %113 {approx = true} : vector<8x1xf32> -> vector<8x1xf32>
    %115 = vector.broadcast %114 : vector<8x1xf32> to vector<8x8xf32>
    %116 = arith.mulf %111, %115 : vector<8x8xf32>
    %cst_124 = arith.constant dense<0.000000e+00> : vector<8x8xf32>
    %117 = tpu.matmul %116, %105, %cst_124 {dimension_numbers = #tpu.dot_dimension_numbers<[1], [0], [0], [1], [0, 0, 1, 1], [], []>} : vector<8x8xf32>, vector<8x8xf32>, vector<8x8xf32> -> vector<8x8xf32>
    %118 = tpu.concatenate %72, %87, %102, %117 in 1 : vector<8x8xf32>, vector<8x8xf32>, vector<8x8xf32>, vector<8x8xf32> -> vector<8x32xf32>
    %119 = vector.extract_strided_slice %57 {offsets = [8, 0], sizes = [8, 8], strides = [1, 1]} : vector<16x96xf32> to vector<8x8xf32>
    %120 = vector.extract_strided_slice %57 {offsets = [8, 32], sizes = [8, 8], strides = [1, 1]} : vector<16x96xf32> to vector<8x8xf32>
    %121 = vector.extract_strided_slice %57 {offsets = [8, 64], sizes = [8, 8], strides = [1, 1]} : vector<16x96xf32> to vector<8x8xf32>
    %cst_125 = arith.constant dense<0.000000e+00> : vector<8x8xf32>
    %122 = tpu.matmul %119, %120, %cst_125 {dimension_numbers = #tpu.dot_dimension_numbers<[1], [1], [0], [0], [0, 0, 1, 0], [], []>} : vector<8x8xf32>, vector<8x8xf32>, vector<8x8xf32> -> vector<8x8xf32>
    %cst_126 = arith.constant dense<0xFF800000> : vector<8xf32>
    %123 = vector.multi_reduction <maximumf>, %122, %cst_126 [1] : vector<8x8xf32> to vector<8xf32>
    %124 = vector.shape_cast %123 : vector<8xf32> to vector<8x1xf32>
    %125 = vector.broadcast %124 : vector<8x1xf32> to vector<8x8xf32>
    %126 = arith.subf %122, %125 : vector<8x8xf32>
    %127 = math.exp %126 : vector<8x8xf32>
    %cst_127 = arith.constant dense<0.000000e+00> : vector<8xf32>
    %128 = vector.multi_reduction <add>, %127, %cst_127 [1] : vector<8x8xf32> to vector<8xf32>
    %129 = vector.shape_cast %128 : vector<8xf32> to vector<8x1xf32>
    %130 = tpu.reciprocal %129 {approx = true} : vector<8x1xf32> -> vector<8x1xf32>
    %131 = vector.broadcast %130 : vector<8x1xf32> to vector<8x8xf32>
    %132 = arith.mulf %127, %131 : vector<8x8xf32>
    %cst_128 = arith.constant dense<0.000000e+00> : vector<8x8xf32>
    %133 = tpu.matmul %132, %121, %cst_128 {dimension_numbers = #tpu.dot_dimension_numbers<[1], [0], [0], [1], [0, 0, 1, 1], [], []>} : vector<8x8xf32>, vector<8x8xf32>, vector<8x8xf32> -> vector<8x8xf32>
    %134 = vector.extract_strided_slice %57 {offsets = [8, 8], sizes = [8, 8], strides = [1, 1]} : vector<16x96xf32> to vector<8x8xf32>
    %135 = vector.extract_strided_slice %57 {offsets = [8, 40], sizes = [8, 8], strides = [1, 1]} : vector<16x96xf32> to vector<8x8xf32>
    %136 = vector.extract_strided_slice %57 {offsets = [8, 72], sizes = [8, 8], strides = [1, 1]} : vector<16x96xf32> to vector<8x8xf32>
    %cst_129 = arith.constant dense<0.000000e+00> : vector<8x8xf32>
    %137 = tpu.matmul %134, %135, %cst_129 {dimension_numbers = #tpu.dot_dimension_numbers<[1], [1], [0], [0], [0, 0, 1, 0], [], []>} : vector<8x8xf32>, vector<8x8xf32>, vector<8x8xf32> -> vector<8x8xf32>
    %cst_130 = arith.constant dense<0xFF800000> : vector<8xf32>
    %138 = vector.multi_reduction <maximumf>, %137, %cst_130 [1] : vector<8x8xf32> to vector<8xf32>
    %139 = vector.shape_cast %138 : vector<8xf32> to vector<8x1xf32>
    %140 = vector.broadcast %139 : vector<8x1xf32> to vector<8x8xf32>
    %141 = arith.subf %137, %140 : vector<8x8xf32>
    %142 = math.exp %141 : vector<8x8xf32>
    %cst_131 = arith.constant dense<0.000000e+00> : vector<8xf32>
    %143 = vector.multi_reduction <add>, %142, %cst_131 [1] : vector<8x8xf32> to vector<8xf32>
    %144 = vector.shape_cast %143 : vector<8xf32> to vector<8x1xf32>
    %145 = tpu.reciprocal %144 {approx = true} : vector<8x1xf32> -> vector<8x1xf32>
    %146 = vector.broadcast %145 : vector<8x1xf32> to vector<8x8xf32>
    %147 = arith.mulf %142, %146 : vector<8x8xf32>
    %cst_132 = arith.constant dense<0.000000e+00> : vector<8x8xf32>
    %148 = tpu.matmul %147, %136, %cst_132 {dimension_numbers = #tpu.dot_dimension_numbers<[1], [0], [0], [1], [0, 0, 1, 1], [], []>} : vector<8x8xf32>, vector<8x8xf32>, vector<8x8xf32> -> vector<8x8xf32>
    %149 = vector.extract_strided_slice %57 {offsets = [8, 16], sizes = [8, 8], strides = [1, 1]} : vector<16x96xf32> to vector<8x8xf32>
    %150 = vector.extract_strided_slice %57 {offsets = [8, 48], sizes = [8, 8], strides = [1, 1]} : vector<16x96xf32> to vector<8x8xf32>
    %151 = vector.extract_strided_slice %57 {offsets = [8, 80], sizes = [8, 8], strides = [1, 1]} : vector<16x96xf32> to vector<8x8xf32>
    %cst_133 = arith.constant dense<0.000000e+00> : vector<8x8xf32>
    %152 = tpu.matmul %149, %150, %cst_133 {dimension_numbers = #tpu.dot_dimension_numbers<[1], [1], [0], [0], [0, 0, 1, 0], [], []>} : vector<8x8xf32>, vector<8x8xf32>, vector<8x8xf32> -> vector<8x8xf32>
    %cst_134 = arith.constant dense<0xFF800000> : vector<8xf32>
    %153 = vector.multi_reduction <maximumf>, %152, %cst_134 [1] : vector<8x8xf32> to vector<8xf32>
    %154 = vector.shape_cast %153 : vector<8xf32> to vector<8x1xf32>
    %155 = vector.broadcast %154 : vector<8x1xf32> to vector<8x8xf32>
    %156 = arith.subf %152, %155 : vector<8x8xf32>
    %157 = math.exp %156 : vector<8x8xf32>
    %cst_135 = arith.constant dense<0.000000e+00> : vector<8xf32>
    %158 = vector.multi_reduction <add>, %157, %cst_135 [1] : vector<8x8xf32> to vector<8xf32>
    %159 = vector.shape_cast %158 : vector<8xf32> to vector<8x1xf32>
    %160 = tpu.reciprocal %159 {approx = true} : vector<8x1xf32> -> vector<8x1xf32>
    %161 = vector.broadcast %160 : vector<8x1xf32> to vector<8x8xf32>
    %162 = arith.mulf %157, %161 : vector<8x8xf32>
    %cst_136 = arith.constant dense<0.000000e+00> : vector<8x8xf32>
    %163 = tpu.matmul %162, %151, %cst_136 {dimension_numbers = #tpu.dot_dimension_numbers<[1], [0], [0], [1], [0, 0, 1, 1], [], []>} : vector<8x8xf32>, vector<8x8xf32>, vector<8x8xf32> -> vector<8x8xf32>
    %164 = vector.extract_strided_slice %57 {offsets = [8, 24], sizes = [8, 8], strides = [1, 1]} : vector<16x96xf32> to vector<8x8xf32>
    %165 = vector.extract_strided_slice %57 {offsets = [8, 56], sizes = [8, 8], strides = [1, 1]} : vector<16x96xf32> to vector<8x8xf32>
    %166 = vector.extract_strided_slice %57 {offsets = [8, 88], sizes = [8, 8], strides = [1, 1]} : vector<16x96xf32> to vector<8x8xf32>
    %cst_137 = arith.constant dense<0.000000e+00> : vector<8x8xf32>
    %167 = tpu.matmul %164, %165, %cst_137 {dimension_numbers = #tpu.dot_dimension_numbers<[1], [1], [0], [0], [0, 0, 1, 0], [], []>} : vector<8x8xf32>, vector<8x8xf32>, vector<8x8xf32> -> vector<8x8xf32>
    %cst_138 = arith.constant dense<0xFF800000> : vector<8xf32>
    %168 = vector.multi_reduction <maximumf>, %167, %cst_138 [1] : vector<8x8xf32> to vector<8xf32>
    %169 = vector.shape_cast %168 : vector<8xf32> to vector<8x1xf32>
    %170 = vector.broadcast %169 : vector<8x1xf32> to vector<8x8xf32>
    %171 = arith.subf %167, %170 : vector<8x8xf32>
    %172 = math.exp %171 : vector<8x8xf32>
    %cst_139 = arith.constant dense<0.000000e+00> : vector<8xf32>
    %173 = vector.multi_reduction <add>, %172, %cst_139 [1] : vector<8x8xf32> to vector<8xf32>
    %174 = vector.shape_cast %173 : vector<8xf32> to vector<8x1xf32>
    %175 = tpu.reciprocal %174 {approx = true} : vector<8x1xf32> -> vector<8x1xf32>
    %176 = vector.broadcast %175 : vector<8x1xf32> to vector<8x8xf32>
    %177 = arith.mulf %172, %176 : vector<8x8xf32>
    %cst_140 = arith.constant dense<0.000000e+00> : vector<8x8xf32>
    %178 = tpu.matmul %177, %166, %cst_140 {dimension_numbers = #tpu.dot_dimension_numbers<[1], [0], [0], [1], [0, 0, 1, 1], [], []>} : vector<8x8xf32>, vector<8x8xf32>, vector<8x8xf32> -> vector<8x8xf32>
    %179 = tpu.concatenate %133, %148, %163, %178 in 1 : vector<8x8xf32>, vector<8x8xf32>, vector<8x8xf32>, vector<8x8xf32> -> vector<8x32xf32>
    %180 = tpu.concatenate %118, %179 in 0 : vector<8x32xf32>, vector<8x32xf32> -> vector<16x32xf32>
    %cst_141 = arith.constant dense<0.000000e+00> : vector<16x32xf32>
    %181 = tpu.matmul %180, %51, %cst_141 {dimension_numbers = #tpu.dot_dimension_numbers<[1], [0], [0], [1], [0, 0, 1, 1], [], []>} : vector<16x32xf32>, vector<32x32xf32>, vector<16x32xf32> -> vector<16x32xf32>
    %182 = vector.broadcast %43 : vector<1x32xf32> to vector<16x32xf32>
    %183 = arith.addf %181, %182 : vector<16x32xf32>
    %184 = arith.addf %54, %183 : vector<16x32xf32>
    %cst_142 = arith.constant dense<0.000000e+00> : vector<16xf32>
    %185 = vector.multi_reduction <add>, %184, %cst_142 [1] : vector<16x32xf32> to vector<16xf32>
    %186 = vector.shape_cast %185 : vector<16xf32> to vector<16x1xf32>
    %cst_143 = arith.constant 3.200000e+01 : f32
    %187 = vector.broadcast %cst_143 : f32 to vector<16x1xf32>
    %188 = arith.divf %186, %187 : vector<16x1xf32>
    %189 = vector.broadcast %188 : vector<16x1xf32> to vector<16x32xf32>
    %190 = arith.subf %184, %189 : vector<16x32xf32>
    %191 = arith.mulf %190, %190 : vector<16x32xf32>
    %cst_144 = arith.constant dense<0.000000e+00> : vector<16xf32>
    %192 = vector.multi_reduction <add>, %191, %cst_144 [1] : vector<16x32xf32> to vector<16xf32>
    %193 = vector.shape_cast %192 : vector<16xf32> to vector<16x1xf32>
    %cst_145 = arith.constant 3.200000e+01 : f32
    %194 = vector.broadcast %cst_145 : f32 to vector<16x1xf32>
    %195 = arith.divf %193, %194 : vector<16x1xf32>
    %cst_146 = arith.constant 9.99999974E-6 : f32
    %196 = vector.broadcast %cst_146 : f32 to vector<16x1xf32>
    %197 = arith.addf %195, %196 : vector<16x1xf32>
    %198 = math.rsqrt %197 : vector<16x1xf32>
    %199 = vector.broadcast %198 : vector<16x1xf32> to vector<16x32xf32>
    %200 = arith.mulf %190, %199 : vector<16x32xf32>
    %201 = vector.broadcast %46 : vector<1x32xf32> to vector<16x32xf32>
    %202 = arith.mulf %200, %201 : vector<16x32xf32>
    %203 = vector.broadcast %45 : vector<1x32xf32> to vector<16x32xf32>
    %204 = arith.addf %202, %203 : vector<16x32xf32>
    %cst_147 = arith.constant dense<0.000000e+00> : vector<16x64xf32>
    %205 = tpu.matmul %204, %49, %cst_147 {dimension_numbers = #tpu.dot_dimension_numbers<[1], [0], [0], [1], [0, 0, 1, 1], [], []>} : vector<16x32xf32>, vector<32x64xf32>, vector<16x64xf32> -> vector<16x64xf32>
    %206 = vector.broadcast %41 : vector<1x64xf32> to vector<16x64xf32>
    %207 = arith.addf %205, %206 : vector<16x64xf32>
    %cst_148 = arith.constant 0.000000e+00 : f32
    %208 = vector.broadcast %cst_148 : f32 to vector<16x64xf32>
    %209 = arith.maximumf %207, %208 : vector<16x64xf32>
    %cst_149 = arith.constant dense<0.000000e+00> : vector<16x32xf32>
    %210 = tpu.matmul %209, %50, %cst_149 {dimension_numbers = #tpu.dot_dimension_numbers<[1], [0], [0], [1], [0, 0, 1, 1], [], []>} : vector<16x64xf32>, vector<64x32xf32>, vector<16x32xf32> -> vector<16x32xf32>
    %211 = vector.broadcast %42 : vector<1x32xf32> to vector<16x32xf32>
    %212 = arith.addf %210, %211 : vector<16x32xf32>
    %213 = arith.addf %204, %212 : vector<16x32xf32>
    %cst_150 = arith.constant dense<0.000000e+00> : vector<16xf32>
    %214 = vector.multi_reduction <add>, %213, %cst_150 [1] : vector<16x32xf32> to vector<16xf32>
    %215 = vector.shape_cast %214 : vector<16xf32> to vector<16x1xf32>
    %cst_151 = arith.constant 3.200000e+01 : f32
    %216 = vector.broadcast %cst_151 : f32 to vector<16x1xf32>
    %217 = arith.divf %215, %216 : vector<16x1xf32>
    %218 = vector.broadcast %217 : vector<16x1xf32> to vector<16x32xf32>
    %219 = arith.subf %213, %218 : vector<16x32xf32>
    %220 = arith.mulf %219, %219 : vector<16x32xf32>
    %cst_152 = arith.constant dense<0.000000e+00> : vector<16xf32>
    %221 = vector.multi_reduction <add>, %220, %cst_152 [1] : vector<16x32xf32> to vector<16xf32>
    %222 = vector.shape_cast %221 : vector<16xf32> to vector<16x1xf32>
    %cst_153 = arith.constant 3.200000e+01 : f32
    %223 = vector.broadcast %cst_153 : f32 to vector<16x1xf32>
    %224 = arith.divf %222, %223 : vector<16x1xf32>
    %cst_154 = arith.constant 9.99999974E-6 : f32
    %225 = vector.broadcast %cst_154 : f32 to vector<16x1xf32>
    %226 = arith.addf %224, %225 : vector<16x1xf32>
    %227 = math.rsqrt %226 : vector<16x1xf32>
    %228 = vector.broadcast %227 : vector<16x1xf32> to vector<16x32xf32>
    %229 = arith.mulf %219, %228 : vector<16x32xf32>
    %230 = vector.broadcast %48 : vector<1x32xf32> to vector<16x32xf32>
    %231 = arith.mulf %229, %230 : vector<16x32xf32>
    %232 = vector.broadcast %47 : vector<1x32xf32> to vector<16x32xf32>
    %233 = arith.addf %231, %232 : vector<16x32xf32>
    %c0_155 = arith.constant 0 : index
    %c0_156 = arith.constant 0 : index
    %234 = vector.load %arg1[%c0_155, %c0_156] : memref<16x32xf32, #tpu.memory_space<vmem>>, vector<16x32xf32>
    %cst_157 = arith.constant dense<0.000000e+00> : vector<16x96xf32>
    %235 = tpu.matmul %234, %18, %cst_157 {dimension_numbers = #tpu.dot_dimension_numbers<[1], [0], [0], [1], [0, 0, 1, 1], [], []>} : vector<16x32xf32>, vector<32x96xf32>, vector<16x96xf32> -> vector<16x96xf32>
    %236 = vector.broadcast %16 : vector<1x96xf32> to vector<16x96xf32>
    %237 = arith.addf %235, %236 : vector<16x96xf32>
    %238 = vector.extract_strided_slice %237 {offsets = [0, 0], sizes = [8, 8], strides = [1, 1]} : vector<16x96xf32> to vector<8x8xf32>
    %239 = vector.extract_strided_slice %237 {offsets = [0, 32], sizes = [8, 8], strides = [1, 1]} : vector<16x96xf32> to vector<8x8xf32>
    %240 = vector.extract_strided_slice %237 {offsets = [0, 64], sizes = [8, 8], strides = [1, 1]} : vector<16x96xf32> to vector<8x8xf32>
    %cst_158 = arith.constant dense<0.000000e+00> : vector<8x8xf32>
    %241 = tpu.matmul %238, %239, %cst_158 {dimension_numbers = #tpu.dot_dimension_numbers<[1], [1], [0], [0], [0, 0, 1, 0], [], []>} : vector<8x8xf32>, vector<8x8xf32>, vector<8x8xf32> -> vector<8x8xf32>
    %cst_159 = arith.constant dense<0xFF800000> : vector<8xf32>
    %242 = vector.multi_reduction <maximumf>, %241, %cst_159 [1] : vector<8x8xf32> to vector<8xf32>
    %243 = vector.shape_cast %242 : vector<8xf32> to vector<8x1xf32>
    %244 = vector.broadcast %243 : vector<8x1xf32> to vector<8x8xf32>
    %245 = arith.subf %241, %244 : vector<8x8xf32>
    %246 = math.exp %245 : vector<8x8xf32>
    %cst_160 = arith.constant dense<0.000000e+00> : vector<8xf32>
    %247 = vector.multi_reduction <add>, %246, %cst_160 [1] : vector<8x8xf32> to vector<8xf32>
    %248 = vector.shape_cast %247 : vector<8xf32> to vector<8x1xf32>
    %249 = tpu.reciprocal %248 {approx = true} : vector<8x1xf32> -> vector<8x1xf32>
    %250 = vector.broadcast %249 : vector<8x1xf32> to vector<8x8xf32>
    %251 = arith.mulf %246, %250 : vector<8x8xf32>
    %cst_161 = arith.constant dense<0.000000e+00> : vector<8x8xf32>
    %252 = tpu.matmul %251, %240, %cst_161 {dimension_numbers = #tpu.dot_dimension_numbers<[1], [0], [0], [1], [0, 0, 1, 1], [], []>} : vector<8x8xf32>, vector<8x8xf32>, vector<8x8xf32> -> vector<8x8xf32>
    %253 = vector.extract_strided_slice %237 {offsets = [0, 8], sizes = [8, 8], strides = [1, 1]} : vector<16x96xf32> to vector<8x8xf32>
    %254 = vector.extract_strided_slice %237 {offsets = [0, 40], sizes = [8, 8], strides = [1, 1]} : vector<16x96xf32> to vector<8x8xf32>
    %255 = vector.extract_strided_slice %237 {offsets = [0, 72], sizes = [8, 8], strides = [1, 1]} : vector<16x96xf32> to vector<8x8xf32>
    %cst_162 = arith.constant dense<0.000000e+00> : vector<8x8xf32>
    %256 = tpu.matmul %253, %254, %cst_162 {dimension_numbers = #tpu.dot_dimension_numbers<[1], [1], [0], [0], [0, 0, 1, 0], [], []>} : vector<8x8xf32>, vector<8x8xf32>, vector<8x8xf32> -> vector<8x8xf32>
    %cst_163 = arith.constant dense<0xFF800000> : vector<8xf32>
    %257 = vector.multi_reduction <maximumf>, %256, %cst_163 [1] : vector<8x8xf32> to vector<8xf32>
    %258 = vector.shape_cast %257 : vector<8xf32> to vector<8x1xf32>
    %259 = vector.broadcast %258 : vector<8x1xf32> to vector<8x8xf32>
    %260 = arith.subf %256, %259 : vector<8x8xf32>
    %261 = math.exp %260 : vector<8x8xf32>
    %cst_164 = arith.constant dense<0.000000e+00> : vector<8xf32>
    %262 = vector.multi_reduction <add>, %261, %cst_164 [1] : vector<8x8xf32> to vector<8xf32>
    %263 = vector.shape_cast %262 : vector<8xf32> to vector<8x1xf32>
    %264 = tpu.reciprocal %263 {approx = true} : vector<8x1xf32> -> vector<8x1xf32>
    %265 = vector.broadcast %264 : vector<8x1xf32> to vector<8x8xf32>
    %266 = arith.mulf %261, %265 : vector<8x8xf32>
    %cst_165 = arith.constant dense<0.000000e+00> : vector<8x8xf32>
    %267 = tpu.matmul %266, %255, %cst_165 {dimension_numbers = #tpu.dot_dimension_numbers<[1], [0], [0], [1], [0, 0, 1, 1], [], []>} : vector<8x8xf32>, vector<8x8xf32>, vector<8x8xf32> -> vector<8x8xf32>
    %268 = vector.extract_strided_slice %237 {offsets = [0, 16], sizes = [8, 8], strides = [1, 1]} : vector<16x96xf32> to vector<8x8xf32>
    %269 = vector.extract_strided_slice %237 {offsets = [0, 48], sizes = [8, 8], strides = [1, 1]} : vector<16x96xf32> to vector<8x8xf32>
    %270 = vector.extract_strided_slice %237 {offsets = [0, 80], sizes = [8, 8], strides = [1, 1]} : vector<16x96xf32> to vector<8x8xf32>
    %cst_166 = arith.constant dense<0.000000e+00> : vector<8x8xf32>
    %271 = tpu.matmul %268, %269, %cst_166 {dimension_numbers = #tpu.dot_dimension_numbers<[1], [1], [0], [0], [0, 0, 1, 0], [], []>} : vector<8x8xf32>, vector<8x8xf32>, vector<8x8xf32> -> vector<8x8xf32>
    %cst_167 = arith.constant dense<0xFF800000> : vector<8xf32>
    %272 = vector.multi_reduction <maximumf>, %271, %cst_167 [1] : vector<8x8xf32> to vector<8xf32>
    %273 = vector.shape_cast %272 : vector<8xf32> to vector<8x1xf32>
    %274 = vector.broadcast %273 : vector<8x1xf32> to vector<8x8xf32>
    %275 = arith.subf %271, %274 : vector<8x8xf32>
    %276 = math.exp %275 : vector<8x8xf32>
    %cst_168 = arith.constant dense<0.000000e+00> : vector<8xf32>
    %277 = vector.multi_reduction <add>, %276, %cst_168 [1] : vector<8x8xf32> to vector<8xf32>
    %278 = vector.shape_cast %277 : vector<8xf32> to vector<8x1xf32>
    %279 = tpu.reciprocal %278 {approx = true} : vector<8x1xf32> -> vector<8x1xf32>
    %280 = vector.broadcast %279 : vector<8x1xf32> to vector<8x8xf32>
    %281 = arith.mulf %276, %280 : vector<8x8xf32>
    %cst_169 = arith.constant dense<0.000000e+00> : vector<8x8xf32>
    %282 = tpu.matmul %281, %270, %cst_169 {dimension_numbers = #tpu.dot_dimension_numbers<[1], [0], [0], [1], [0, 0, 1, 1], [], []>} : vector<8x8xf32>, vector<8x8xf32>, vector<8x8xf32> -> vector<8x8xf32>
    %283 = vector.extract_strided_slice %237 {offsets = [0, 24], sizes = [8, 8], strides = [1, 1]} : vector<16x96xf32> to vector<8x8xf32>
    %284 = vector.extract_strided_slice %237 {offsets = [0, 56], sizes = [8, 8], strides = [1, 1]} : vector<16x96xf32> to vector<8x8xf32>
    %285 = vector.extract_strided_slice %237 {offsets = [0, 88], sizes = [8, 8], strides = [1, 1]} : vector<16x96xf32> to vector<8x8xf32>
    %cst_170 = arith.constant dense<0.000000e+00> : vector<8x8xf32>
    %286 = tpu.matmul %283, %284, %cst_170 {dimension_numbers = #tpu.dot_dimension_numbers<[1], [1], [0], [0], [0, 0, 1, 0], [], []>} : vector<8x8xf32>, vector<8x8xf32>, vector<8x8xf32> -> vector<8x8xf32>
    %cst_171 = arith.constant dense<0xFF800000> : vector<8xf32>
    %287 = vector.multi_reduction <maximumf>, %286, %cst_171 [1] : vector<8x8xf32> to vector<8xf32>
    %288 = vector.shape_cast %287 : vector<8xf32> to vector<8x1xf32>
    %289 = vector.broadcast %288 : vector<8x1xf32> to vector<8x8xf32>
    %290 = arith.subf %286, %289 : vector<8x8xf32>
    %291 = math.exp %290 : vector<8x8xf32>
    %cst_172 = arith.constant dense<0.000000e+00> : vector<8xf32>
    %292 = vector.multi_reduction <add>, %291, %cst_172 [1] : vector<8x8xf32> to vector<8xf32>
    %293 = vector.shape_cast %292 : vector<8xf32> to vector<8x1xf32>
    %294 = tpu.reciprocal %293 {approx = true} : vector<8x1xf32> -> vector<8x1xf32>
    %295 = vector.broadcast %294 : vector<8x1xf32> to vector<8x8xf32>
    %296 = arith.mulf %291, %295 : vector<8x8xf32>
    %cst_173 = arith.constant dense<0.000000e+00> : vector<8x8xf32>
    %297 = tpu.matmul %296, %285, %cst_173 {dimension_numbers = #tpu.dot_dimension_numbers<[1], [0], [0], [1], [0, 0, 1, 1], [], []>} : vector<8x8xf32>, vector<8x8xf32>, vector<8x8xf32> -> vector<8x8xf32>
    %298 = tpu.concatenate %252, %267, %282, %297 in 1 : vector<8x8xf32>, vector<8x8xf32>, vector<8x8xf32>, vector<8x8xf32> -> vector<8x32xf32>
    %299 = vector.extract_strided_slice %237 {offsets = [8, 0], sizes = [8, 8], strides = [1, 1]} : vector<16x96xf32> to vector<8x8xf32>
    %300 = vector.extract_strided_slice %237 {offsets = [8, 32], sizes = [8, 8], strides = [1, 1]} : vector<16x96xf32> to vector<8x8xf32>
    %301 = vector.extract_strided_slice %237 {offsets = [8, 64], sizes = [8, 8], strides = [1, 1]} : vector<16x96xf32> to vector<8x8xf32>
    %cst_174 = arith.constant dense<0.000000e+00> : vector<8x8xf32>
    %302 = tpu.matmul %299, %300, %cst_174 {dimension_numbers = #tpu.dot_dimension_numbers<[1], [1], [0], [0], [0, 0, 1, 0], [], []>} : vector<8x8xf32>, vector<8x8xf32>, vector<8x8xf32> -> vector<8x8xf32>
    %cst_175 = arith.constant dense<0xFF800000> : vector<8xf32>
    %303 = vector.multi_reduction <maximumf>, %302, %cst_175 [1] : vector<8x8xf32> to vector<8xf32>
    %304 = vector.shape_cast %303 : vector<8xf32> to vector<8x1xf32>
    %305 = vector.broadcast %304 : vector<8x1xf32> to vector<8x8xf32>
    %306 = arith.subf %302, %305 : vector<8x8xf32>
    %307 = math.exp %306 : vector<8x8xf32>
    %cst_176 = arith.constant dense<0.000000e+00> : vector<8xf32>
    %308 = vector.multi_reduction <add>, %307, %cst_176 [1] : vector<8x8xf32> to vector<8xf32>
    %309 = vector.shape_cast %308 : vector<8xf32> to vector<8x1xf32>
    %310 = tpu.reciprocal %309 {approx = true} : vector<8x1xf32> -> vector<8x1xf32>
    %311 = vector.broadcast %310 : vector<8x1xf32> to vector<8x8xf32>
    %312 = arith.mulf %307, %311 : vector<8x8xf32>
    %cst_177 = arith.constant dense<0.000000e+00> : vector<8x8xf32>
    %313 = tpu.matmul %312, %301, %cst_177 {dimension_numbers = #tpu.dot_dimension_numbers<[1], [0], [0], [1], [0, 0, 1, 1], [], []>} : vector<8x8xf32>, vector<8x8xf32>, vector<8x8xf32> -> vector<8x8xf32>
    %314 = vector.extract_strided_slice %237 {offsets = [8, 8], sizes = [8, 8], strides = [1, 1]} : vector<16x96xf32> to vector<8x8xf32>
    %315 = vector.extract_strided_slice %237 {offsets = [8, 40], sizes = [8, 8], strides = [1, 1]} : vector<16x96xf32> to vector<8x8xf32>
    %316 = vector.extract_strided_slice %237 {offsets = [8, 72], sizes = [8, 8], strides = [1, 1]} : vector<16x96xf32> to vector<8x8xf32>
    %cst_178 = arith.constant dense<0.000000e+00> : vector<8x8xf32>
    %317 = tpu.matmul %314, %315, %cst_178 {dimension_numbers = #tpu.dot_dimension_numbers<[1], [1], [0], [0], [0, 0, 1, 0], [], []>} : vector<8x8xf32>, vector<8x8xf32>, vector<8x8xf32> -> vector<8x8xf32>
    %cst_179 = arith.constant dense<0xFF800000> : vector<8xf32>
    %318 = vector.multi_reduction <maximumf>, %317, %cst_179 [1] : vector<8x8xf32> to vector<8xf32>
    %319 = vector.shape_cast %318 : vector<8xf32> to vector<8x1xf32>
    %320 = vector.broadcast %319 : vector<8x1xf32> to vector<8x8xf32>
    %321 = arith.subf %317, %320 : vector<8x8xf32>
    %322 = math.exp %321 : vector<8x8xf32>
    %cst_180 = arith.constant dense<0.000000e+00> : vector<8xf32>
    %323 = vector.multi_reduction <add>, %322, %cst_180 [1] : vector<8x8xf32> to vector<8xf32>
    %324 = vector.shape_cast %323 : vector<8xf32> to vector<8x1xf32>
    %325 = tpu.reciprocal %324 {approx = true} : vector<8x1xf32> -> vector<8x1xf32>
    %326 = vector.broadcast %325 : vector<8x1xf32> to vector<8x8xf32>
    %327 = arith.mulf %322, %326 : vector<8x8xf32>
    %cst_181 = arith.constant dense<0.000000e+00> : vector<8x8xf32>
    %328 = tpu.matmul %327, %316, %cst_181 {dimension_numbers = #tpu.dot_dimension_numbers<[1], [0], [0], [1], [0, 0, 1, 1], [], []>} : vector<8x8xf32>, vector<8x8xf32>, vector<8x8xf32> -> vector<8x8xf32>
    %329 = vector.extract_strided_slice %237 {offsets = [8, 16], sizes = [8, 8], strides = [1, 1]} : vector<16x96xf32> to vector<8x8xf32>
    %330 = vector.extract_strided_slice %237 {offsets = [8, 48], sizes = [8, 8], strides = [1, 1]} : vector<16x96xf32> to vector<8x8xf32>
    %331 = vector.extract_strided_slice %237 {offsets = [8, 80], sizes = [8, 8], strides = [1, 1]} : vector<16x96xf32> to vector<8x8xf32>
    %cst_182 = arith.constant dense<0.000000e+00> : vector<8x8xf32>
    %332 = tpu.matmul %329, %330, %cst_182 {dimension_numbers = #tpu.dot_dimension_numbers<[1], [1], [0], [0], [0, 0, 1, 0], [], []>} : vector<8x8xf32>, vector<8x8xf32>, vector<8x8xf32> -> vector<8x8xf32>
    %cst_183 = arith.constant dense<0xFF800000> : vector<8xf32>
    %333 = vector.multi_reduction <maximumf>, %332, %cst_183 [1] : vector<8x8xf32> to vector<8xf32>
    %334 = vector.shape_cast %333 : vector<8xf32> to vector<8x1xf32>
    %335 = vector.broadcast %334 : vector<8x1xf32> to vector<8x8xf32>
    %336 = arith.subf %332, %335 : vector<8x8xf32>
    %337 = math.exp %336 : vector<8x8xf32>
    %cst_184 = arith.constant dense<0.000000e+00> : vector<8xf32>
    %338 = vector.multi_reduction <add>, %337, %cst_184 [1] : vector<8x8xf32> to vector<8xf32>
    %339 = vector.shape_cast %338 : vector<8xf32> to vector<8x1xf32>
    %340 = tpu.reciprocal %339 {approx = true} : vector<8x1xf32> -> vector<8x1xf32>
    %341 = vector.broadcast %340 : vector<8x1xf32> to vector<8x8xf32>
    %342 = arith.mulf %337, %341 : vector<8x8xf32>
    %cst_185 = arith.constant dense<0.000000e+00> : vector<8x8xf32>
    %343 = tpu.matmul %342, %331, %cst_185 {dimension_numbers = #tpu.dot_dimension_numbers<[1], [0], [0], [1], [0, 0, 1, 1], [], []>} : vector<8x8xf32>, vector<8x8xf32>, vector<8x8xf32> -> vector<8x8xf32>
    %344 = vector.extract_strided_slice %237 {offsets = [8, 24], sizes = [8, 8], strides = [1, 1]} : vector<16x96xf32> to vector<8x8xf32>
    %345 = vector.extract_strided_slice %237 {offsets = [8, 56], sizes = [8, 8], strides = [1, 1]} : vector<16x96xf32> to vector<8x8xf32>
    %346 = vector.extract_strided_slice %237 {offsets = [8, 88], sizes = [8, 8], strides = [1, 1]} : vector<16x96xf32> to vector<8x8xf32>
    %cst_186 = arith.constant dense<0.000000e+00> : vector<8x8xf32>
    %347 = tpu.matmul %344, %345, %cst_186 {dimension_numbers = #tpu.dot_dimension_numbers<[1], [1], [0], [0], [0, 0, 1, 0], [], []>} : vector<8x8xf32>, vector<8x8xf32>, vector<8x8xf32> -> vector<8x8xf32>
    %cst_187 = arith.constant dense<0xFF800000> : vector<8xf32>
    %348 = vector.multi_reduction <maximumf>, %347, %cst_187 [1] : vector<8x8xf32> to vector<8xf32>
    %349 = vector.shape_cast %348 : vector<8xf32> to vector<8x1xf32>
    %350 = vector.broadcast %349 : vector<8x1xf32> to vector<8x8xf32>
    %351 = arith.subf %347, %350 : vector<8x8xf32>
    %352 = math.exp %351 : vector<8x8xf32>
    %cst_188 = arith.constant dense<0.000000e+00> : vector<8xf32>
    %353 = vector.multi_reduction <add>, %352, %cst_188 [1] : vector<8x8xf32> to vector<8xf32>
    %354 = vector.shape_cast %353 : vector<8xf32> to vector<8x1xf32>
    %355 = tpu.reciprocal %354 {approx = true} : vector<8x1xf32> -> vector<8x1xf32>
    %356 = vector.broadcast %355 : vector<8x1xf32> to vector<8x8xf32>
    %357 = arith.mulf %352, %356 : vector<8x8xf32>
    %cst_189 = arith.constant dense<0.000000e+00> : vector<8x8xf32>
    %358 = tpu.matmul %357, %346, %cst_189 {dimension_numbers = #tpu.dot_dimension_numbers<[1], [0], [0], [1], [0, 0, 1, 1], [], []>} : vector<8x8xf32>, vector<8x8xf32>, vector<8x8xf32> -> vector<8x8xf32>
    %359 = tpu.concatenate %313, %328, %343, %358 in 1 : vector<8x8xf32>, vector<8x8xf32>, vector<8x8xf32>, vector<8x8xf32> -> vector<8x32xf32>
    %360 = tpu.concatenate %298, %359 in 0 : vector<8x32xf32>, vector<8x32xf32> -> vector<16x32xf32>
    %cst_190 = arith.constant dense<0.000000e+00> : vector<16x32xf32>
    %361 = tpu.matmul %360, %17, %cst_190 {dimension_numbers = #tpu.dot_dimension_numbers<[1], [0], [0], [1], [0, 0, 1, 1], [], []>} : vector<16x32xf32>, vector<32x32xf32>, vector<16x32xf32> -> vector<16x32xf32>
    %362 = vector.broadcast %15 : vector<1x32xf32> to vector<16x32xf32>
    %363 = arith.addf %361, %362 : vector<16x32xf32>
    %364 = arith.addf %234, %363 : vector<16x32xf32>
    %cst_191 = arith.constant dense<0.000000e+00> : vector<16xf32>
    %365 = vector.multi_reduction <add>, %364, %cst_191 [1] : vector<16x32xf32> to vector<16xf32>
    %366 = vector.shape_cast %365 : vector<16xf32> to vector<16x1xf32>
    %cst_192 = arith.constant 3.200000e+01 : f32
    %367 = vector.broadcast %cst_192 : f32 to vector<16x1xf32>
    %368 = arith.divf %366, %367 : vector<16x1xf32>
    %369 = vector.broadcast %368 : vector<16x1xf32> to vector<16x32xf32>
    %370 = arith.subf %364, %369 : vector<16x32xf32>
    %371 = arith.mulf %370, %370 : vector<16x32xf32>
    %cst_193 = arith.constant dense<0.000000e+00> : vector<16xf32>
    %372 = vector.multi_reduction <add>, %371, %cst_193 [1] : vector<16x32xf32> to vector<16xf32>
    %373 = vector.shape_cast %372 : vector<16xf32> to vector<16x1xf32>
    %cst_194 = arith.constant 3.200000e+01 : f32
    %374 = vector.broadcast %cst_194 : f32 to vector<16x1xf32>
    %375 = arith.divf %373, %374 : vector<16x1xf32>
    %cst_195 = arith.constant 9.99999974E-6 : f32
    %376 = vector.broadcast %cst_195 : f32 to vector<16x1xf32>
    %377 = arith.addf %375, %376 : vector<16x1xf32>
    %378 = math.rsqrt %377 : vector<16x1xf32>
    %379 = vector.broadcast %378 : vector<16x1xf32> to vector<16x32xf32>
    %380 = arith.mulf %370, %379 : vector<16x32xf32>
    %381 = vector.broadcast %10 : vector<1x32xf32> to vector<16x32xf32>
    %382 = arith.mulf %380, %381 : vector<16x32xf32>
    %383 = vector.broadcast %9 : vector<1x32xf32> to vector<16x32xf32>
    %384 = arith.addf %382, %383 : vector<16x32xf32>
    %cst_196 = arith.constant dense<0.000000e+00> : vector<16x32xf32>
    %385 = tpu.matmul %384, %8, %cst_196 {dimension_numbers = #tpu.dot_dimension_numbers<[1], [0], [0], [1], [0, 0, 1, 1], [], []>} : vector<16x32xf32>, vector<32x32xf32>, vector<16x32xf32> -> vector<16x32xf32>
    %386 = vector.broadcast %5 : vector<1x32xf32> to vector<16x32xf32>
    %387 = arith.addf %385, %386 : vector<16x32xf32>
    %cst_197 = arith.constant dense<0.000000e+00> : vector<16x64xf32>
    %388 = tpu.matmul %233, %6, %cst_197 {dimension_numbers = #tpu.dot_dimension_numbers<[1], [0], [0], [1], [0, 0, 1, 1], [], []>} : vector<16x32xf32>, vector<32x64xf32>, vector<16x64xf32> -> vector<16x64xf32>
    %389 = vector.broadcast %3 : vector<1x64xf32> to vector<16x64xf32>
    %390 = arith.addf %388, %389 : vector<16x64xf32>
    %391 = vector.extract_strided_slice %387 {offsets = [0, 0], sizes = [8, 8], strides = [1, 1]} : vector<16x32xf32> to vector<8x8xf32>
    %392 = vector.extract_strided_slice %390 {offsets = [0, 0], sizes = [8, 8], strides = [1, 1]} : vector<16x64xf32> to vector<8x8xf32>
    %393 = vector.extract_strided_slice %390 {offsets = [0, 32], sizes = [8, 8], strides = [1, 1]} : vector<16x64xf32> to vector<8x8xf32>
    %cst_198 = arith.constant dense<0.000000e+00> : vector<8x8xf32>
    %394 = tpu.matmul %391, %392, %cst_198 {dimension_numbers = #tpu.dot_dimension_numbers<[1], [1], [0], [0], [0, 0, 1, 0], [], []>} : vector<8x8xf32>, vector<8x8xf32>, vector<8x8xf32> -> vector<8x8xf32>
    %cst_199 = arith.constant dense<0xFF800000> : vector<8xf32>
    %395 = vector.multi_reduction <maximumf>, %394, %cst_199 [1] : vector<8x8xf32> to vector<8xf32>
    %396 = vector.shape_cast %395 : vector<8xf32> to vector<8x1xf32>
    %397 = vector.broadcast %396 : vector<8x1xf32> to vector<8x8xf32>
    %398 = arith.subf %394, %397 : vector<8x8xf32>
    %399 = math.exp %398 : vector<8x8xf32>
    %cst_200 = arith.constant dense<0.000000e+00> : vector<8xf32>
    %400 = vector.multi_reduction <add>, %399, %cst_200 [1] : vector<8x8xf32> to vector<8xf32>
    %401 = vector.shape_cast %400 : vector<8xf32> to vector<8x1xf32>
    %402 = tpu.reciprocal %401 {approx = true} : vector<8x1xf32> -> vector<8x1xf32>
    %403 = vector.broadcast %402 : vector<8x1xf32> to vector<8x8xf32>
    %404 = arith.mulf %399, %403 : vector<8x8xf32>
    %cst_201 = arith.constant dense<0.000000e+00> : vector<8x8xf32>
    %405 = tpu.matmul %404, %393, %cst_201 {dimension_numbers = #tpu.dot_dimension_numbers<[1], [0], [0], [1], [0, 0, 1, 1], [], []>} : vector<8x8xf32>, vector<8x8xf32>, vector<8x8xf32> -> vector<8x8xf32>
    %406 = vector.extract_strided_slice %387 {offsets = [0, 8], sizes = [8, 8], strides = [1, 1]} : vector<16x32xf32> to vector<8x8xf32>
    %407 = vector.extract_strided_slice %390 {offsets = [0, 8], sizes = [8, 8], strides = [1, 1]} : vector<16x64xf32> to vector<8x8xf32>
    %408 = vector.extract_strided_slice %390 {offsets = [0, 40], sizes = [8, 8], strides = [1, 1]} : vector<16x64xf32> to vector<8x8xf32>
    %cst_202 = arith.constant dense<0.000000e+00> : vector<8x8xf32>
    %409 = tpu.matmul %406, %407, %cst_202 {dimension_numbers = #tpu.dot_dimension_numbers<[1], [1], [0], [0], [0, 0, 1, 0], [], []>} : vector<8x8xf32>, vector<8x8xf32>, vector<8x8xf32> -> vector<8x8xf32>
    %cst_203 = arith.constant dense<0xFF800000> : vector<8xf32>
    %410 = vector.multi_reduction <maximumf>, %409, %cst_203 [1] : vector<8x8xf32> to vector<8xf32>
    %411 = vector.shape_cast %410 : vector<8xf32> to vector<8x1xf32>
    %412 = vector.broadcast %411 : vector<8x1xf32> to vector<8x8xf32>
    %413 = arith.subf %409, %412 : vector<8x8xf32>
    %414 = math.exp %413 : vector<8x8xf32>
    %cst_204 = arith.constant dense<0.000000e+00> : vector<8xf32>
    %415 = vector.multi_reduction <add>, %414, %cst_204 [1] : vector<8x8xf32> to vector<8xf32>
    %416 = vector.shape_cast %415 : vector<8xf32> to vector<8x1xf32>
    %417 = tpu.reciprocal %416 {approx = true} : vector<8x1xf32> -> vector<8x1xf32>
    %418 = vector.broadcast %417 : vector<8x1xf32> to vector<8x8xf32>
    %419 = arith.mulf %414, %418 : vector<8x8xf32>
    %cst_205 = arith.constant dense<0.000000e+00> : vector<8x8xf32>
    %420 = tpu.matmul %419, %408, %cst_205 {dimension_numbers = #tpu.dot_dimension_numbers<[1], [0], [0], [1], [0, 0, 1, 1], [], []>} : vector<8x8xf32>, vector<8x8xf32>, vector<8x8xf32> -> vector<8x8xf32>
    %421 = vector.extract_strided_slice %387 {offsets = [0, 16], sizes = [8, 8], strides = [1, 1]} : vector<16x32xf32> to vector<8x8xf32>
    %422 = vector.extract_strided_slice %390 {offsets = [0, 16], sizes = [8, 8], strides = [1, 1]} : vector<16x64xf32> to vector<8x8xf32>
    %423 = vector.extract_strided_slice %390 {offsets = [0, 48], sizes = [8, 8], strides = [1, 1]} : vector<16x64xf32> to vector<8x8xf32>
    %cst_206 = arith.constant dense<0.000000e+00> : vector<8x8xf32>
    %424 = tpu.matmul %421, %422, %cst_206 {dimension_numbers = #tpu.dot_dimension_numbers<[1], [1], [0], [0], [0, 0, 1, 0], [], []>} : vector<8x8xf32>, vector<8x8xf32>, vector<8x8xf32> -> vector<8x8xf32>
    %cst_207 = arith.constant dense<0xFF800000> : vector<8xf32>
    %425 = vector.multi_reduction <maximumf>, %424, %cst_207 [1] : vector<8x8xf32> to vector<8xf32>
    %426 = vector.shape_cast %425 : vector<8xf32> to vector<8x1xf32>
    %427 = vector.broadcast %426 : vector<8x1xf32> to vector<8x8xf32>
    %428 = arith.subf %424, %427 : vector<8x8xf32>
    %429 = math.exp %428 : vector<8x8xf32>
    %cst_208 = arith.constant dense<0.000000e+00> : vector<8xf32>
    %430 = vector.multi_reduction <add>, %429, %cst_208 [1] : vector<8x8xf32> to vector<8xf32>
    %431 = vector.shape_cast %430 : vector<8xf32> to vector<8x1xf32>
    %432 = tpu.reciprocal %431 {approx = true} : vector<8x1xf32> -> vector<8x1xf32>
    %433 = vector.broadcast %432 : vector<8x1xf32> to vector<8x8xf32>
    %434 = arith.mulf %429, %433 : vector<8x8xf32>
    %cst_209 = arith.constant dense<0.000000e+00> : vector<8x8xf32>
    %435 = tpu.matmul %434, %423, %cst_209 {dimension_numbers = #tpu.dot_dimension_numbers<[1], [0], [0], [1], [0, 0, 1, 1], [], []>} : vector<8x8xf32>, vector<8x8xf32>, vector<8x8xf32> -> vector<8x8xf32>
    %436 = vector.extract_strided_slice %387 {offsets = [0, 24], sizes = [8, 8], strides = [1, 1]} : vector<16x32xf32> to vector<8x8xf32>
    %437 = vector.extract_strided_slice %390 {offsets = [0, 24], sizes = [8, 8], strides = [1, 1]} : vector<16x64xf32> to vector<8x8xf32>
    %438 = vector.extract_strided_slice %390 {offsets = [0, 56], sizes = [8, 8], strides = [1, 1]} : vector<16x64xf32> to vector<8x8xf32>
    %cst_210 = arith.constant dense<0.000000e+00> : vector<8x8xf32>
    %439 = tpu.matmul %436, %437, %cst_210 {dimension_numbers = #tpu.dot_dimension_numbers<[1], [1], [0], [0], [0, 0, 1, 0], [], []>} : vector<8x8xf32>, vector<8x8xf32>, vector<8x8xf32> -> vector<8x8xf32>
    %cst_211 = arith.constant dense<0xFF800000> : vector<8xf32>
    %440 = vector.multi_reduction <maximumf>, %439, %cst_211 [1] : vector<8x8xf32> to vector<8xf32>
    %441 = vector.shape_cast %440 : vector<8xf32> to vector<8x1xf32>
    %442 = vector.broadcast %441 : vector<8x1xf32> to vector<8x8xf32>
    %443 = arith.subf %439, %442 : vector<8x8xf32>
    %444 = math.exp %443 : vector<8x8xf32>
    %cst_212 = arith.constant dense<0.000000e+00> : vector<8xf32>
    %445 = vector.multi_reduction <add>, %444, %cst_212 [1] : vector<8x8xf32> to vector<8xf32>
    %446 = vector.shape_cast %445 : vector<8xf32> to vector<8x1xf32>
    %447 = tpu.reciprocal %446 {approx = true} : vector<8x1xf32> -> vector<8x1xf32>
    %448 = vector.broadcast %447 : vector<8x1xf32> to vector<8x8xf32>
    %449 = arith.mulf %444, %448 : vector<8x8xf32>
    %cst_213 = arith.constant dense<0.000000e+00> : vector<8x8xf32>
    %450 = tpu.matmul %449, %438, %cst_213 {dimension_numbers = #tpu.dot_dimension_numbers<[1], [0], [0], [1], [0, 0, 1, 1], [], []>} : vector<8x8xf32>, vector<8x8xf32>, vector<8x8xf32> -> vector<8x8xf32>
    %451 = tpu.concatenate %405, %420, %435, %450 in 1 : vector<8x8xf32>, vector<8x8xf32>, vector<8x8xf32>, vector<8x8xf32> -> vector<8x32xf32>
    %452 = vector.extract_strided_slice %387 {offsets = [8, 0], sizes = [8, 8], strides = [1, 1]} : vector<16x32xf32> to vector<8x8xf32>
    %453 = vector.extract_strided_slice %390 {offsets = [8, 0], sizes = [8, 8], strides = [1, 1]} : vector<16x64xf32> to vector<8x8xf32>
    %454 = vector.extract_strided_slice %390 {offsets = [8, 32], sizes = [8, 8], strides = [1, 1]} : vector<16x64xf32> to vector<8x8xf32>
    %cst_214 = arith.constant dense<0.000000e+00> : vector<8x8xf32>
    %455 = tpu.matmul %452, %453, %cst_214 {dimension_numbers = #tpu.dot_dimension_numbers<[1], [1], [0], [0], [0, 0, 1, 0], [], []>} : vector<8x8xf32>, vector<8x8xf32>, vector<8x8xf32> -> vector<8x8xf32>
    %cst_215 = arith.constant dense<0xFF800000> : vector<8xf32>
    %456 = vector.multi_reduction <maximumf>, %455, %cst_215 [1] : vector<8x8xf32> to vector<8xf32>
    %457 = vector.shape_cast %456 : vector<8xf32> to vector<8x1xf32>
    %458 = vector.broadcast %457 : vector<8x1xf32> to vector<8x8xf32>
    %459 = arith.subf %455, %458 : vector<8x8xf32>
    %460 = math.exp %459 : vector<8x8xf32>
    %cst_216 = arith.constant dense<0.000000e+00> : vector<8xf32>
    %461 = vector.multi_reduction <add>, %460, %cst_216 [1] : vector<8x8xf32> to vector<8xf32>
    %462 = vector.shape_cast %461 : vector<8xf32> to vector<8x1xf32>
    %463 = tpu.reciprocal %462 {approx = true} : vector<8x1xf32> -> vector<8x1xf32>
    %464 = vector.broadcast %463 : vector<8x1xf32> to vector<8x8xf32>
    %465 = arith.mulf %460, %464 : vector<8x8xf32>
    %cst_217 = arith.constant dense<0.000000e+00> : vector<8x8xf32>
    %466 = tpu.matmul %465, %454, %cst_217 {dimension_numbers = #tpu.dot_dimension_numbers<[1], [0], [0], [1], [0, 0, 1, 1], [], []>} : vector<8x8xf32>, vector<8x8xf32>, vector<8x8xf32> -> vector<8x8xf32>
    %467 = vector.extract_strided_slice %387 {offsets = [8, 8], sizes = [8, 8], strides = [1, 1]} : vector<16x32xf32> to vector<8x8xf32>
    %468 = vector.extract_strided_slice %390 {offsets = [8, 8], sizes = [8, 8], strides = [1, 1]} : vector<16x64xf32> to vector<8x8xf32>
    %469 = vector.extract_strided_slice %390 {offsets = [8, 40], sizes = [8, 8], strides = [1, 1]} : vector<16x64xf32> to vector<8x8xf32>
    %cst_218 = arith.constant dense<0.000000e+00> : vector<8x8xf32>
    %470 = tpu.matmul %467, %468, %cst_218 {dimension_numbers = #tpu.dot_dimension_numbers<[1], [1], [0], [0], [0, 0, 1, 0], [], []>} : vector<8x8xf32>, vector<8x8xf32>, vector<8x8xf32> -> vector<8x8xf32>
    %cst_219 = arith.constant dense<0xFF800000> : vector<8xf32>
    %471 = vector.multi_reduction <maximumf>, %470, %cst_219 [1] : vector<8x8xf32> to vector<8xf32>
    %472 = vector.shape_cast %471 : vector<8xf32> to vector<8x1xf32>
    %473 = vector.broadcast %472 : vector<8x1xf32> to vector<8x8xf32>
    %474 = arith.subf %470, %473 : vector<8x8xf32>
    %475 = math.exp %474 : vector<8x8xf32>
    %cst_220 = arith.constant dense<0.000000e+00> : vector<8xf32>
    %476 = vector.multi_reduction <add>, %475, %cst_220 [1] : vector<8x8xf32> to vector<8xf32>
    %477 = vector.shape_cast %476 : vector<8xf32> to vector<8x1xf32>
    %478 = tpu.reciprocal %477 {approx = true} : vector<8x1xf32> -> vector<8x1xf32>
    %479 = vector.broadcast %478 : vector<8x1xf32> to vector<8x8xf32>
    %480 = arith.mulf %475, %479 : vector<8x8xf32>
    %cst_221 = arith.constant dense<0.000000e+00> : vector<8x8xf32>
    %481 = tpu.matmul %480, %469, %cst_221 {dimension_numbers = #tpu.dot_dimension_numbers<[1], [0], [0], [1], [0, 0, 1, 1], [], []>} : vector<8x8xf32>, vector<8x8xf32>, vector<8x8xf32> -> vector<8x8xf32>
    %482 = vector.extract_strided_slice %387 {offsets = [8, 16], sizes = [8, 8], strides = [1, 1]} : vector<16x32xf32> to vector<8x8xf32>
    %483 = vector.extract_strided_slice %390 {offsets = [8, 16], sizes = [8, 8], strides = [1, 1]} : vector<16x64xf32> to vector<8x8xf32>
    %484 = vector.extract_strided_slice %390 {offsets = [8, 48], sizes = [8, 8], strides = [1, 1]} : vector<16x64xf32> to vector<8x8xf32>
    %cst_222 = arith.constant dense<0.000000e+00> : vector<8x8xf32>
    %485 = tpu.matmul %482, %483, %cst_222 {dimension_numbers = #tpu.dot_dimension_numbers<[1], [1], [0], [0], [0, 0, 1, 0], [], []>} : vector<8x8xf32>, vector<8x8xf32>, vector<8x8xf32> -> vector<8x8xf32>
    %cst_223 = arith.constant dense<0xFF800000> : vector<8xf32>
    %486 = vector.multi_reduction <maximumf>, %485, %cst_223 [1] : vector<8x8xf32> to vector<8xf32>
    %487 = vector.shape_cast %486 : vector<8xf32> to vector<8x1xf32>
    %488 = vector.broadcast %487 : vector<8x1xf32> to vector<8x8xf32>
    %489 = arith.subf %485, %488 : vector<8x8xf32>
    %490 = math.exp %489 : vector<8x8xf32>
    %cst_224 = arith.constant dense<0.000000e+00> : vector<8xf32>
    %491 = vector.multi_reduction <add>, %490, %cst_224 [1] : vector<8x8xf32> to vector<8xf32>
    %492 = vector.shape_cast %491 : vector<8xf32> to vector<8x1xf32>
    %493 = tpu.reciprocal %492 {approx = true} : vector<8x1xf32> -> vector<8x1xf32>
    %494 = vector.broadcast %493 : vector<8x1xf32> to vector<8x8xf32>
    %495 = arith.mulf %490, %494 : vector<8x8xf32>
    %cst_225 = arith.constant dense<0.000000e+00> : vector<8x8xf32>
    %496 = tpu.matmul %495, %484, %cst_225 {dimension_numbers = #tpu.dot_dimension_numbers<[1], [0], [0], [1], [0, 0, 1, 1], [], []>} : vector<8x8xf32>, vector<8x8xf32>, vector<8x8xf32> -> vector<8x8xf32>
    %497 = vector.extract_strided_slice %387 {offsets = [8, 24], sizes = [8, 8], strides = [1, 1]} : vector<16x32xf32> to vector<8x8xf32>
    %498 = vector.extract_strided_slice %390 {offsets = [8, 24], sizes = [8, 8], strides = [1, 1]} : vector<16x64xf32> to vector<8x8xf32>
    %499 = vector.extract_strided_slice %390 {offsets = [8, 56], sizes = [8, 8], strides = [1, 1]} : vector<16x64xf32> to vector<8x8xf32>
    %cst_226 = arith.constant dense<0.000000e+00> : vector<8x8xf32>
    %500 = tpu.matmul %497, %498, %cst_226 {dimension_numbers = #tpu.dot_dimension_numbers<[1], [1], [0], [0], [0, 0, 1, 0], [], []>} : vector<8x8xf32>, vector<8x8xf32>, vector<8x8xf32> -> vector<8x8xf32>
    %cst_227 = arith.constant dense<0xFF800000> : vector<8xf32>
    %501 = vector.multi_reduction <maximumf>, %500, %cst_227 [1] : vector<8x8xf32> to vector<8xf32>
    %502 = vector.shape_cast %501 : vector<8xf32> to vector<8x1xf32>
    %503 = vector.broadcast %502 : vector<8x1xf32> to vector<8x8xf32>
    %504 = arith.subf %500, %503 : vector<8x8xf32>
    %505 = math.exp %504 : vector<8x8xf32>
    %cst_228 = arith.constant dense<0.000000e+00> : vector<8xf32>
    %506 = vector.multi_reduction <add>, %505, %cst_228 [1] : vector<8x8xf32> to vector<8xf32>
    %507 = vector.shape_cast %506 : vector<8xf32> to vector<8x1xf32>
    %508 = tpu.reciprocal %507 {approx = true} : vector<8x1xf32> -> vector<8x1xf32>
    %509 = vector.broadcast %508 : vector<8x1xf32> to vector<8x8xf32>
    %510 = arith.mulf %505, %509 : vector<8x8xf32>
    %cst_229 = arith.constant dense<0.000000e+00> : vector<8x8xf32>
    %511 = tpu.matmul %510, %499, %cst_229 {dimension_numbers = #tpu.dot_dimension_numbers<[1], [0], [0], [1], [0, 0, 1, 1], [], []>} : vector<8x8xf32>, vector<8x8xf32>, vector<8x8xf32> -> vector<8x8xf32>
    %512 = tpu.concatenate %466, %481, %496, %511 in 1 : vector<8x8xf32>, vector<8x8xf32>, vector<8x8xf32>, vector<8x8xf32> -> vector<8x32xf32>
    %513 = tpu.concatenate %451, %512 in 0 : vector<8x32xf32>, vector<8x32xf32> -> vector<16x32xf32>
    %cst_230 = arith.constant dense<0.000000e+00> : vector<16x32xf32>
    %514 = tpu.matmul %513, %7, %cst_230 {dimension_numbers = #tpu.dot_dimension_numbers<[1], [0], [0], [1], [0, 0, 1, 1], [], []>} : vector<16x32xf32>, vector<32x32xf32>, vector<16x32xf32> -> vector<16x32xf32>
    %515 = vector.broadcast %4 : vector<1x32xf32> to vector<16x32xf32>
    %516 = arith.addf %514, %515 : vector<16x32xf32>
    %517 = arith.addf %384, %516 : vector<16x32xf32>
    %cst_231 = arith.constant dense<0.000000e+00> : vector<16xf32>
    %518 = vector.multi_reduction <add>, %517, %cst_231 [1] : vector<16x32xf32> to vector<16xf32>
    %519 = vector.shape_cast %518 : vector<16xf32> to vector<16x1xf32>
    %cst_232 = arith.constant 3.200000e+01 : f32
    %520 = vector.broadcast %cst_232 : f32 to vector<16x1xf32>
    %521 = arith.divf %519, %520 : vector<16x1xf32>
    %522 = vector.broadcast %521 : vector<16x1xf32> to vector<16x32xf32>
    %523 = arith.subf %517, %522 : vector<16x32xf32>
    %524 = arith.mulf %523, %523 : vector<16x32xf32>
    %cst_233 = arith.constant dense<0.000000e+00> : vector<16xf32>
    %525 = vector.multi_reduction <add>, %524, %cst_233 [1] : vector<16x32xf32> to vector<16xf32>
    %526 = vector.shape_cast %525 : vector<16xf32> to vector<16x1xf32>
    %cst_234 = arith.constant 3.200000e+01 : f32
    %527 = vector.broadcast %cst_234 : f32 to vector<16x1xf32>
    %528 = arith.divf %526, %527 : vector<16x1xf32>
    %cst_235 = arith.constant 9.99999974E-6 : f32
    %529 = vector.broadcast %cst_235 : f32 to vector<16x1xf32>
    %530 = arith.addf %528, %529 : vector<16x1xf32>
    %531 = math.rsqrt %530 : vector<16x1xf32>
    %532 = vector.broadcast %531 : vector<16x1xf32> to vector<16x32xf32>
    %533 = arith.mulf %523, %532 : vector<16x32xf32>
    %534 = vector.broadcast %12 : vector<1x32xf32> to vector<16x32xf32>
    %535 = arith.mulf %533, %534 : vector<16x32xf32>
    %536 = vector.broadcast %11 : vector<1x32xf32> to vector<16x32xf32>
    %537 = arith.addf %535, %536 : vector<16x32xf32>
    %cst_236 = arith.constant dense<0.000000e+00> : vector<16x64xf32>
    %538 = tpu.matmul %537, %19, %cst_236 {dimension_numbers = #tpu.dot_dimension_numbers<[1], [0], [0], [1], [0, 0, 1, 1], [], []>} : vector<16x32xf32>, vector<32x64xf32>, vector<16x64xf32> -> vector<16x64xf32>
    %539 = vector.broadcast %1 : vector<1x64xf32> to vector<16x64xf32>
    %540 = arith.addf %538, %539 : vector<16x64xf32>
    %cst_237 = arith.constant 0.000000e+00 : f32
    %541 = vector.broadcast %cst_237 : f32 to vector<16x64xf32>
    %542 = arith.maximumf %540, %541 : vector<16x64xf32>
    %cst_238 = arith.constant dense<0.000000e+00> : vector<16x32xf32>
    %543 = tpu.matmul %542, %20, %cst_238 {dimension_numbers = #tpu.dot_dimension_numbers<[1], [0], [0], [1], [0, 0, 1, 1], [], []>} : vector<16x64xf32>, vector<64x32xf32>, vector<16x32xf32> -> vector<16x32xf32>
    %544 = vector.broadcast %2 : vector<1x32xf32> to vector<16x32xf32>
    %545 = arith.addf %543, %544 : vector<16x32xf32>
    %546 = arith.addf %537, %545 : vector<16x32xf32>
    %cst_239 = arith.constant dense<0.000000e+00> : vector<16xf32>
    %547 = vector.multi_reduction <add>, %546, %cst_239 [1] : vector<16x32xf32> to vector<16xf32>
    %548 = vector.shape_cast %547 : vector<16xf32> to vector<16x1xf32>
    %cst_240 = arith.constant 3.200000e+01 : f32
    %549 = vector.broadcast %cst_240 : f32 to vector<16x1xf32>
    %550 = arith.divf %548, %549 : vector<16x1xf32>
    %551 = vector.broadcast %550 : vector<16x1xf32> to vector<16x32xf32>
    %552 = arith.subf %546, %551 : vector<16x32xf32>
    %553 = arith.mulf %552, %552 : vector<16x32xf32>
    %cst_241 = arith.constant dense<0.000000e+00> : vector<16xf32>
    %554 = vector.multi_reduction <add>, %553, %cst_241 [1] : vector<16x32xf32> to vector<16xf32>
    %555 = vector.shape_cast %554 : vector<16xf32> to vector<16x1xf32>
    %cst_242 = arith.constant 3.200000e+01 : f32
    %556 = vector.broadcast %cst_242 : f32 to vector<16x1xf32>
    %557 = arith.divf %555, %556 : vector<16x1xf32>
    %cst_243 = arith.constant 9.99999974E-6 : f32
    %558 = vector.broadcast %cst_243 : f32 to vector<16x1xf32>
    %559 = arith.addf %557, %558 : vector<16x1xf32>
    %560 = math.rsqrt %559 : vector<16x1xf32>
    %561 = vector.broadcast %560 : vector<16x1xf32> to vector<16x32xf32>
    %562 = arith.mulf %552, %561 : vector<16x32xf32>
    %563 = vector.broadcast %14 : vector<1x32xf32> to vector<16x32xf32>
    %564 = arith.mulf %562, %563 : vector<16x32xf32>
    %565 = vector.broadcast %13 : vector<1x32xf32> to vector<16x32xf32>
    %566 = arith.addf %564, %565 : vector<16x32xf32>
    %cst_244 = arith.constant dense<0.000000e+00> : vector<16x96xf32>
    %567 = tpu.matmul %566, %38, %cst_244 {dimension_numbers = #tpu.dot_dimension_numbers<[1], [0], [0], [1], [0, 0, 1, 1], [], []>} : vector<16x32xf32>, vector<32x96xf32>, vector<16x96xf32> -> vector<16x96xf32>
    %568 = vector.broadcast %36 : vector<1x96xf32> to vector<16x96xf32>
    %569 = arith.addf %567, %568 : vector<16x96xf32>
    %570 = vector.extract_strided_slice %569 {offsets = [0, 0], sizes = [8, 8], strides = [1, 1]} : vector<16x96xf32> to vector<8x8xf32>
    %571 = vector.extract_strided_slice %569 {offsets = [0, 32], sizes = [8, 8], strides = [1, 1]} : vector<16x96xf32> to vector<8x8xf32>
    %572 = vector.extract_strided_slice %569 {offsets = [0, 64], sizes = [8, 8], strides = [1, 1]} : vector<16x96xf32> to vector<8x8xf32>
    %cst_245 = arith.constant dense<0.000000e+00> : vector<8x8xf32>
    %573 = tpu.matmul %570, %571, %cst_245 {dimension_numbers = #tpu.dot_dimension_numbers<[1], [1], [0], [0], [0, 0, 1, 0], [], []>} : vector<8x8xf32>, vector<8x8xf32>, vector<8x8xf32> -> vector<8x8xf32>
    %cst_246 = arith.constant dense<0xFF800000> : vector<8xf32>
    %574 = vector.multi_reduction <maximumf>, %573, %cst_246 [1] : vector<8x8xf32> to vector<8xf32>
    %575 = vector.shape_cast %574 : vector<8xf32> to vector<8x1xf32>
    %576 = vector.broadcast %575 : vector<8x1xf32> to vector<8x8xf32>
    %577 = arith.subf %573, %576 : vector<8x8xf32>
    %578 = math.exp %577 : vector<8x8xf32>
    %cst_247 = arith.constant dense<0.000000e+00> : vector<8xf32>
    %579 = vector.multi_reduction <add>, %578, %cst_247 [1] : vector<8x8xf32> to vector<8xf32>
    %580 = vector.shape_cast %579 : vector<8xf32> to vector<8x1xf32>
    %581 = tpu.reciprocal %580 {approx = true} : vector<8x1xf32> -> vector<8x1xf32>
    %582 = vector.broadcast %581 : vector<8x1xf32> to vector<8x8xf32>
    %583 = arith.mulf %578, %582 : vector<8x8xf32>
    %cst_248 = arith.constant dense<0.000000e+00> : vector<8x8xf32>
    %584 = tpu.matmul %583, %572, %cst_248 {dimension_numbers = #tpu.dot_dimension_numbers<[1], [0], [0], [1], [0, 0, 1, 1], [], []>} : vector<8x8xf32>, vector<8x8xf32>, vector<8x8xf32> -> vector<8x8xf32>
    %585 = vector.extract_strided_slice %569 {offsets = [0, 8], sizes = [8, 8], strides = [1, 1]} : vector<16x96xf32> to vector<8x8xf32>
    %586 = vector.extract_strided_slice %569 {offsets = [0, 40], sizes = [8, 8], strides = [1, 1]} : vector<16x96xf32> to vector<8x8xf32>
    %587 = vector.extract_strided_slice %569 {offsets = [0, 72], sizes = [8, 8], strides = [1, 1]} : vector<16x96xf32> to vector<8x8xf32>
    %cst_249 = arith.constant dense<0.000000e+00> : vector<8x8xf32>
    %588 = tpu.matmul %585, %586, %cst_249 {dimension_numbers = #tpu.dot_dimension_numbers<[1], [1], [0], [0], [0, 0, 1, 0], [], []>} : vector<8x8xf32>, vector<8x8xf32>, vector<8x8xf32> -> vector<8x8xf32>
    %cst_250 = arith.constant dense<0xFF800000> : vector<8xf32>
    %589 = vector.multi_reduction <maximumf>, %588, %cst_250 [1] : vector<8x8xf32> to vector<8xf32>
    %590 = vector.shape_cast %589 : vector<8xf32> to vector<8x1xf32>
    %591 = vector.broadcast %590 : vector<8x1xf32> to vector<8x8xf32>
    %592 = arith.subf %588, %591 : vector<8x8xf32>
    %593 = math.exp %592 : vector<8x8xf32>
    %cst_251 = arith.constant dense<0.000000e+00> : vector<8xf32>
    %594 = vector.multi_reduction <add>, %593, %cst_251 [1] : vector<8x8xf32> to vector<8xf32>
    %595 = vector.shape_cast %594 : vector<8xf32> to vector<8x1xf32>
    %596 = tpu.reciprocal %595 {approx = true} : vector<8x1xf32> -> vector<8x1xf32>
    %597 = vector.broadcast %596 : vector<8x1xf32> to vector<8x8xf32>
    %598 = arith.mulf %593, %597 : vector<8x8xf32>
    %cst_252 = arith.constant dense<0.000000e+00> : vector<8x8xf32>
    %599 = tpu.matmul %598, %587, %cst_252 {dimension_numbers = #tpu.dot_dimension_numbers<[1], [0], [0], [1], [0, 0, 1, 1], [], []>} : vector<8x8xf32>, vector<8x8xf32>, vector<8x8xf32> -> vector<8x8xf32>
    %600 = vector.extract_strided_slice %569 {offsets = [0, 16], sizes = [8, 8], strides = [1, 1]} : vector<16x96xf32> to vector<8x8xf32>
    %601 = vector.extract_strided_slice %569 {offsets = [0, 48], sizes = [8, 8], strides = [1, 1]} : vector<16x96xf32> to vector<8x8xf32>
    %602 = vector.extract_strided_slice %569 {offsets = [0, 80], sizes = [8, 8], strides = [1, 1]} : vector<16x96xf32> to vector<8x8xf32>
    %cst_253 = arith.constant dense<0.000000e+00> : vector<8x8xf32>
    %603 = tpu.matmul %600, %601, %cst_253 {dimension_numbers = #tpu.dot_dimension_numbers<[1], [1], [0], [0], [0, 0, 1, 0], [], []>} : vector<8x8xf32>, vector<8x8xf32>, vector<8x8xf32> -> vector<8x8xf32>
    %cst_254 = arith.constant dense<0xFF800000> : vector<8xf32>
    %604 = vector.multi_reduction <maximumf>, %603, %cst_254 [1] : vector<8x8xf32> to vector<8xf32>
    %605 = vector.shape_cast %604 : vector<8xf32> to vector<8x1xf32>
    %606 = vector.broadcast %605 : vector<8x1xf32> to vector<8x8xf32>
    %607 = arith.subf %603, %606 : vector<8x8xf32>
    %608 = math.exp %607 : vector<8x8xf32>
    %cst_255 = arith.constant dense<0.000000e+00> : vector<8xf32>
    %609 = vector.multi_reduction <add>, %608, %cst_255 [1] : vector<8x8xf32> to vector<8xf32>
    %610 = vector.shape_cast %609 : vector<8xf32> to vector<8x1xf32>
    %611 = tpu.reciprocal %610 {approx = true} : vector<8x1xf32> -> vector<8x1xf32>
    %612 = vector.broadcast %611 : vector<8x1xf32> to vector<8x8xf32>
    %613 = arith.mulf %608, %612 : vector<8x8xf32>
    %cst_256 = arith.constant dense<0.000000e+00> : vector<8x8xf32>
    %614 = tpu.matmul %613, %602, %cst_256 {dimension_numbers = #tpu.dot_dimension_numbers<[1], [0], [0], [1], [0, 0, 1, 1], [], []>} : vector<8x8xf32>, vector<8x8xf32>, vector<8x8xf32> -> vector<8x8xf32>
    %615 = vector.extract_strided_slice %569 {offsets = [0, 24], sizes = [8, 8], strides = [1, 1]} : vector<16x96xf32> to vector<8x8xf32>
    %616 = vector.extract_strided_slice %569 {offsets = [0, 56], sizes = [8, 8], strides = [1, 1]} : vector<16x96xf32> to vector<8x8xf32>
    %617 = vector.extract_strided_slice %569 {offsets = [0, 88], sizes = [8, 8], strides = [1, 1]} : vector<16x96xf32> to vector<8x8xf32>
    %cst_257 = arith.constant dense<0.000000e+00> : vector<8x8xf32>
    %618 = tpu.matmul %615, %616, %cst_257 {dimension_numbers = #tpu.dot_dimension_numbers<[1], [1], [0], [0], [0, 0, 1, 0], [], []>} : vector<8x8xf32>, vector<8x8xf32>, vector<8x8xf32> -> vector<8x8xf32>
    %cst_258 = arith.constant dense<0xFF800000> : vector<8xf32>
    %619 = vector.multi_reduction <maximumf>, %618, %cst_258 [1] : vector<8x8xf32> to vector<8xf32>
    %620 = vector.shape_cast %619 : vector<8xf32> to vector<8x1xf32>
    %621 = vector.broadcast %620 : vector<8x1xf32> to vector<8x8xf32>
    %622 = arith.subf %618, %621 : vector<8x8xf32>
    %623 = math.exp %622 : vector<8x8xf32>
    %cst_259 = arith.constant dense<0.000000e+00> : vector<8xf32>
    %624 = vector.multi_reduction <add>, %623, %cst_259 [1] : vector<8x8xf32> to vector<8xf32>
    %625 = vector.shape_cast %624 : vector<8xf32> to vector<8x1xf32>
    %626 = tpu.reciprocal %625 {approx = true} : vector<8x1xf32> -> vector<8x1xf32>
    %627 = vector.broadcast %626 : vector<8x1xf32> to vector<8x8xf32>
    %628 = arith.mulf %623, %627 : vector<8x8xf32>
    %cst_260 = arith.constant dense<0.000000e+00> : vector<8x8xf32>
    %629 = tpu.matmul %628, %617, %cst_260 {dimension_numbers = #tpu.dot_dimension_numbers<[1], [0], [0], [1], [0, 0, 1, 1], [], []>} : vector<8x8xf32>, vector<8x8xf32>, vector<8x8xf32> -> vector<8x8xf32>
    %630 = tpu.concatenate %584, %599, %614, %629 in 1 : vector<8x8xf32>, vector<8x8xf32>, vector<8x8xf32>, vector<8x8xf32> -> vector<8x32xf32>
    %631 = vector.extract_strided_slice %569 {offsets = [8, 0], sizes = [8, 8], strides = [1, 1]} : vector<16x96xf32> to vector<8x8xf32>
    %632 = vector.extract_strided_slice %569 {offsets = [8, 32], sizes = [8, 8], strides = [1, 1]} : vector<16x96xf32> to vector<8x8xf32>
    %633 = vector.extract_strided_slice %569 {offsets = [8, 64], sizes = [8, 8], strides = [1, 1]} : vector<16x96xf32> to vector<8x8xf32>
    %cst_261 = arith.constant dense<0.000000e+00> : vector<8x8xf32>
    %634 = tpu.matmul %631, %632, %cst_261 {dimension_numbers = #tpu.dot_dimension_numbers<[1], [1], [0], [0], [0, 0, 1, 0], [], []>} : vector<8x8xf32>, vector<8x8xf32>, vector<8x8xf32> -> vector<8x8xf32>
    %cst_262 = arith.constant dense<0xFF800000> : vector<8xf32>
    %635 = vector.multi_reduction <maximumf>, %634, %cst_262 [1] : vector<8x8xf32> to vector<8xf32>
    %636 = vector.shape_cast %635 : vector<8xf32> to vector<8x1xf32>
    %637 = vector.broadcast %636 : vector<8x1xf32> to vector<8x8xf32>
    %638 = arith.subf %634, %637 : vector<8x8xf32>
    %639 = math.exp %638 : vector<8x8xf32>
    %cst_263 = arith.constant dense<0.000000e+00> : vector<8xf32>
    %640 = vector.multi_reduction <add>, %639, %cst_263 [1] : vector<8x8xf32> to vector<8xf32>
    %641 = vector.shape_cast %640 : vector<8xf32> to vector<8x1xf32>
    %642 = tpu.reciprocal %641 {approx = true} : vector<8x1xf32> -> vector<8x1xf32>
    %643 = vector.broadcast %642 : vector<8x1xf32> to vector<8x8xf32>
    %644 = arith.mulf %639, %643 : vector<8x8xf32>
    %cst_264 = arith.constant dense<0.000000e+00> : vector<8x8xf32>
    %645 = tpu.matmul %644, %633, %cst_264 {dimension_numbers = #tpu.dot_dimension_numbers<[1], [0], [0], [1], [0, 0, 1, 1], [], []>} : vector<8x8xf32>, vector<8x8xf32>, vector<8x8xf32> -> vector<8x8xf32>
    %646 = vector.extract_strided_slice %569 {offsets = [8, 8], sizes = [8, 8], strides = [1, 1]} : vector<16x96xf32> to vector<8x8xf32>
    %647 = vector.extract_strided_slice %569 {offsets = [8, 40], sizes = [8, 8], strides = [1, 1]} : vector<16x96xf32> to vector<8x8xf32>
    %648 = vector.extract_strided_slice %569 {offsets = [8, 72], sizes = [8, 8], strides = [1, 1]} : vector<16x96xf32> to vector<8x8xf32>
    %cst_265 = arith.constant dense<0.000000e+00> : vector<8x8xf32>
    %649 = tpu.matmul %646, %647, %cst_265 {dimension_numbers = #tpu.dot_dimension_numbers<[1], [1], [0], [0], [0, 0, 1, 0], [], []>} : vector<8x8xf32>, vector<8x8xf32>, vector<8x8xf32> -> vector<8x8xf32>
    %cst_266 = arith.constant dense<0xFF800000> : vector<8xf32>
    %650 = vector.multi_reduction <maximumf>, %649, %cst_266 [1] : vector<8x8xf32> to vector<8xf32>
    %651 = vector.shape_cast %650 : vector<8xf32> to vector<8x1xf32>
    %652 = vector.broadcast %651 : vector<8x1xf32> to vector<8x8xf32>
    %653 = arith.subf %649, %652 : vector<8x8xf32>
    %654 = math.exp %653 : vector<8x8xf32>
    %cst_267 = arith.constant dense<0.000000e+00> : vector<8xf32>
    %655 = vector.multi_reduction <add>, %654, %cst_267 [1] : vector<8x8xf32> to vector<8xf32>
    %656 = vector.shape_cast %655 : vector<8xf32> to vector<8x1xf32>
    %657 = tpu.reciprocal %656 {approx = true} : vector<8x1xf32> -> vector<8x1xf32>
    %658 = vector.broadcast %657 : vector<8x1xf32> to vector<8x8xf32>
    %659 = arith.mulf %654, %658 : vector<8x8xf32>
    %cst_268 = arith.constant dense<0.000000e+00> : vector<8x8xf32>
    %660 = tpu.matmul %659, %648, %cst_268 {dimension_numbers = #tpu.dot_dimension_numbers<[1], [0], [0], [1], [0, 0, 1, 1], [], []>} : vector<8x8xf32>, vector<8x8xf32>, vector<8x8xf32> -> vector<8x8xf32>
    %661 = vector.extract_strided_slice %569 {offsets = [8, 16], sizes = [8, 8], strides = [1, 1]} : vector<16x96xf32> to vector<8x8xf32>
    %662 = vector.extract_strided_slice %569 {offsets = [8, 48], sizes = [8, 8], strides = [1, 1]} : vector<16x96xf32> to vector<8x8xf32>
    %663 = vector.extract_strided_slice %569 {offsets = [8, 80], sizes = [8, 8], strides = [1, 1]} : vector<16x96xf32> to vector<8x8xf32>
    %cst_269 = arith.constant dense<0.000000e+00> : vector<8x8xf32>
    %664 = tpu.matmul %661, %662, %cst_269 {dimension_numbers = #tpu.dot_dimension_numbers<[1], [1], [0], [0], [0, 0, 1, 0], [], []>} : vector<8x8xf32>, vector<8x8xf32>, vector<8x8xf32> -> vector<8x8xf32>
    %cst_270 = arith.constant dense<0xFF800000> : vector<8xf32>
    %665 = vector.multi_reduction <maximumf>, %664, %cst_270 [1] : vector<8x8xf32> to vector<8xf32>
    %666 = vector.shape_cast %665 : vector<8xf32> to vector<8x1xf32>
    %667 = vector.broadcast %666 : vector<8x1xf32> to vector<8x8xf32>
    %668 = arith.subf %664, %667 : vector<8x8xf32>
    %669 = math.exp %668 : vector<8x8xf32>
    %cst_271 = arith.constant dense<0.000000e+00> : vector<8xf32>
    %670 = vector.multi_reduction <add>, %669, %cst_271 [1] : vector<8x8xf32> to vector<8xf32>
    %671 = vector.shape_cast %670 : vector<8xf32> to vector<8x1xf32>
    %672 = tpu.reciprocal %671 {approx = true} : vector<8x1xf32> -> vector<8x1xf32>
    %673 = vector.broadcast %672 : vector<8x1xf32> to vector<8x8xf32>
    %674 = arith.mulf %669, %673 : vector<8x8xf32>
    %cst_272 = arith.constant dense<0.000000e+00> : vector<8x8xf32>
    %675 = tpu.matmul %674, %663, %cst_272 {dimension_numbers = #tpu.dot_dimension_numbers<[1], [0], [0], [1], [0, 0, 1, 1], [], []>} : vector<8x8xf32>, vector<8x8xf32>, vector<8x8xf32> -> vector<8x8xf32>
    %676 = vector.extract_strided_slice %569 {offsets = [8, 24], sizes = [8, 8], strides = [1, 1]} : vector<16x96xf32> to vector<8x8xf32>
    %677 = vector.extract_strided_slice %569 {offsets = [8, 56], sizes = [8, 8], strides = [1, 1]} : vector<16x96xf32> to vector<8x8xf32>
    %678 = vector.extract_strided_slice %569 {offsets = [8, 88], sizes = [8, 8], strides = [1, 1]} : vector<16x96xf32> to vector<8x8xf32>
    %cst_273 = arith.constant dense<0.000000e+00> : vector<8x8xf32>
    %679 = tpu.matmul %676, %677, %cst_273 {dimension_numbers = #tpu.dot_dimension_numbers<[1], [1], [0], [0], [0, 0, 1, 0], [], []>} : vector<8x8xf32>, vector<8x8xf32>, vector<8x8xf32> -> vector<8x8xf32>
    %cst_274 = arith.constant dense<0xFF800000> : vector<8xf32>
    %680 = vector.multi_reduction <maximumf>, %679, %cst_274 [1] : vector<8x8xf32> to vector<8xf32>
    %681 = vector.shape_cast %680 : vector<8xf32> to vector<8x1xf32>
    %682 = vector.broadcast %681 : vector<8x1xf32> to vector<8x8xf32>
    %683 = arith.subf %679, %682 : vector<8x8xf32>
    %684 = math.exp %683 : vector<8x8xf32>
    %cst_275 = arith.constant dense<0.000000e+00> : vector<8xf32>
    %685 = vector.multi_reduction <add>, %684, %cst_275 [1] : vector<8x8xf32> to vector<8xf32>
    %686 = vector.shape_cast %685 : vector<8xf32> to vector<8x1xf32>
    %687 = tpu.reciprocal %686 {approx = true} : vector<8x1xf32> -> vector<8x1xf32>
    %688 = vector.broadcast %687 : vector<8x1xf32> to vector<8x8xf32>
    %689 = arith.mulf %684, %688 : vector<8x8xf32>
    %cst_276 = arith.constant dense<0.000000e+00> : vector<8x8xf32>
    %690 = tpu.matmul %689, %678, %cst_276 {dimension_numbers = #tpu.dot_dimension_numbers<[1], [0], [0], [1], [0, 0, 1, 1], [], []>} : vector<8x8xf32>, vector<8x8xf32>, vector<8x8xf32> -> vector<8x8xf32>
    %691 = tpu.concatenate %645, %660, %675, %690 in 1 : vector<8x8xf32>, vector<8x8xf32>, vector<8x8xf32>, vector<8x8xf32> -> vector<8x32xf32>
    %692 = tpu.concatenate %630, %691 in 0 : vector<8x32xf32>, vector<8x32xf32> -> vector<16x32xf32>
    %cst_277 = arith.constant dense<0.000000e+00> : vector<16x32xf32>
    %693 = tpu.matmul %692, %37, %cst_277 {dimension_numbers = #tpu.dot_dimension_numbers<[1], [0], [0], [1], [0, 0, 1, 1], [], []>} : vector<16x32xf32>, vector<32x32xf32>, vector<16x32xf32> -> vector<16x32xf32>
    %694 = vector.broadcast %35 : vector<1x32xf32> to vector<16x32xf32>
    %695 = arith.addf %693, %694 : vector<16x32xf32>
    %696 = arith.addf %566, %695 : vector<16x32xf32>
    %cst_278 = arith.constant dense<0.000000e+00> : vector<16xf32>
    %697 = vector.multi_reduction <add>, %696, %cst_278 [1] : vector<16x32xf32> to vector<16xf32>
    %698 = vector.shape_cast %697 : vector<16xf32> to vector<16x1xf32>
    %cst_279 = arith.constant 3.200000e+01 : f32
    %699 = vector.broadcast %cst_279 : f32 to vector<16x1xf32>
    %700 = arith.divf %698, %699 : vector<16x1xf32>
    %701 = vector.broadcast %700 : vector<16x1xf32> to vector<16x32xf32>
    %702 = arith.subf %696, %701 : vector<16x32xf32>
    %703 = arith.mulf %702, %702 : vector<16x32xf32>
    %cst_280 = arith.constant dense<0.000000e+00> : vector<16xf32>
    %704 = vector.multi_reduction <add>, %703, %cst_280 [1] : vector<16x32xf32> to vector<16xf32>
    %705 = vector.shape_cast %704 : vector<16xf32> to vector<16x1xf32>
    %cst_281 = arith.constant 3.200000e+01 : f32
    %706 = vector.broadcast %cst_281 : f32 to vector<16x1xf32>
    %707 = arith.divf %705, %706 : vector<16x1xf32>
    %cst_282 = arith.constant 9.99999974E-6 : f32
    %708 = vector.broadcast %cst_282 : f32 to vector<16x1xf32>
    %709 = arith.addf %707, %708 : vector<16x1xf32>
    %710 = math.rsqrt %709 : vector<16x1xf32>
    %711 = vector.broadcast %710 : vector<16x1xf32> to vector<16x32xf32>
    %712 = arith.mulf %702, %711 : vector<16x32xf32>
    %713 = vector.broadcast %30 : vector<1x32xf32> to vector<16x32xf32>
    %714 = arith.mulf %712, %713 : vector<16x32xf32>
    %715 = vector.broadcast %29 : vector<1x32xf32> to vector<16x32xf32>
    %716 = arith.addf %714, %715 : vector<16x32xf32>
    %cst_283 = arith.constant dense<0.000000e+00> : vector<16x32xf32>
    %717 = tpu.matmul %716, %28, %cst_283 {dimension_numbers = #tpu.dot_dimension_numbers<[1], [0], [0], [1], [0, 0, 1, 1], [], []>} : vector<16x32xf32>, vector<32x32xf32>, vector<16x32xf32> -> vector<16x32xf32>
    %718 = vector.broadcast %25 : vector<1x32xf32> to vector<16x32xf32>
    %719 = arith.addf %717, %718 : vector<16x32xf32>
    %cst_284 = arith.constant dense<0.000000e+00> : vector<16x64xf32>
    %720 = tpu.matmul %233, %26, %cst_284 {dimension_numbers = #tpu.dot_dimension_numbers<[1], [0], [0], [1], [0, 0, 1, 1], [], []>} : vector<16x32xf32>, vector<32x64xf32>, vector<16x64xf32> -> vector<16x64xf32>
    %721 = vector.broadcast %23 : vector<1x64xf32> to vector<16x64xf32>
    %722 = arith.addf %720, %721 : vector<16x64xf32>
    %723 = vector.extract_strided_slice %719 {offsets = [0, 0], sizes = [8, 8], strides = [1, 1]} : vector<16x32xf32> to vector<8x8xf32>
    %724 = vector.extract_strided_slice %722 {offsets = [0, 0], sizes = [8, 8], strides = [1, 1]} : vector<16x64xf32> to vector<8x8xf32>
    %725 = vector.extract_strided_slice %722 {offsets = [0, 32], sizes = [8, 8], strides = [1, 1]} : vector<16x64xf32> to vector<8x8xf32>
    %cst_285 = arith.constant dense<0.000000e+00> : vector<8x8xf32>
    %726 = tpu.matmul %723, %724, %cst_285 {dimension_numbers = #tpu.dot_dimension_numbers<[1], [1], [0], [0], [0, 0, 1, 0], [], []>} : vector<8x8xf32>, vector<8x8xf32>, vector<8x8xf32> -> vector<8x8xf32>
    %cst_286 = arith.constant dense<0xFF800000> : vector<8xf32>
    %727 = vector.multi_reduction <maximumf>, %726, %cst_286 [1] : vector<8x8xf32> to vector<8xf32>
    %728 = vector.shape_cast %727 : vector<8xf32> to vector<8x1xf32>
    %729 = vector.broadcast %728 : vector<8x1xf32> to vector<8x8xf32>
    %730 = arith.subf %726, %729 : vector<8x8xf32>
    %731 = math.exp %730 : vector<8x8xf32>
    %cst_287 = arith.constant dense<0.000000e+00> : vector<8xf32>
    %732 = vector.multi_reduction <add>, %731, %cst_287 [1] : vector<8x8xf32> to vector<8xf32>
    %733 = vector.shape_cast %732 : vector<8xf32> to vector<8x1xf32>
    %734 = tpu.reciprocal %733 {approx = true} : vector<8x1xf32> -> vector<8x1xf32>
    %735 = vector.broadcast %734 : vector<8x1xf32> to vector<8x8xf32>
    %736 = arith.mulf %731, %735 : vector<8x8xf32>
    %cst_288 = arith.constant dense<0.000000e+00> : vector<8x8xf32>
    %737 = tpu.matmul %736, %725, %cst_288 {dimension_numbers = #tpu.dot_dimension_numbers<[1], [0], [0], [1], [0, 0, 1, 1], [], []>} : vector<8x8xf32>, vector<8x8xf32>, vector<8x8xf32> -> vector<8x8xf32>
    %738 = vector.extract_strided_slice %719 {offsets = [0, 8], sizes = [8, 8], strides = [1, 1]} : vector<16x32xf32> to vector<8x8xf32>
    %739 = vector.extract_strided_slice %722 {offsets = [0, 8], sizes = [8, 8], strides = [1, 1]} : vector<16x64xf32> to vector<8x8xf32>
    %740 = vector.extract_strided_slice %722 {offsets = [0, 40], sizes = [8, 8], strides = [1, 1]} : vector<16x64xf32> to vector<8x8xf32>
    %cst_289 = arith.constant dense<0.000000e+00> : vector<8x8xf32>
    %741 = tpu.matmul %738, %739, %cst_289 {dimension_numbers = #tpu.dot_dimension_numbers<[1], [1], [0], [0], [0, 0, 1, 0], [], []>} : vector<8x8xf32>, vector<8x8xf32>, vector<8x8xf32> -> vector<8x8xf32>
    %cst_290 = arith.constant dense<0xFF800000> : vector<8xf32>
    %742 = vector.multi_reduction <maximumf>, %741, %cst_290 [1] : vector<8x8xf32> to vector<8xf32>
    %743 = vector.shape_cast %742 : vector<8xf32> to vector<8x1xf32>
    %744 = vector.broadcast %743 : vector<8x1xf32> to vector<8x8xf32>
    %745 = arith.subf %741, %744 : vector<8x8xf32>
    %746 = math.exp %745 : vector<8x8xf32>
    %cst_291 = arith.constant dense<0.000000e+00> : vector<8xf32>
    %747 = vector.multi_reduction <add>, %746, %cst_291 [1] : vector<8x8xf32> to vector<8xf32>
    %748 = vector.shape_cast %747 : vector<8xf32> to vector<8x1xf32>
    %749 = tpu.reciprocal %748 {approx = true} : vector<8x1xf32> -> vector<8x1xf32>
    %750 = vector.broadcast %749 : vector<8x1xf32> to vector<8x8xf32>
    %751 = arith.mulf %746, %750 : vector<8x8xf32>
    %cst_292 = arith.constant dense<0.000000e+00> : vector<8x8xf32>
    %752 = tpu.matmul %751, %740, %cst_292 {dimension_numbers = #tpu.dot_dimension_numbers<[1], [0], [0], [1], [0, 0, 1, 1], [], []>} : vector<8x8xf32>, vector<8x8xf32>, vector<8x8xf32> -> vector<8x8xf32>
    %753 = vector.extract_strided_slice %719 {offsets = [0, 16], sizes = [8, 8], strides = [1, 1]} : vector<16x32xf32> to vector<8x8xf32>
    %754 = vector.extract_strided_slice %722 {offsets = [0, 16], sizes = [8, 8], strides = [1, 1]} : vector<16x64xf32> to vector<8x8xf32>
    %755 = vector.extract_strided_slice %722 {offsets = [0, 48], sizes = [8, 8], strides = [1, 1]} : vector<16x64xf32> to vector<8x8xf32>
    %cst_293 = arith.constant dense<0.000000e+00> : vector<8x8xf32>
    %756 = tpu.matmul %753, %754, %cst_293 {dimension_numbers = #tpu.dot_dimension_numbers<[1], [1], [0], [0], [0, 0, 1, 0], [], []>} : vector<8x8xf32>, vector<8x8xf32>, vector<8x8xf32> -> vector<8x8xf32>
    %cst_294 = arith.constant dense<0xFF800000> : vector<8xf32>
    %757 = vector.multi_reduction <maximumf>, %756, %cst_294 [1] : vector<8x8xf32> to vector<8xf32>
    %758 = vector.shape_cast %757 : vector<8xf32> to vector<8x1xf32>
    %759 = vector.broadcast %758 : vector<8x1xf32> to vector<8x8xf32>
    %760 = arith.subf %756, %759 : vector<8x8xf32>
    %761 = math.exp %760 : vector<8x8xf32>
    %cst_295 = arith.constant dense<0.000000e+00> : vector<8xf32>
    %762 = vector.multi_reduction <add>, %761, %cst_295 [1] : vector<8x8xf32> to vector<8xf32>
    %763 = vector.shape_cast %762 : vector<8xf32> to vector<8x1xf32>
    %764 = tpu.reciprocal %763 {approx = true} : vector<8x1xf32> -> vector<8x1xf32>
    %765 = vector.broadcast %764 : vector<8x1xf32> to vector<8x8xf32>
    %766 = arith.mulf %761, %765 : vector<8x8xf32>
    %cst_296 = arith.constant dense<0.000000e+00> : vector<8x8xf32>
    %767 = tpu.matmul %766, %755, %cst_296 {dimension_numbers = #tpu.dot_dimension_numbers<[1], [0], [0], [1], [0, 0, 1, 1], [], []>} : vector<8x8xf32>, vector<8x8xf32>, vector<8x8xf32> -> vector<8x8xf32>
    %768 = vector.extract_strided_slice %719 {offsets = [0, 24], sizes = [8, 8], strides = [1, 1]} : vector<16x32xf32> to vector<8x8xf32>
    %769 = vector.extract_strided_slice %722 {offsets = [0, 24], sizes = [8, 8], strides = [1, 1]} : vector<16x64xf32> to vector<8x8xf32>
    %770 = vector.extract_strided_slice %722 {offsets = [0, 56], sizes = [8, 8], strides = [1, 1]} : vector<16x64xf32> to vector<8x8xf32>
    %cst_297 = arith.constant dense<0.000000e+00> : vector<8x8xf32>
    %771 = tpu.matmul %768, %769, %cst_297 {dimension_numbers = #tpu.dot_dimension_numbers<[1], [1], [0], [0], [0, 0, 1, 0], [], []>} : vector<8x8xf32>, vector<8x8xf32>, vector<8x8xf32> -> vector<8x8xf32>
    %cst_298 = arith.constant dense<0xFF800000> : vector<8xf32>
    %772 = vector.multi_reduction <maximumf>, %771, %cst_298 [1] : vector<8x8xf32> to vector<8xf32>
    %773 = vector.shape_cast %772 : vector<8xf32> to vector<8x1xf32>
    %774 = vector.broadcast %773 : vector<8x1xf32> to vector<8x8xf32>
    %775 = arith.subf %771, %774 : vector<8x8xf32>
    %776 = math.exp %775 : vector<8x8xf32>
    %cst_299 = arith.constant dense<0.000000e+00> : vector<8xf32>
    %777 = vector.multi_reduction <add>, %776, %cst_299 [1] : vector<8x8xf32> to vector<8xf32>
    %778 = vector.shape_cast %777 : vector<8xf32> to vector<8x1xf32>
    %779 = tpu.reciprocal %778 {approx = true} : vector<8x1xf32> -> vector<8x1xf32>
    %780 = vector.broadcast %779 : vector<8x1xf32> to vector<8x8xf32>
    %781 = arith.mulf %776, %780 : vector<8x8xf32>
    %cst_300 = arith.constant dense<0.000000e+00> : vector<8x8xf32>
    %782 = tpu.matmul %781, %770, %cst_300 {dimension_numbers = #tpu.dot_dimension_numbers<[1], [0], [0], [1], [0, 0, 1, 1], [], []>} : vector<8x8xf32>, vector<8x8xf32>, vector<8x8xf32> -> vector<8x8xf32>
    %783 = tpu.concatenate %737, %752, %767, %782 in 1 : vector<8x8xf32>, vector<8x8xf32>, vector<8x8xf32>, vector<8x8xf32> -> vector<8x32xf32>
    %784 = vector.extract_strided_slice %719 {offsets = [8, 0], sizes = [8, 8], strides = [1, 1]} : vector<16x32xf32> to vector<8x8xf32>
    %785 = vector.extract_strided_slice %722 {offsets = [8, 0], sizes = [8, 8], strides = [1, 1]} : vector<16x64xf32> to vector<8x8xf32>
    %786 = vector.extract_strided_slice %722 {offsets = [8, 32], sizes = [8, 8], strides = [1, 1]} : vector<16x64xf32> to vector<8x8xf32>
    %cst_301 = arith.constant dense<0.000000e+00> : vector<8x8xf32>
    %787 = tpu.matmul %784, %785, %cst_301 {dimension_numbers = #tpu.dot_dimension_numbers<[1], [1], [0], [0], [0, 0, 1, 0], [], []>} : vector<8x8xf32>, vector<8x8xf32>, vector<8x8xf32> -> vector<8x8xf32>
    %cst_302 = arith.constant dense<0xFF800000> : vector<8xf32>
    %788 = vector.multi_reduction <maximumf>, %787, %cst_302 [1] : vector<8x8xf32> to vector<8xf32>
    %789 = vector.shape_cast %788 : vector<8xf32> to vector<8x1xf32>
    %790 = vector.broadcast %789 : vector<8x1xf32> to vector<8x8xf32>
    %791 = arith.subf %787, %790 : vector<8x8xf32>
    %792 = math.exp %791 : vector<8x8xf32>
    %cst_303 = arith.constant dense<0.000000e+00> : vector<8xf32>
    %793 = vector.multi_reduction <add>, %792, %cst_303 [1] : vector<8x8xf32> to vector<8xf32>
    %794 = vector.shape_cast %793 : vector<8xf32> to vector<8x1xf32>
    %795 = tpu.reciprocal %794 {approx = true} : vector<8x1xf32> -> vector<8x1xf32>
    %796 = vector.broadcast %795 : vector<8x1xf32> to vector<8x8xf32>
    %797 = arith.mulf %792, %796 : vector<8x8xf32>
    %cst_304 = arith.constant dense<0.000000e+00> : vector<8x8xf32>
    %798 = tpu.matmul %797, %786, %cst_304 {dimension_numbers = #tpu.dot_dimension_numbers<[1], [0], [0], [1], [0, 0, 1, 1], [], []>} : vector<8x8xf32>, vector<8x8xf32>, vector<8x8xf32> -> vector<8x8xf32>
    %799 = vector.extract_strided_slice %719 {offsets = [8, 8], sizes = [8, 8], strides = [1, 1]} : vector<16x32xf32> to vector<8x8xf32>
    %800 = vector.extract_strided_slice %722 {offsets = [8, 8], sizes = [8, 8], strides = [1, 1]} : vector<16x64xf32> to vector<8x8xf32>
    %801 = vector.extract_strided_slice %722 {offsets = [8, 40], sizes = [8, 8], strides = [1, 1]} : vector<16x64xf32> to vector<8x8xf32>
    %cst_305 = arith.constant dense<0.000000e+00> : vector<8x8xf32>
    %802 = tpu.matmul %799, %800, %cst_305 {dimension_numbers = #tpu.dot_dimension_numbers<[1], [1], [0], [0], [0, 0, 1, 0], [], []>} : vector<8x8xf32>, vector<8x8xf32>, vector<8x8xf32> -> vector<8x8xf32>
    %cst_306 = arith.constant dense<0xFF800000> : vector<8xf32>
    %803 = vector.multi_reduction <maximumf>, %802, %cst_306 [1] : vector<8x8xf32> to vector<8xf32>
    %804 = vector.shape_cast %803 : vector<8xf32> to vector<8x1xf32>
    %805 = vector.broadcast %804 : vector<8x1xf32> to vector<8x8xf32>
    %806 = arith.subf %802, %805 : vector<8x8xf32>
    %807 = math.exp %806 : vector<8x8xf32>
    %cst_307 = arith.constant dense<0.000000e+00> : vector<8xf32>
    %808 = vector.multi_reduction <add>, %807, %cst_307 [1] : vector<8x8xf32> to vector<8xf32>
    %809 = vector.shape_cast %808 : vector<8xf32> to vector<8x1xf32>
    %810 = tpu.reciprocal %809 {approx = true} : vector<8x1xf32> -> vector<8x1xf32>
    %811 = vector.broadcast %810 : vector<8x1xf32> to vector<8x8xf32>
    %812 = arith.mulf %807, %811 : vector<8x8xf32>
    %cst_308 = arith.constant dense<0.000000e+00> : vector<8x8xf32>
    %813 = tpu.matmul %812, %801, %cst_308 {dimension_numbers = #tpu.dot_dimension_numbers<[1], [0], [0], [1], [0, 0, 1, 1], [], []>} : vector<8x8xf32>, vector<8x8xf32>, vector<8x8xf32> -> vector<8x8xf32>
    %814 = vector.extract_strided_slice %719 {offsets = [8, 16], sizes = [8, 8], strides = [1, 1]} : vector<16x32xf32> to vector<8x8xf32>
    %815 = vector.extract_strided_slice %722 {offsets = [8, 16], sizes = [8, 8], strides = [1, 1]} : vector<16x64xf32> to vector<8x8xf32>
    %816 = vector.extract_strided_slice %722 {offsets = [8, 48], sizes = [8, 8], strides = [1, 1]} : vector<16x64xf32> to vector<8x8xf32>
    %cst_309 = arith.constant dense<0.000000e+00> : vector<8x8xf32>
    %817 = tpu.matmul %814, %815, %cst_309 {dimension_numbers = #tpu.dot_dimension_numbers<[1], [1], [0], [0], [0, 0, 1, 0], [], []>} : vector<8x8xf32>, vector<8x8xf32>, vector<8x8xf32> -> vector<8x8xf32>
    %cst_310 = arith.constant dense<0xFF800000> : vector<8xf32>
    %818 = vector.multi_reduction <maximumf>, %817, %cst_310 [1] : vector<8x8xf32> to vector<8xf32>
    %819 = vector.shape_cast %818 : vector<8xf32> to vector<8x1xf32>
    %820 = vector.broadcast %819 : vector<8x1xf32> to vector<8x8xf32>
    %821 = arith.subf %817, %820 : vector<8x8xf32>
    %822 = math.exp %821 : vector<8x8xf32>
    %cst_311 = arith.constant dense<0.000000e+00> : vector<8xf32>
    %823 = vector.multi_reduction <add>, %822, %cst_311 [1] : vector<8x8xf32> to vector<8xf32>
    %824 = vector.shape_cast %823 : vector<8xf32> to vector<8x1xf32>
    %825 = tpu.reciprocal %824 {approx = true} : vector<8x1xf32> -> vector<8x1xf32>
    %826 = vector.broadcast %825 : vector<8x1xf32> to vector<8x8xf32>
    %827 = arith.mulf %822, %826 : vector<8x8xf32>
    %cst_312 = arith.constant dense<0.000000e+00> : vector<8x8xf32>
    %828 = tpu.matmul %827, %816, %cst_312 {dimension_numbers = #tpu.dot_dimension_numbers<[1], [0], [0], [1], [0, 0, 1, 1], [], []>} : vector<8x8xf32>, vector<8x8xf32>, vector<8x8xf32> -> vector<8x8xf32>
    %829 = vector.extract_strided_slice %719 {offsets = [8, 24], sizes = [8, 8], strides = [1, 1]} : vector<16x32xf32> to vector<8x8xf32>
    %830 = vector.extract_strided_slice %722 {offsets = [8, 24], sizes = [8, 8], strides = [1, 1]} : vector<16x64xf32> to vector<8x8xf32>
    %831 = vector.extract_strided_slice %722 {offsets = [8, 56], sizes = [8, 8], strides = [1, 1]} : vector<16x64xf32> to vector<8x8xf32>
    %cst_313 = arith.constant dense<0.000000e+00> : vector<8x8xf32>
    %832 = tpu.matmul %829, %830, %cst_313 {dimension_numbers = #tpu.dot_dimension_numbers<[1], [1], [0], [0], [0, 0, 1, 0], [], []>} : vector<8x8xf32>, vector<8x8xf32>, vector<8x8xf32> -> vector<8x8xf32>
    %cst_314 = arith.constant dense<0xFF800000> : vector<8xf32>
    %833 = vector.multi_reduction <maximumf>, %832, %cst_314 [1] : vector<8x8xf32> to vector<8xf32>
    %834 = vector.shape_cast %833 : vector<8xf32> to vector<8x1xf32>
    %835 = vector.broadcast %834 : vector<8x1xf32> to vector<8x8xf32>
    %836 = arith.subf %832, %835 : vector<8x8xf32>
    %837 = math.exp %836 : vector<8x8xf32>
    %cst_315 = arith.constant dense<0.000000e+00> : vector<8xf32>
    %838 = vector.multi_reduction <add>, %837, %cst_315 [1] : vector<8x8xf32> to vector<8xf32>
    %839 = vector.shape_cast %838 : vector<8xf32> to vector<8x1xf32>
    %840 = tpu.reciprocal %839 {approx = true} : vector<8x1xf32> -> vector<8x1xf32>
    %841 = vector.broadcast %840 : vector<8x1xf32> to vector<8x8xf32>
    %842 = arith.mulf %837, %841 : vector<8x8xf32>
    %cst_316 = arith.constant dense<0.000000e+00> : vector<8x8xf32>
    %843 = tpu.matmul %842, %831, %cst_316 {dimension_numbers = #tpu.dot_dimension_numbers<[1], [0], [0], [1], [0, 0, 1, 1], [], []>} : vector<8x8xf32>, vector<8x8xf32>, vector<8x8xf32> -> vector<8x8xf32>
    %844 = tpu.concatenate %798, %813, %828, %843 in 1 : vector<8x8xf32>, vector<8x8xf32>, vector<8x8xf32>, vector<8x8xf32> -> vector<8x32xf32>
    %845 = tpu.concatenate %783, %844 in 0 : vector<8x32xf32>, vector<8x32xf32> -> vector<16x32xf32>
    %cst_317 = arith.constant dense<0.000000e+00> : vector<16x32xf32>
    %846 = tpu.matmul %845, %27, %cst_317 {dimension_numbers = #tpu.dot_dimension_numbers<[1], [0], [0], [1], [0, 0, 1, 1], [], []>} : vector<16x32xf32>, vector<32x32xf32>, vector<16x32xf32> -> vector<16x32xf32>
    %847 = vector.broadcast %24 : vector<1x32xf32> to vector<16x32xf32>
    %848 = arith.addf %846, %847 : vector<16x32xf32>
    %849 = arith.addf %716, %848 : vector<16x32xf32>
    %cst_318 = arith.constant dense<0.000000e+00> : vector<16xf32>
    %850 = vector.multi_reduction <add>, %849, %cst_318 [1] : vector<16x32xf32> to vector<16xf32>
    %851 = vector.shape_cast %850 : vector<16xf32> to vector<16x1xf32>
    %cst_319 = arith.constant 3.200000e+01 : f32
    %852 = vector.broadcast %cst_319 : f32 to vector<16x1xf32>
    %853 = arith.divf %851, %852 : vector<16x1xf32>
    %854 = vector.broadcast %853 : vector<16x1xf32> to vector<16x32xf32>
    %855 = arith.subf %849, %854 : vector<16x32xf32>
    %856 = arith.mulf %855, %855 : vector<16x32xf32>
    %cst_320 = arith.constant dense<0.000000e+00> : vector<16xf32>
    %857 = vector.multi_reduction <add>, %856, %cst_320 [1] : vector<16x32xf32> to vector<16xf32>
    %858 = vector.shape_cast %857 : vector<16xf32> to vector<16x1xf32>
    %cst_321 = arith.constant 3.200000e+01 : f32
    %859 = vector.broadcast %cst_321 : f32 to vector<16x1xf32>
    %860 = arith.divf %858, %859 : vector<16x1xf32>
    %cst_322 = arith.constant 9.99999974E-6 : f32
    %861 = vector.broadcast %cst_322 : f32 to vector<16x1xf32>
    %862 = arith.addf %860, %861 : vector<16x1xf32>
    %863 = math.rsqrt %862 : vector<16x1xf32>
    %864 = vector.broadcast %863 : vector<16x1xf32> to vector<16x32xf32>
    %865 = arith.mulf %855, %864 : vector<16x32xf32>
    %866 = vector.broadcast %32 : vector<1x32xf32> to vector<16x32xf32>
    %867 = arith.mulf %865, %866 : vector<16x32xf32>
    %868 = vector.broadcast %31 : vector<1x32xf32> to vector<16x32xf32>
    %869 = arith.addf %867, %868 : vector<16x32xf32>
    %cst_323 = arith.constant dense<0.000000e+00> : vector<16x64xf32>
    %870 = tpu.matmul %869, %39, %cst_323 {dimension_numbers = #tpu.dot_dimension_numbers<[1], [0], [0], [1], [0, 0, 1, 1], [], []>} : vector<16x32xf32>, vector<32x64xf32>, vector<16x64xf32> -> vector<16x64xf32>
    %871 = vector.broadcast %21 : vector<1x64xf32> to vector<16x64xf32>
    %872 = arith.addf %870, %871 : vector<16x64xf32>
    %cst_324 = arith.constant 0.000000e+00 : f32
    %873 = vector.broadcast %cst_324 : f32 to vector<16x64xf32>
    %874 = arith.maximumf %872, %873 : vector<16x64xf32>
    %cst_325 = arith.constant dense<0.000000e+00> : vector<16x32xf32>
    %875 = tpu.matmul %874, %40, %cst_325 {dimension_numbers = #tpu.dot_dimension_numbers<[1], [0], [0], [1], [0, 0, 1, 1], [], []>} : vector<16x64xf32>, vector<64x32xf32>, vector<16x32xf32> -> vector<16x32xf32>
    %876 = vector.broadcast %22 : vector<1x32xf32> to vector<16x32xf32>
    %877 = arith.addf %875, %876 : vector<16x32xf32>
    %878 = arith.addf %869, %877 : vector<16x32xf32>
    %cst_326 = arith.constant dense<0.000000e+00> : vector<16xf32>
    %879 = vector.multi_reduction <add>, %878, %cst_326 [1] : vector<16x32xf32> to vector<16xf32>
    %880 = vector.shape_cast %879 : vector<16xf32> to vector<16x1xf32>
    %cst_327 = arith.constant 3.200000e+01 : f32
    %881 = vector.broadcast %cst_327 : f32 to vector<16x1xf32>
    %882 = arith.divf %880, %881 : vector<16x1xf32>
    %883 = vector.broadcast %882 : vector<16x1xf32> to vector<16x32xf32>
    %884 = arith.subf %878, %883 : vector<16x32xf32>
    %885 = arith.mulf %884, %884 : vector<16x32xf32>
    %cst_328 = arith.constant dense<0.000000e+00> : vector<16xf32>
    %886 = vector.multi_reduction <add>, %885, %cst_328 [1] : vector<16x32xf32> to vector<16xf32>
    %887 = vector.shape_cast %886 : vector<16xf32> to vector<16x1xf32>
    %cst_329 = arith.constant 3.200000e+01 : f32
    %888 = vector.broadcast %cst_329 : f32 to vector<16x1xf32>
    %889 = arith.divf %887, %888 : vector<16x1xf32>
    %cst_330 = arith.constant 9.99999974E-6 : f32
    %890 = vector.broadcast %cst_330 : f32 to vector<16x1xf32>
    %891 = arith.addf %889, %890 : vector<16x1xf32>
    %892 = math.rsqrt %891 : vector<16x1xf32>
    %893 = vector.broadcast %892 : vector<16x1xf32> to vector<16x32xf32>
    %894 = arith.mulf %884, %893 : vector<16x32xf32>
    %895 = vector.broadcast %34 : vector<1x32xf32> to vector<16x32xf32>
    %896 = arith.mulf %894, %895 : vector<16x32xf32>
    %897 = vector.broadcast %33 : vector<1x32xf32> to vector<16x32xf32>
    %898 = arith.addf %896, %897 : vector<16x32xf32>
    %cst_331 = arith.constant dense<0.000000e+00> : vector<16x16xf32>
    %899 = tpu.matmul %898, %53, %cst_331 {dimension_numbers = #tpu.dot_dimension_numbers<[1], [0], [0], [1], [0, 0, 1, 1], [], []>} : vector<16x32xf32>, vector<32x16xf32>, vector<16x16xf32> -> vector<16x16xf32>
    %900 = vector.broadcast %0 : vector<1x16xf32> to vector<16x16xf32>
    %901 = arith.addf %899, %900 : vector<16x16xf32>
    %c0_332 = arith.constant 0 : index
    %c0_333 = arith.constant 0 : index
    %902 = vector.load %arg56[%c0_332, %c0_333] : memref<16x16xf32, #tpu.memory_space<vmem>>, vector<16x16xf32>
    tpu.vector_store %arg56[%c0_332, %c0_333], %901 {strides = array<i32>} : memref<16x16xf32, #tpu.memory_space<vmem>>, vector<16x16xf32>,
    return
  }
}

</mosaic_0001>

<bundles_post_ra>
// kernel: guide_rna_forward.1
= control target key start
LH: loop header
LB: loop body
LE: loop exit
PB: predicated region body
PF: predicated region fallthrough
CT: control target
= control target key end

     0   :  { %s6008_s6 = smov 1   ;;  %s6009_s10 = smov 2   ;;  %s7368_s0 = inlined_call_operand.smem [shape: u32[57], index: -1, kind: input, shape index: {}] }
   0x1   :  { %s6120_s5 = sld [smem:[%s7368_s0]]   ;;  %s6010_s14 = smov 3  }
   0x2   :  { %s6125_s9 = sld [smem:[%s7368_s0 + %s6008_s6]]   ;;  %s6011_s18 = smov 4  }
   0x3   :  { %s6130_s13 = sld [smem:[%s7368_s0 + %s6009_s10]]   ;;  %s6012_s22 = smov 5  }
   0x4   :  { %s6135_s17 = sld [smem:[%s7368_s0 + %s6010_s14]]   ;;  %s6013_s26 = smov 6  }
   0x5   :  { %s6140_s21 = sld [smem:[%s7368_s0 + %s6011_s18]]   ;;  %s6014_s30 = smov 7  }
   0x6   :  { %s6145_s25 = sld [smem:[%s7368_s0 + %s6012_s22]]   ;;  %s6015_s4 = smov 8  }
   0x7   :  { %7406 = sst [smem:[#allocation69_spill]] %s6120_s5  ;;  %s6016_s10 = smov 9  }
   0x8   :  { %7407 = sst [smem:[#allocation70_spill]] %s6125_s9  ;;  %s6017_s15 = smov 10  }
   0x9   :  { %7408 = sst [smem:[#allocation71_spill]] %s6130_s13  ;;  %s6018_s20 = smov 11  }
   0xa   :  { %s6150_s29 = sld [smem:[%s7368_s0 + %s6013_s26]]   ;;  %s6019_s26 = smov 12  }
   0xb   :  { %7409 = sst [smem:[#allocation72_spill]] %s6140_s21  ;;  %s6020_s1 = smov 13  }
   0xc   :  { %s6155_s3 = sld [smem:[%s7368_s0 + %s6014_s30]]   ;;  %s6021_s7 = smov 14  }
   0xd   :  { %s6160_s8 = sld [smem:[%s7368_s0 + %s6015_s4]]   ;;  %s6023_s22 = smov 16  }
   0xe   :  { %s6165_s14 = sld [smem:[%s7368_s0 + %s6016_s10]]   ;;  %s6024_s28 = smov 17  }
   0xf   :  { %s6170_s19 = sld [smem:[%s7368_s0 + %s6017_s15]]   ;;  %s6022_s15 = smov 15  }
  0x10   :  { %7410 = sst [smem:[#allocation73_spill]] %s6150_s29 }
  0x11   :  { %s6175_s24 = sld [smem:[%s7368_s0 + %s6018_s20]]  }
  0x12   :  { %s6180_s30 = sld [smem:[%s7368_s0 + %s6019_s26]]  }
  0x13   :  { %7411 = sst [smem:[#allocation74_spill]] %s6160_s8 }
  0x14   :  { %7412 = sst [smem:[#allocation75_spill]] %s6165_s14 }
  0x15   :  { %7413 = sst [smem:[#allocation76_spill]] %s6170_s19 }
  0x16   :  { %s6185_s6 = sld [smem:[%s7368_s0 + %s6020_s1]]  }
  0x17   :  { %7414 = sst [smem:[#allocation77_spill]] %s6175_s24 }
  0x18   :  { %s6190_s12 = sld [smem:[%s7368_s0 + %s6021_s7]]   ;;  %s6025_s7 = smov 18  }
  0x19   :  { %s6195_s20 = sld [smem:[%s7368_s0 + %s6022_s15]]   ;;  %s6026_s15 = smov 19  }
  0x1a   :  { %s6200_s27 = sld [smem:[%s7368_s0 + %s6023_s22]]   ;;  %s6027_s22 = smov 20  }
  0x1b   :  { %s6205_s4 = sld [smem:[%s7368_s0 + %s6024_s28]]   ;;  %s6028_s28 = smov 21  }
  0x1c   :  { %7415 = sst [smem:[#allocation78_spill]] %s6185_s6 }
  0x1d   :  { %s6210_s14 = sld [smem:[%s7368_s0 + %s6025_s7]]   ;;  %s6029_s7 = smov 22  }
  0x1e   :  { %s6215_s19 = sld [smem:[%s7368_s0 + %s6026_s15]]   ;;  %s6030_s15 = smov 23  }
  0x1f   :  { %7416 = sst [smem:[#allocation79_spill]] %s6195_s20 }
  0x20   :  { %s6220_s8 = sld [smem:[%s7368_s0 + %s6027_s22]]   ;;  %s6031_s22 = smov 24  }
  0x21   :  { %7417 = sst [smem:[#allocation80_spill]] %s6205_s4 }
  0x22   :  { %s6225_s9 = sld [smem:[%s7368_s0 + %s6028_s28]]   ;;  %s6032_s28 = smov 25  }
  0x23   :  { %s6230_s5 = sld [smem:[%s7368_s0 + %s6029_s7]]   ;;  %s6033_s7 = smov 26  }
  0x24   :  { %7418 = sst [smem:[#allocation81_spill]] %s6215_s19 }
  0x25   :  { %s6235_s19 = sld [smem:[%s7368_s0 + %s6030_s15]]   ;;  %s6034_s15 = smov 27  }
  0x26   :  { %7419 = sst [smem:[#allocation82_spill]] %s6220_s8 }
  0x27   :  { %s6240_s8 = sld [smem:[%s7368_s0 + %s6031_s22]]   ;;  %s6035_s22 = smov 28  }
  0x28   :  { %7420 = sst [smem:[#allocation83_spill]] %s6225_s9 }
  0x29   :  { %7421 = sst [smem:[#allocation84_spill]] %s6230_s5 }
  0x2a   :  { %s6245_s9 = sld [smem:[%s7368_s0 + %s6032_s28]]   ;;  %s6036_s28 = smov 29  }
  0x2b   :  { %7422 = sst [smem:[#allocation85_spill]] %s6235_s19 }
  0x2c   :  { %s6250_s5 = sld [smem:[%s7368_s0 + %s6033_s7]]   ;;  %s6037_s7 = smov 30  }
  0x2d   :  { %s6255_s19 = sld [smem:[%s7368_s0 + %s6034_s15]]   ;;  %s6038_s15 = smov 31  }
  0x2e   :  { %s6260_s4 = sld [smem:[%s7368_s0 + %s6035_s22]]   ;;  %s6039_s22 = smov 32  }
  0x2f   :  { %s6270_s20 = sld [smem:[%s7368_s0 + %s6037_s7]]   ;;  %s6041_s7 = smov 34  }
  0x30   :  { %7423 = sst [smem:[#allocation86_spill]] %s6245_s9 }
  0x31   :  { %s6265_s9 = sld [smem:[%s7368_s0 + %s6036_s28]]   ;;  %s6040_s28 = smov 33  }
  0x33   :  { %7424 = sst [smem:[#allocation87_spill]] %s6255_s19 }
  0x34   :  { %7425 = sst [smem:[#allocation88_spill]] %s6260_s4 }
  0x35   :  { %7427 = sst [smem:[#allocation90_spill]] %s6270_s20 }
  0x36   :  { %s6275_s19 = sld [smem:[%s7368_s0 + %s6038_s15]]   ;;  %s6042_s15 = smov 35  }
  0x37   :  { %7426 = sst [smem:[#allocation89_spill]] %s6265_s9 }
  0x38   :  { %s6280_s4 = sld [smem:[%s7368_s0 + %s6039_s22]]   ;;  %s6043_s22 = smov 36  }
  0x39   :  { %s6285_s9 = sld [smem:[%s7368_s0 + %s6040_s28]]   ;;  %s6044_s28 = smov 37  }
  0x3a   :  { %s6290_s20 = sld [smem:[%s7368_s0 + %s6041_s7]]   ;;  %s6045_s7 = smov 38  }
  0x3b   :  { %s6295_s6 = sld [smem:[%s7368_s0 + %s6042_s15]]   ;;  %s6046_s15 = smov 39  }
  0x3c   :  { %s6305_s24 = sld [smem:[%s7368_s0 + %s6044_s28]]   ;;  %s6048_s28 = smov 41  }
  0x3d   :  { %s6315_s29 = sld [smem:[%s7368_s0 + %s6046_s15]]   ;;  %s6050_s15 = smov 43  }
  0x3e   :  { %7428 = sst [smem:[#allocation91_spill]] %s6280_s4 }
  0x3f   :  { %s6300_s4 = sld [smem:[%s7368_s0 + %s6043_s22]]   ;;  %s6047_s22 = smov 40  }
  0x40   :  { %7429 = sst [smem:[#allocation92_spill]] %s6290_s20 }
  0x41   :  { %s6310_s20 = sld [smem:[%s7368_s0 + %s6045_s7]]   ;;  %s6049_s7 = smov 42  }
  0x42   :  { %s6325_s21 = sld [smem:[%s7368_s0 + %s6048_s28]]   ;;  %s6052_s28 = smov 45  }
  0x43   :  { %7432 = sst [smem:[#allocation95_spill]] %s6315_s29 }
  0x44   :  { %s6335_s29 = sld [smem:[%s7368_s0 + %s6050_s15]]   ;;  %s6054_s15 = smov 47  }
  0x45   :  { %7430 = sst [smem:[#allocation93_spill]] %s6300_s4 }
  0x46   :  { %s6320_s4 = sld [smem:[%s7368_s0 + %s6047_s22]]   ;;  %s6051_s22 = smov 44  }
  0x47   :  { %7431 = sst [smem:[#allocation94_spill]] %s6310_s20 }
  0x48   :  { %7434 = sst [smem:[#allocation97_spill]] %s6325_s21 }
  0x49   :  { %s6330_s20 = sld [smem:[%s7368_s0 + %s6049_s7]]   ;;  %s6053_s7 = smov 46  }
  0x4a   :  { %s6345_s21 = sld [smem:[%s7368_s0 + %s6052_s28]]   ;;  %s6056_s28 = smov 49  }
  0x4b   :  { %s6355_s13 = sld [smem:[%s7368_s0 + %s6054_s15]]   ;;  %s6058_s15 = smov 51  }
  0x4c   :  { %7433 = sst [smem:[#allocation96_spill]] %s6320_s4 }
  0x4d   :  { %s6340_s4 = sld [smem:[%s7368_s0 + %s6051_s22]]   ;;  %s6055_s22 = smov 48  }
  0x4f   :  { %7435 = sst [smem:[#allocation98_spill]] %s6330_s20 }
  0x50   :  { %7437 = sst [smem:[#allocation100_spill]] %s6345_s21 }
  0x51   :  { %s6350_s20 = sld [smem:[%s7368_s0 + %s6053_s7]]   ;;  %s6057_s7 = smov 50  }
  0x52   :  { %7439 = sst [smem:[#allocation102_spill]] %s6355_s13 }
  0x53   :  { %7436 = sst [smem:[#allocation99_spill]] %s6340_s4 }
  0x54   :  { %s6360_s4 = sld [smem:[%s7368_s0 + %s6055_s22]]   ;;  %s6059_s22 = smov 52  }
  0x55   :  { %s6365_s21 = sld [smem:[%s7368_s0 + %s6056_s28]]   ;;  %s6060_s28 = smov 53  }
  0x56   :  { %s6375_s13 = sld [smem:[%s7368_s0 + %s6058_s15]]   ;;  %s6062_s15 = smov 55  }
  0x57   :  { %7438 = sst [smem:[#allocation101_spill]] %s6350_s20 }
  0x58   :  { %s6370_s20 = sld [smem:[%s7368_s0 + %s6057_s7]]   ;;  %s6061_s7 = smov 54  }
  0x5a   :  { %7440 = sst [smem:[#allocation103_spill]] %s6360_s4 }
  0x5b   :  { %7441 = sst [smem:[#allocation104_spill]] %s6365_s21 }
  0x5c   :  { %7443 = sst [smem:[#allocation106_spill]] %s6375_s13 }
  0x5d   :  { %s6380_s4 = sld [smem:[%s7368_s0 + %s6059_s22]]   ;;  %s6063_s22 = smov 56  }
  0x5e   :  { %7442 = sst [smem:[#allocation105_spill]] %s6370_s20 }
  0x5f   :  { %s6385_s21 = sld [smem:[%s7368_s0 + %s6060_s28]]  }
  0x60   :  { %s6390_s20 = sld [smem:[%s7368_s0 + %s6061_s7]]  }
  0x61   :  { %s6395_s13 = sld [smem:[%s7368_s0 + %s6062_s15]]  }
  0x63   :  { %7444 = sst [smem:[#allocation107_spill]] %s6380_s4 }
  0x64   :  { %s6400_s4 = sld [smem:[%s7368_s0 + %s6063_s22]]  }
  0x65   :  { %118 = vsyncpa [#allocation3], 0 }
  0x66   :  { %119 = vsyncpa [#allocation5], 0 }
  0x67   :  { %120 = vsyncpa [#allocation8], 0 }
  0x68   :  { %121 = vsyncpa [#allocation11], 0 }
  0x69   :  { %122 = vsyncpa [#allocation14], 0 }
  0x6a   :  { %123 = vsyncpa [#allocation17], 0 }
  0x6b   :  { %124 = vsyncpa [#allocation20], 0 }
  0x6c   :  { %125 = vsyncpa [#allocation23], 0 }
  0x6d   :  { %126 = vsyncpa [#allocation26], 0 }
  0x6e   :  { %127 = vsyncpa [#allocation29], 0 }
  0x6f   :  { %128 = vsyncpa [#allocation32], 0 }
  0x70   :  { %129 = vsyncpa [#allocation35], 0 }
  0x71   :  { %130 = vsyncpa [#allocation38], 0 }
  0x72   :  { %131 = vsyncpa [#allocation41], 0 }
  0x73   :  { %132 = vsyncpa [#allocation44], 0 }
  0x74   :  { %133 = vsyncpa [#allocation47], 0  ;;  %s155_s28 = sshll.u32 %s6135_s17, 4  ;;  %s156_s28 = int_to_ptr.hbm [resolvable:$true] %s155_s28 }
  0x75   :  { %134 = vsyncpa [#allocation50], 0  ;;  %s6064_s0 = smov [#allocation4]   ;;  %s177_s2 = sshll.u32 %s6145_s25, 4  ;;  %s178_s2 = int_to_ptr.hbm [resolvable:$true] %s177_s2 }
  0x76   :  { %s157_s1 = sshll.u32 %s6064_s0, 4  ;;  %s5182_s7 = sshra.s32 %s156_s28, 4  ;;  %s158_s1 = int_to_ptr.vmem [resolvable:$true] %s157_s1  ;;  %s5183_s7 = int_to_ptr.hbm [resolvable:$true] %s5182_s7 }
  0x77   :  { %s5184_s10 = scalar_lea.hbm %s5183_s7, 1  ;;  %s5186_s11 = scalar_lea.hbm %s6135_s17, 1 }
  0x78   :  { %p5185_p0 = scmp.ne.s32.totalorder %s5183_s7, %s5184_s10  ;;  %p5187_p1 = scmp.lt.s32.totalorder %s5183_s7, %s6135_s17 }
  0x79   :  { %p5188_p2 = scmp.lt.s32.totalorder %s5186_s11, %s5184_s10 }
  0x7b   :  { %p5189_p3 = por %p5188_p2, %p5187_p1 }
  0x7d   :  { %p5190_p4 = pnand %p5189_p3, %p5185_p0 }
  0x7f   :  { %5193 = shalt.err (!%p5190_p4)
}
  0x80   :  { %160 = dma.hbm_to_vmem [thread:$0]  %s156_s28, 16, %s158_s1, [#allocation5]  }
  0x81   :  { %s6065_s15 = smov [#allocation7]   ;;  %s199_s18 = sshll.u32 %s6155_s3, 4  ;;  %s200_s18 = int_to_ptr.hbm [resolvable:$true] %s199_s18 }
  0x82   :  { %s179_s16 = sshll.u32 %s6065_s15, 4  ;;  %s5206_s22 = sshra.s32 %s178_s2, 4  ;;  %s180_s16 = int_to_ptr.vmem [resolvable:$true] %s179_s16  ;;  %s5207_s22 = int_to_ptr.hbm [resolvable:$true] %s5206_s22 }
  0x83   :  { %s5208_s23 = scalar_lea.hbm %s5207_s22, 1  ;;  %s5210_s26 = scalar_lea.hbm %s6145_s25, 1 }
  0x84   :  { %p5209_p5 = scmp.ne.s32.totalorder %s5207_s22, %s5208_s23  ;;  %p5211_p6 = scmp.lt.s32.totalorder %s5207_s22, %s6145_s25 }
  0x85   :  { %p5212_p7 = scmp.lt.s32.totalorder %s5210_s26, %s5208_s23 }
  0x87   :  { %p5213_p8 = por %p5212_p7, %p5211_p6 }
  0x89   :  { %p5214_p9 = pnand %p5213_p8, %p5209_p5 }
  0x8b   :  { %5217 = shalt.err (!%p5214_p9)
}
  0x8c   :  { %182 = dma.hbm_to_vmem [thread:$0]  %s178_s2, 16, %s180_s16, [#allocation8]  }
  0x8d   :  { %s227_s17 = sshll.u32 %s6180_s30, 4  ;;  %s6066_s28 = smov [#allocation10]   ;;  %s228_s17 = int_to_ptr.hbm [resolvable:$true] %s227_s17 }
  0x8e   :  { %s201_s0 = sshll.u32 %s6066_s28, 4  ;;  %s5230_s1 = sshra.s32 %s200_s18, 4  ;;  %s202_s0 = int_to_ptr.vmem [resolvable:$true] %s201_s0  ;;  %s5231_s1 = int_to_ptr.hbm [resolvable:$true] %s5230_s1 }
  0x8f   :  { %s5232_s7 = scalar_lea.hbm %s5231_s1, 1  ;;  %s5234_s10 = scalar_lea.hbm %s6155_s3, 1 }
  0x90   :  { %p5233_p10 = scmp.ne.s32.totalorder %s5231_s1, %s5232_s7  ;;  %p5235_p11 = scmp.lt.s32.totalorder %s5231_s1, %s6155_s3 }
  0x91   :  { %p5236_p12 = scmp.lt.s32.totalorder %s5234_s10, %s5232_s7 }
  0x93   :  { %p5237_p13 = por %p5236_p12, %p5235_p11 }
  0x95   :  { %p5238_p0 = pnand %p5237_p13, %p5233_p10 }
  0x97   :  { %5241 = shalt.err (!%p5238_p0)
}
  0x98   :  { %204 = dma.hbm_to_vmem [thread:$0]  %s200_s18, 16, %s202_s0, [#allocation11]  }
  0x99   :  { %s6067_s25 = smov [#allocation13]   ;;  %s249_s11 = sshll.u32 %s6190_s12, 4  ;;  %s250_s11 = int_to_ptr.hbm [resolvable:$true] %s249_s11 }
  0x9a   :  { %s229_s2 = sshll.u32 %s6067_s25, 4  ;;  %s5254_s15 = sshra.s32 %s228_s17, 4  ;;  %s230_s2 = int_to_ptr.vmem [resolvable:$true] %s229_s2  ;;  %s5255_s15 = int_to_ptr.hbm [resolvable:$true] %s5254_s15 }
  0x9b   :  { %s5256_s16 = scalar_lea.hbm %s5255_s15, 1  ;;  %s5258_s22 = scalar_lea.hbm %s6180_s30, 1 }
  0x9c   :  { %p5257_p1 = scmp.ne.s32.totalorder %s5255_s15, %s5256_s16  ;;  %p5259_p2 = scmp.lt.s32.totalorder %s5255_s15, %s6180_s30 }
  0x9d   :  { %p5260_p3 = scmp.lt.s32.totalorder %s5258_s22, %s5256_s16 }
  0x9f   :  { %p5261_p4 = por %p5260_p3, %p5259_p2 }
  0xa1   :  { %p5262_p5 = pnand %p5261_p4, %p5257_p1 }
  0xa3   :  { %5265 = shalt.err (!%p5262_p5)
}
  0xa4   :  { %232 = dma.hbm_to_vmem [thread:$0]  %s228_s17, 16, %s230_s2, [#allocation14]  }
  0xa5   :  { %s271_s3 = sshll.u32 %s6200_s27, 4  ;;  %s6068_s18 = smov [#allocation16]   ;;  %s272_s3 = int_to_ptr.hbm [resolvable:$true] %s271_s3 }
  0xa6   :  { %s251_s23 = sshll.u32 %s6068_s18, 4  ;;  %s5278_s26 = sshra.s32 %s250_s11, 4  ;;  %s252_s23 = int_to_ptr.vmem [resolvable:$true] %s251_s23  ;;  %s5279_s26 = int_to_ptr.hbm [resolvable:$true] %s5278_s26 }
  0xa7   :  { %s5280_s28 = scalar_lea.hbm %s5279_s26, 1  ;;  %s5282_s0 = scalar_lea.hbm %s6190_s12, 1 }
  0xa8   :  { %p5281_p6 = scmp.ne.s32.totalorder %s5279_s26, %s5280_s28  ;;  %p5283_p7 = scmp.lt.s32.totalorder %s5279_s26, %s6190_s12 }
  0xa9   :  { %p5284_p8 = scmp.lt.s32.totalorder %s5282_s0, %s5280_s28 }
  0xab   :  { %p5285_p9 = por %p5284_p8, %p5283_p7 }
  0xad   :  { %p5286_p10 = pnand %p5285_p9, %p5281_p6 }
  0xaf   :  { %5289 = shalt.err (!%p5286_p10)
}
  0xb0   :  { %254 = dma.hbm_to_vmem [thread:$0]  %s250_s11, 16, %s252_s23, [#allocation17]  }
  0xb1   :  { %s6069_s30 = smov [#allocation19]   ;;  %s293_s1 = sshll.u32 %s6210_s14, 4  ;;  %s294_s1 = int_to_ptr.hbm [resolvable:$true] %s293_s1 }
  0xb2   :  { %s273_s17 = sshll.u32 %s6069_s30, 4  ;;  %s5302_s7 = sshra.s32 %s272_s3, 4  ;;  %s274_s17 = int_to_ptr.vmem [resolvable:$true] %s273_s17  ;;  %s5303_s7 = int_to_ptr.hbm [resolvable:$true] %s5302_s7 }
  0xb3   :  { %s5304_s10 = scalar_lea.hbm %s5303_s7, 1  ;;  %s5306_s25 = scalar_lea.hbm %s6200_s27, 1 }
  0xb4   :  { %p5305_p11 = scmp.ne.s32.totalorder %s5303_s7, %s5304_s10  ;;  %p5307_p12 = scmp.lt.s32.totalorder %s5303_s7, %s6200_s27 }
  0xb5   :  { %p5308_p13 = scmp.lt.s32.totalorder %s5306_s25, %s5304_s10 }
  0xb7   :  { %p5309_p0 = por %p5308_p13, %p5307_p12 }
  0xb9   :  { %p5310_p1 = pnand %p5309_p0, %p5305_p11 }
  0xbb   :  { %5313 = shalt.err (!%p5310_p1)
}
  0xbc   :  { %276 = dma.hbm_to_vmem [thread:$0]  %s272_s3, 16, %s274_s17, [#allocation20]  }
  0xbd   :  { %s323_s12 = sshll.u32 %s6240_s8, 4  ;;  %s6070_s2 = smov [#allocation22]   ;;  %s324_s12 = int_to_ptr.hbm [resolvable:$true] %s323_s12 }
  0xbe   :  { %s295_s11 = sshll.u32 %s6070_s2, 4  ;;  %s5326_s15 = sshra.s32 %s294_s1, 4  ;;  %s296_s11 = int_to_ptr.vmem [resolvable:$true] %s295_s11  ;;  %s5327_s15 = int_to_ptr.hbm [resolvable:$true] %s5326_s15 }
  0xbf   :  { %s5328_s16 = scalar_lea.hbm %s5327_s15, 1  ;;  %s5330_s22 = scalar_lea.hbm %s6210_s14, 1 }
  0xc0   :  { %p5329_p2 = scmp.ne.s32.totalorder %s5327_s15, %s5328_s16  ;;  %p5331_p3 = scmp.lt.s32.totalorder %s5327_s15, %s6210_s14 }
  0xc1   :  { %p5332_p4 = scmp.lt.s32.totalorder %s5330_s22, %s5328_s16 }
  0xc3   :  { %p5333_p5 = por %p5332_p4, %p5331_p3 }
  0xc5   :  { %p5334_p6 = pnand %p5333_p5, %p5329_p2 }
  0xc7   :  { %5337 = shalt.err (!%p5334_p6)
}
  0xc8   :  { %298 = dma.hbm_to_vmem [thread:$0]  %s294_s1, 16, %s296_s11, [#allocation23]  }
  0xc9   :  { %s6071_s27 = smov [#allocation25]   ;;  %s345_s18 = sshll.u32 %s6250_s5, 4  ;;  %s346_s18 = int_to_ptr.hbm [resolvable:$true] %s345_s18 }
  0xca   :  { %s325_s3 = sshll.u32 %s6071_s27, 4  ;;  %s5350_s23 = sshra.s32 %s324_s12, 4  ;;  %s326_s3 = int_to_ptr.vmem [resolvable:$true] %s325_s3  ;;  %s5351_s23 = int_to_ptr.hbm [resolvable:$true] %s5350_s23 }
  0xcb   :  { %s5352_s26 = scalar_lea.hbm %s5351_s23, 1  ;;  %s5354_s28 = scalar_lea.hbm %s6240_s8, 1 }
  0xcc   :  { %p5353_p7 = scmp.ne.s32.totalorder %s5351_s23, %s5352_s26  ;;  %p5355_p8 = scmp.lt.s32.totalorder %s5351_s23, %s6240_s8 }
  0xcd   :  { %p5356_p9 = scmp.lt.s32.totalorder %s5354_s28, %s5352_s26 }
  0xcf   :  { %p5357_p10 = por %p5356_p9, %p5355_p8 }
  0xd1   :  { %p5358_p11 = pnand %p5357_p10, %p5353_p7 }
  0xd3   :  { %5361 = shalt.err (!%p5358_p11)
}
  0xd4   :  { %328 = dma.hbm_to_vmem [thread:$0]  %s324_s12, 16, %s326_s3, [#allocation26]  }
  0xd5   :  { %s373_s14 = sshll.u32 %s6275_s19, 4  ;;  %s6072_s0 = smov [#allocation28]   ;;  %s374_s14 = int_to_ptr.hbm [resolvable:$true] %s373_s14 }
  0xd6   :  { %s347_s30 = sshll.u32 %s6072_s0, 4  ;;  %s5374_s17 = sshra.s32 %s346_s18, 4  ;;  %s348_s30 = int_to_ptr.vmem [resolvable:$true] %s347_s30  ;;  %s5375_s17 = int_to_ptr.hbm [resolvable:$true] %s5374_s17 }
  0xd7   :  { %s5376_s1 = scalar_lea.hbm %s5375_s17, 1  ;;  %s5378_s7 = scalar_lea.hbm %s6250_s5, 1 }
  0xd8   :  { %p5377_p12 = scmp.ne.s32.totalorder %s5375_s17, %s5376_s1  ;;  %p5379_p13 = scmp.lt.s32.totalorder %s5375_s17, %s6250_s5 }
  0xd9   :  { %p5380_p0 = scmp.lt.s32.totalorder %s5378_s7, %s5376_s1 }
  0xdb   :  { %p5381_p1 = por %p5380_p0, %p5379_p13 }
  0xdd   :  { %p5382_p2 = pnand %p5381_p1, %p5377_p12 }
  0xdf   :  { %5385 = shalt.err (!%p5382_p2)
}
  0xe0   :  { %350 = dma.hbm_to_vmem [thread:$0]  %s346_s18, 16, %s348_s30, [#allocation29]  }
  0xe1   :  { %s6073_s8 = smov [#allocation31]   ;;  %s395_s25 = sshll.u32 %s6285_s9, 4  ;;  %s396_s25 = int_to_ptr.hbm [resolvable:$true] %s395_s25 }
  0xe2   :  { %s375_s10 = sshll.u32 %s6073_s8, 4  ;;  %s5398_s12 = sshra.s32 %s374_s14, 4  ;;  %s376_s10 = int_to_ptr.vmem [resolvable:$true] %s375_s10  ;;  %s5399_s12 = int_to_ptr.hbm [resolvable:$true] %s5398_s12 }
  0xe3   :  { %s5400_s2 = scalar_lea.hbm %s5399_s12, 1  ;;  %s5402_s11 = scalar_lea.hbm %s6275_s19, 1 }
  0xe4   :  { %p5401_p3 = scmp.ne.s32.totalorder %s5399_s12, %s5400_s2  ;;  %p5403_p4 = scmp.lt.s32.totalorder %s5399_s12, %s6275_s19 }
  0xe5   :  { %p5404_p5 = scmp.lt.s32.totalorder %s5402_s11, %s5400_s2 }
  0xe7   :  { %p5405_p6 = por %p5404_p5, %p5403_p4 }
  0xe9   :  { %p5406_p7 = pnand %p5405_p6, %p5401_p3 }
  0xeb   :  { %5409 = shalt.err (!%p5406_p7)
}
  0xec   :  { %378 = dma.hbm_to_vmem [thread:$0]  %s374_s14, 16, %s376_s10, [#allocation32]  }
  0xed   :  { %s417_s5 = sshll.u32 %s6295_s6, 4  ;;  %s6074_s15 = smov [#allocation34]   ;;  %s418_s5 = int_to_ptr.hbm [resolvable:$true] %s417_s5 }
  0xee   :  { %s397_s16 = sshll.u32 %s6074_s15, 4  ;;  %s5422_s22 = sshra.s32 %s396_s25, 4  ;;  %s398_s16 = int_to_ptr.vmem [resolvable:$true] %s397_s16  ;;  %s5423_s22 = int_to_ptr.hbm [resolvable:$true] %s5422_s22 }
  0xef   :  { %s5424_s27 = scalar_lea.hbm %s5423_s22, 1  ;;  %s5426_s3 = scalar_lea.hbm %s6285_s9, 1 }
  0xf0   :  { %p5425_p8 = scmp.ne.s32.totalorder %s5423_s22, %s5424_s27  ;;  %p5427_p9 = scmp.lt.s32.totalorder %s5423_s22, %s6285_s9 }
  0xf1   :  { %p5428_p10 = scmp.lt.s32.totalorder %s5426_s3, %s5424_s27 }
  0xf3   :  { %p5429_p11 = por %p5428_p10, %p5427_p9 }
  0xf5   :  { %p5430_p12 = pnand %p5429_p11, %p5425_p8 }
  0xf7   :  { %5433 = shalt.err (!%p5430_p12)
}
  0xf8   :  { %400 = dma.hbm_to_vmem [thread:$0]  %s396_s25, 16, %s398_s16, [#allocation35]  }
  0xf9   :  { %s6075_s19 = smov [#allocation37]   ;;  %s439_s23 = sshll.u32 %s6305_s24, 4  ;;  %s440_s23 = int_to_ptr.hbm [resolvable:$true] %s439_s23 }
  0xfa   :  { %s419_s18 = sshll.u32 %s6075_s19, 4  ;;  %s5446_s26 = sshra.s32 %s418_s5, 4  ;;  %s420_s18 = int_to_ptr.vmem [resolvable:$true] %s419_s18  ;;  %s5447_s26 = int_to_ptr.hbm [resolvable:$true] %s5446_s26 }
  0xfb   :  { %s5448_s28 = scalar_lea.hbm %s5447_s26, 1  ;;  %s5450_s14 = scalar_lea.hbm %s6295_s6, 1 }
  0xfc   :  { %p5449_p13 = scmp.ne.s32.totalorder %s5447_s26, %s5448_s28  ;;  %p5451_p0 = scmp.lt.s32.totalorder %s5447_s26, %s6295_s6 }
  0xfd   :  { %p5452_p1 = scmp.lt.s32.totalorder %s5450_s14, %s5448_s28 }
  0xff   :  { %p5453_p2 = por %p5452_p1, %p5451_p0 }
 0x101   :  { %p5454_p3 = pnand %p5453_p2, %p5449_p13 }
 0x103   :  { %5457 = shalt.err (!%p5454_p3)
}
 0x104   :  { %422 = dma.hbm_to_vmem [thread:$0]  %s418_s5, 16, %s420_s18, [#allocation38]  }
 0x105   :  { %s469_s9 = sshll.u32 %s6335_s29, 4  ;;  %s6076_s0 = smov [#allocation40]   ;;  %s470_s9 = int_to_ptr.hbm [resolvable:$true] %s469_s9 }
 0x106   :  { %s441_s30 = sshll.u32 %s6076_s0, 4  ;;  %s5470_s17 = sshra.s32 %s440_s23, 4  ;;  %s442_s30 = int_to_ptr.vmem [resolvable:$true] %s441_s30  ;;  %s5471_s17 = int_to_ptr.hbm [resolvable:$true] %s5470_s17 }
 0x107   :  { %s5472_s1 = scalar_lea.hbm %s5471_s17, 1  ;;  %s5474_s7 = scalar_lea.hbm %s6305_s24, 1 }
 0x108   :  { %p5473_p4 = scmp.ne.s32.totalorder %s5471_s17, %s5472_s1  ;;  %p5475_p5 = scmp.lt.s32.totalorder %s5471_s17, %s6305_s24 }
 0x109   :  { %p5476_p6 = scmp.lt.s32.totalorder %s5474_s7, %s5472_s1 }
 0x10b   :  { %p5477_p7 = por %p5476_p6, %p5475_p5 }
 0x10d   :  { %p5478_p8 = pnand %p5477_p7, %p5473_p4 }
 0x10f   :  { %5481 = shalt.err (!%p5478_p8)
}
 0x110   :  { %444 = dma.hbm_to_vmem [thread:$0]  %s440_s23, 16, %s442_s30, [#allocation41]  }
 0x111   :  { %s7445_s6 = sld [smem:[#allocation100_spill]]  ;;  %s6077_s8 = smov [#allocation43]  }
 0x112   :  { %s471_s10 = sshll.u32 %s6077_s8, 4  ;;  %s5494_s12 = sshra.s32 %s470_s9, 4  ;;  %s472_s10 = int_to_ptr.vmem [resolvable:$true] %s471_s10  ;;  %s5495_s12 = int_to_ptr.hbm [resolvable:$true] %s5494_s12 }
 0x113   :  { %s5496_s2 = scalar_lea.hbm %s5495_s12, 1  ;;  %s5498_s11 = scalar_lea.hbm %s6335_s29, 1 }
 0x114   :  { %p5497_p9 = scmp.ne.s32.totalorder %s5495_s12, %s5496_s2  ;;  %p5499_p10 = scmp.lt.s32.totalorder %s5495_s12, %s6335_s29 }
 0x115   :  { %p5500_p11 = scmp.lt.s32.totalorder %s5498_s11, %s5496_s2 }
 0x117   :  { %s491_s25 = sshll.u32 %s7445_s6, 4  ;;  %p5501_p12 = por %p5500_p11, %p5499_p10  ;;  %s492_s25 = int_to_ptr.hbm [resolvable:$true] %s491_s25 }
 0x119   :  { %p5502_p13 = pnand %p5501_p12, %p5497_p9 }
 0x11b   :  { %5505 = shalt.err (!%p5502_p13)
}
 0x11c   :  { %474 = dma.hbm_to_vmem [thread:$0]  %s470_s9, 16, %s472_s10, [#allocation44]  }
 0x11d   :  { %s7446_s24 = sld [smem:[#allocation102_spill]]  ;;  %s6078_s15 = smov [#allocation46]  }
 0x11e   :  { %s493_s16 = sshll.u32 %s6078_s15, 4  ;;  %s5518_s22 = sshra.s32 %s492_s25, 4  ;;  %s494_s16 = int_to_ptr.vmem [resolvable:$true] %s493_s16  ;;  %s5519_s22 = int_to_ptr.hbm [resolvable:$true] %s5518_s22 }
 0x11f   :  { %s5520_s27 = scalar_lea.hbm %s5519_s22, 1  ;;  %s5522_s3 = scalar_lea.hbm %s7445_s6, 1 }
 0x120   :  { %p5521_p0 = scmp.ne.s32.totalorder %s5519_s22, %s5520_s27  ;;  %p5523_p1 = scmp.lt.s32.totalorder %s5519_s22, %s7445_s6 }
 0x121   :  { %p5524_p2 = scmp.lt.s32.totalorder %s5522_s3, %s5520_s27 }
 0x123   :  { %s513_s5 = sshll.u32 %s7446_s24, 4  ;;  %p5525_p3 = por %p5524_p2, %p5523_p1  ;;  %s514_s5 = int_to_ptr.hbm [resolvable:$true] %s513_s5 }
 0x125   :  { %p5526_p4 = pnand %p5525_p3, %p5521_p0 }
 0x127   :  { %5529 = shalt.err (!%p5526_p4)
}
 0x128   :  { %496 = dma.hbm_to_vmem [thread:$0]  %s492_s25, 16, %s494_s16, [#allocation47]  }
 0x129   :  { %s7447_s29 = sld [smem:[#allocation71_spill]]  ;;  %s6079_s19 = smov [#allocation49]  }
 0x12a   :  { %s515_s18 = sshll.u32 %s6079_s19, 4  ;;  %s5542_s26 = sshra.s32 %s514_s5, 4  ;;  %s516_s18 = int_to_ptr.vmem [resolvable:$true] %s515_s18  ;;  %s5543_s26 = int_to_ptr.hbm [resolvable:$true] %s5542_s26 }
 0x12b   :  { %s5544_s28 = scalar_lea.hbm %s5543_s26, 1  ;;  %s5546_s14 = scalar_lea.hbm %s7446_s24, 1 }
 0x12c   :  { %p5545_p5 = scmp.ne.s32.totalorder %s5543_s26, %s5544_s28  ;;  %p5547_p6 = scmp.lt.s32.totalorder %s5543_s26, %s7446_s24 }
 0x12d   :  { %p5548_p7 = scmp.lt.s32.totalorder %s5546_s14, %s5544_s28 }
 0x12f   :  { %s144_s23 = sshll.u32 %s7447_s29, 4  ;;  %p5549_p8 = por %p5548_p7, %p5547_p6  ;;  %s145_s23 = int_to_ptr.hbm [resolvable:$true] %s144_s23 }
 0x131   :  { %p5550_p9 = pnand %p5549_p8, %p5545_p5 }
 0x133   :  { %5553 = shalt.err (!%p5550_p9)
}
 0x134   :  { %518 = dma.hbm_to_vmem [thread:$0]  %s514_s5, 16, %s516_s18, [#allocation50]  }
 0x135   :  { %s7448_s9 = sld [smem:[#allocation72_spill]]  ;;  %s6080_s30 = smov [#allocation2]  }
 0x136   :  { %s146_s17 = sshll.u32 %s6080_s30, 4  ;;  %s5566_s1 = sshra.s32 %s145_s23, 4  ;;  %s147_s17 = int_to_ptr.vmem [resolvable:$true] %s146_s17  ;;  %s5567_s1 = int_to_ptr.hbm [resolvable:$true] %s5566_s1 }
 0x137   :  { %s5568_s7 = scalar_lea.hbm %s5567_s1, 1  ;;  %s5570_s6 = scalar_lea.hbm %s7447_s29, 1 }
 0x138   :  { %p5569_p10 = scmp.ne.s32.totalorder %s5567_s1, %s5568_s7  ;;  %p5571_p11 = scmp.lt.s32.totalorder %s5567_s1, %s7447_s29 }
 0x139   :  { %p5572_p12 = scmp.lt.s32.totalorder %s5570_s6, %s5568_s7 }
 0x13b   :  { %s166_s0 = sshll.u32 %s7448_s9, 4  ;;  %p5573_p13 = por %p5572_p12, %p5571_p11  ;;  %s167_s0 = int_to_ptr.hbm [resolvable:$true] %s166_s0 }
 0x13d   :  { %p5574_p0 = pnand %p5573_p13, %p5569_p10 }
 0x13f   :  { %5577 = shalt.err (!%p5574_p0)
}
 0x140   :  { %149 = dma.hbm_to_vmem [thread:$0]  %s145_s23, 16, %s147_s17, [#allocation3]  }
 0x141   :  { %s7449_s8 = sld [smem:[#allocation73_spill]]  ;;  %s6081_s10 = smov [#allocation6]  }
 0x142   :  { %s168_s25 = sshll.u32 %s6081_s10, 4  ;;  %s5590_s2 = sshra.s32 %s167_s0, 4  ;;  %s169_s25 = int_to_ptr.vmem [resolvable:$true] %s168_s25  ;;  %s5591_s2 = int_to_ptr.hbm [resolvable:$true] %s5590_s2 }
 0x143   :  { %s5592_s11 = scalar_lea.hbm %s5591_s2, 1  ;;  %s5594_s24 = scalar_lea.hbm %s7448_s9, 1 }
 0x144   :  { %p5593_p1 = scmp.ne.s32.totalorder %s5591_s2, %s5592_s11  ;;  %p5595_p2 = scmp.lt.s32.totalorder %s5591_s2, %s7448_s9 }
 0x145   :  { %p5596_p3 = scmp.lt.s32.totalorder %s5594_s24, %s5592_s11 }
 0x147   :  { %s188_s12 = sshll.u32 %s7449_s8, 4  ;;  %p5597_p4 = por %p5596_p3, %p5595_p2  ;;  %s189_s12 = int_to_ptr.hbm [resolvable:$true] %s188_s12 }
 0x149   :  { %p5598_p5 = pnand %p5597_p4, %p5593_p1 }
 0x14b   :  { %5601 = shalt.err (!%p5598_p5)
}
 0x14c   :  { %171 = dma.hbm_to_vmem [thread:$0]  %s167_s0, 16, %s169_s25, [#allocation5]  }
 0x14d   :  { %s7450_s5 = sld [smem:[#allocation77_spill]]  ;;  %s6082_s16 = smov [#allocation9]  }
 0x14e   :  { %s190_s22 = sshll.u32 %s6082_s16, 4  ;;  %s5614_s27 = sshra.s32 %s189_s12, 4  ;;  %s191_s22 = int_to_ptr.vmem [resolvable:$true] %s190_s22  ;;  %s5615_s27 = int_to_ptr.hbm [resolvable:$true] %s5614_s27 }
 0x14f   :  { %s5616_s3 = scalar_lea.hbm %s5615_s27, 1  ;;  %s5618_s29 = scalar_lea.hbm %s7449_s8, 1 }
 0x150   :  { %p5617_p6 = scmp.ne.s32.totalorder %s5615_s27, %s5616_s3  ;;  %p5619_p7 = scmp.lt.s32.totalorder %s5615_s27, %s7449_s8 }
 0x151   :  { %p5620_p8 = scmp.lt.s32.totalorder %s5618_s29, %s5616_s3 }
 0x153   :  { %s216_s15 = sshll.u32 %s7450_s5, 4  ;;  %p5621_p9 = por %p5620_p8, %p5619_p7  ;;  %s217_s15 = int_to_ptr.hbm [resolvable:$true] %s216_s15 }
 0x155   :  { %p5622_p10 = pnand %p5621_p9, %p5617_p6 }
 0x157   :  { %5625 = shalt.err (!%p5622_p10)
}
 0x158   :  { %193 = dma.hbm_to_vmem [thread:$0]  %s189_s12, 16, %s191_s22, [#allocation8]  }
 0x159   :  { %s7451_s19 = sld [smem:[#allocation78_spill]]  ;;  %s6083_s18 = smov [#allocation12]  }
 0x15a   :  { %s218_s23 = sshll.u32 %s6083_s18, 4  ;;  %s5638_s28 = sshra.s32 %s217_s15, 4  ;;  %s219_s23 = int_to_ptr.vmem [resolvable:$true] %s218_s23  ;;  %s5639_s28 = int_to_ptr.hbm [resolvable:$true] %s5638_s28 }
 0x15b   :  { %s5640_s14 = scalar_lea.hbm %s5639_s28, 1  ;;  %s5642_s9 = scalar_lea.hbm %s7450_s5, 1 }
 0x15c   :  { %p5641_p11 = scmp.ne.s32.totalorder %s5639_s28, %s5640_s14  ;;  %p5643_p12 = scmp.lt.s32.totalorder %s5639_s28, %s7450_s5 }
 0x15d   :  { %p5644_p13 = scmp.lt.s32.totalorder %s5642_s9, %s5640_s14 }
 0x15f   :  { %s238_s26 = sshll.u32 %s7451_s19, 4  ;;  %p5645_p0 = por %p5644_p13, %p5643_p12  ;;  %s239_s26 = int_to_ptr.hbm [resolvable:$true] %s238_s26 }
 0x161   :  { %p5646_p1 = pnand %p5645_p0, %p5641_p11 }
 0x163   :  { %5649 = shalt.err (!%p5646_p1)
}
 0x164   :  { %221 = dma.hbm_to_vmem [thread:$0]  %s217_s15, 16, %s219_s23, [#allocation11]  }
 0x165   :  { %s7452_s0 = sld [smem:[#allocation79_spill]]  ;;  %s6084_s17 = smov [#allocation15]  }
 0x166   :  { %s240_s1 = sshll.u32 %s6084_s17, 4  ;;  %s5662_s7 = sshra.s32 %s239_s26, 4  ;;  %s241_s1 = int_to_ptr.vmem [resolvable:$true] %s240_s1  ;;  %s5663_s7 = int_to_ptr.hbm [resolvable:$true] %s5662_s7 }
 0x167   :  { %s5664_s6 = scalar_lea.hbm %s5663_s7, 1  ;;  %s5666_s8 = scalar_lea.hbm %s7451_s19, 1 }
 0x168   :  { %p5665_p2 = scmp.ne.s32.totalorder %s5663_s7, %s5664_s6  ;;  %p5667_p3 = scmp.lt.s32.totalorder %s5663_s7, %s7451_s19 }
 0x169   :  { %p5668_p4 = scmp.lt.s32.totalorder %s5666_s8, %s5664_s6 }
 0x16b   :  { %s260_s30 = sshll.u32 %s7452_s0, 4  ;;  %p5669_p5 = por %p5668_p4, %p5667_p3  ;;  %s261_s30 = int_to_ptr.hbm [resolvable:$true] %s260_s30 }
 0x16d   :  { %p5670_p6 = pnand %p5669_p5, %p5665_p2 }
 0x16f   :  { %5673 = shalt.err (!%p5670_p6)
}
 0x170   :  { %243 = dma.hbm_to_vmem [thread:$0]  %s239_s26, 16, %s241_s1, [#allocation14]  }
 0x171   :  { %s7453_s10 = sld [smem:[#allocation80_spill]]  ;;  %s6085_s25 = smov [#allocation18]  }
 0x172   :  { %s262_s12 = sshll.u32 %s6085_s25, 4  ;;  %s5686_s11 = sshra.s32 %s261_s30, 4  ;;  %s263_s12 = int_to_ptr.vmem [resolvable:$true] %s262_s12  ;;  %s5687_s11 = int_to_ptr.hbm [resolvable:$true] %s5686_s11 }
 0x173   :  { %s5688_s24 = scalar_lea.hbm %s5687_s11, 1  ;;  %s5690_s5 = scalar_lea.hbm %s7452_s0, 1 }
 0x174   :  { %p5689_p7 = scmp.ne.s32.totalorder %s5687_s11, %s5688_s24  ;;  %p5691_p8 = scmp.lt.s32.totalorder %s5687_s11, %s7452_s0 }
 0x175   :  { %p5692_p9 = scmp.lt.s32.totalorder %s5690_s5, %s5688_s24 }
 0x177   :  { %s282_s2 = sshll.u32 %s7453_s10, 4  ;;  %p5693_p10 = por %p5692_p9, %p5691_p8  ;;  %s283_s2 = int_to_ptr.hbm [resolvable:$true] %s282_s2 }
 0x179   :  { %p5694_p11 = pnand %p5693_p10, %p5689_p7 }
 0x17b   :  { %5697 = shalt.err (!%p5694_p11)
}
 0x17c   :  { %265 = dma.hbm_to_vmem [thread:$0]  %s261_s30, 16, %s263_s12, [#allocation17]  }
 0x17d   :  { %s7454_s15 = sld [smem:[#allocation85_spill]]  ;;  %s6086_s22 = smov [#allocation21]  }
 0x17e   :  { %s284_s27 = sshll.u32 %s6086_s22, 4  ;;  %s5710_s3 = sshra.s32 %s283_s2, 4  ;;  %s285_s27 = int_to_ptr.vmem [resolvable:$true] %s284_s27  ;;  %s5711_s3 = int_to_ptr.hbm [resolvable:$true] %s5710_s3 }
 0x17f   :  { %s5712_s29 = scalar_lea.hbm %s5711_s3, 1  ;;  %s5714_s19 = scalar_lea.hbm %s7453_s10, 1 }
 0x180   :  { %p5713_p12 = scmp.ne.s32.totalorder %s5711_s3, %s5712_s29  ;;  %p5715_p13 = scmp.lt.s32.totalorder %s5711_s3, %s7453_s10 }
 0x181   :  { %p5716_p0 = scmp.lt.s32.totalorder %s5714_s19, %s5712_s29 }
 0x183   :  { %s312_s16 = sshll.u32 %s7454_s15, 4  ;;  %p5717_p1 = por %p5716_p0, %p5715_p13  ;;  %s313_s16 = int_to_ptr.hbm [resolvable:$true] %s312_s16 }
 0x185   :  { %p5718_p2 = pnand %p5717_p1, %p5713_p12 }
 0x187   :  { %5721 = shalt.err (!%p5718_p2)
}
 0x188   :  { %287 = dma.hbm_to_vmem [thread:$0]  %s283_s2, 16, %s285_s27, [#allocation20]  }
 0x189   :  { %s7455_s18 = sld [smem:[#allocation86_spill]]  ;;  %s6087_s23 = smov [#allocation24]  }
 0x18a   :  { %s314_s26 = sshll.u32 %s6087_s23, 4  ;;  %s5734_s14 = sshra.s32 %s313_s16, 4  ;;  %s315_s26 = int_to_ptr.vmem [resolvable:$true] %s314_s26  ;;  %s5735_s14 = int_to_ptr.hbm [resolvable:$true] %s5734_s14 }
 0x18b   :  { %s5736_s9 = scalar_lea.hbm %s5735_s14, 1  ;;  %s5738_s0 = scalar_lea.hbm %s7454_s15, 1 }
 0x18c   :  { %p5737_p3 = scmp.ne.s32.totalorder %s5735_s14, %s5736_s9  ;;  %p5739_p4 = scmp.lt.s32.totalorder %s5735_s14, %s7454_s15 }
 0x18d   :  { %p5740_p5 = scmp.lt.s32.totalorder %s5738_s0, %s5736_s9 }
 0x18f   :  { %s334_s28 = sshll.u32 %s7455_s18, 4  ;;  %p5741_p6 = por %p5740_p5, %p5739_p4  ;;  %s335_s28 = int_to_ptr.hbm [resolvable:$true] %s334_s28 }
 0x191   :  { %p5742_p7 = pnand %p5741_p6, %p5737_p3 }
 0x193   :  { %5745 = shalt.err (!%p5742_p7)
}
 0x194   :  { %317 = dma.hbm_to_vmem [thread:$0]  %s313_s16, 16, %s315_s26, [#allocation23]  }
 0x195   :  { %s7456_s30 = sld [smem:[#allocation87_spill]]  ;;  %s6088_s1 = smov [#allocation27]  }
 0x196   :  { %s336_s7 = sshll.u32 %s6088_s1, 4  ;;  %s5758_s6 = sshra.s32 %s335_s28, 4  ;;  %s337_s7 = int_to_ptr.vmem [resolvable:$true] %s336_s7  ;;  %s5759_s6 = int_to_ptr.hbm [resolvable:$true] %s5758_s6 }
 0x197   :  { %s5760_s8 = scalar_lea.hbm %s5759_s6, 1  ;;  %s5762_s10 = scalar_lea.hbm %s7455_s18, 1 }
 0x198   :  { %p5761_p8 = scmp.ne.s32.totalorder %s5759_s6, %s5760_s8  ;;  %p5763_p9 = scmp.lt.s32.totalorder %s5759_s6, %s7455_s18 }
 0x199   :  { %p5764_p10 = scmp.lt.s32.totalorder %s5762_s10, %s5760_s8 }
 0x19b   :  { %s356_s17 = sshll.u32 %s7456_s30, 4  ;;  %p5765_p11 = por %p5764_p10, %p5763_p9  ;;  %s357_s17 = int_to_ptr.hbm [resolvable:$true] %s356_s17 }
 0x19d   :  { %p5766_p12 = pnand %p5765_p11, %p5761_p8 }
 0x19f   :  { %5769 = shalt.err (!%p5766_p12)
}
 0x1a0   :  { %339 = dma.hbm_to_vmem [thread:$0]  %s335_s28, 16, %s337_s7, [#allocation26]  }
 0x1a1   :  { %s7457_s25 = sld [smem:[#allocation91_spill]]  ;;  %s6089_s12 = smov [#allocation30]  }
 0x1a2   :  { %s358_s2 = sshll.u32 %s6089_s12, 4  ;;  %s5782_s24 = sshra.s32 %s357_s17, 4  ;;  %s359_s2 = int_to_ptr.vmem [resolvable:$true] %s358_s2  ;;  %s5783_s24 = int_to_ptr.hbm [resolvable:$true] %s5782_s24 }
 0x1a3   :  { %s5784_s5 = scalar_lea.hbm %s5783_s24, 1  ;;  %s5786_s15 = scalar_lea.hbm %s7456_s30, 1 }
 0x1a4   :  { %p5785_p13 = scmp.ne.s32.totalorder %s5783_s24, %s5784_s5  ;;  %p5787_p0 = scmp.lt.s32.totalorder %s5783_s24, %s7456_s30 }
 0x1a5   :  { %p5788_p1 = scmp.lt.s32.totalorder %s5786_s15, %s5784_s5 }
 0x1a7   :  { %s384_s11 = sshll.u32 %s7457_s25, 4  ;;  %p5789_p2 = por %p5788_p1, %p5787_p0  ;;  %s385_s11 = int_to_ptr.hbm [resolvable:$true] %s384_s11 }
 0x1a9   :  { %p5790_p3 = pnand %p5789_p2, %p5785_p13 }
 0x1ab   :  { %5793 = shalt.err (!%p5790_p3)
}
 0x1ac   :  { %361 = dma.hbm_to_vmem [thread:$0]  %s357_s17, 16, %s359_s2, [#allocation29]  }
 0x1ad   :  { %s7458_s16 = sld [smem:[#allocation92_spill]]  ;;  %s6090_s27 = smov [#allocation33]  }
 0x1ae   :  { %s386_s3 = sshll.u32 %s6090_s27, 4  ;;  %s5806_s29 = sshra.s32 %s385_s11, 4  ;;  %s387_s3 = int_to_ptr.vmem [resolvable:$true] %s386_s3  ;;  %s5807_s29 = int_to_ptr.hbm [resolvable:$true] %s5806_s29 }
 0x1af   :  { %s5808_s19 = scalar_lea.hbm %s5807_s29, 1  ;;  %s5810_s18 = scalar_lea.hbm %s7457_s25, 1 }
 0x1b0   :  { %p5809_p4 = scmp.ne.s32.totalorder %s5807_s29, %s5808_s19  ;;  %p5811_p5 = scmp.lt.s32.totalorder %s5807_s29, %s7457_s25 }
 0x1b1   :  { %p5812_p6 = scmp.lt.s32.totalorder %s5810_s18, %s5808_s19 }
 0x1b3   :  { %s406_s22 = sshll.u32 %s7458_s16, 4  ;;  %p5813_p7 = por %p5812_p6, %p5811_p5  ;;  %s407_s22 = int_to_ptr.hbm [resolvable:$true] %s406_s22 }
 0x1b5   :  { %p5814_p8 = pnand %p5813_p7, %p5809_p4 }
 0x1b7   :  { %5817 = shalt.err (!%p5814_p8)
}
 0x1b8   :  { %389 = dma.hbm_to_vmem [thread:$0]  %s385_s11, 16, %s387_s3, [#allocation32]  }
 0x1b9   :  { %s7459_s23 = sld [smem:[#allocation93_spill]]  ;;  %s6091_s26 = smov [#allocation36]  }
 0x1ba   :  { %s408_s28 = sshll.u32 %s6091_s26, 4  ;;  %s5830_s9 = sshra.s32 %s407_s22, 4  ;;  %s409_s28 = int_to_ptr.vmem [resolvable:$true] %s408_s28  ;;  %s5831_s9 = int_to_ptr.hbm [resolvable:$true] %s5830_s9 }
 0x1bb   :  { %s5832_s0 = scalar_lea.hbm %s5831_s9, 1  ;;  %s5834_s30 = scalar_lea.hbm %s7458_s16, 1 }
 0x1bc   :  { %p5833_p9 = scmp.ne.s32.totalorder %s5831_s9, %s5832_s0  ;;  %p5835_p10 = scmp.lt.s32.totalorder %s5831_s9, %s7458_s16 }
 0x1bd   :  { %p5836_p11 = scmp.lt.s32.totalorder %s5834_s30, %s5832_s0 }
 0x1bf   :  { %s428_s14 = sshll.u32 %s7459_s23, 4  ;;  %p5837_p12 = por %p5836_p11, %p5835_p10  ;;  %s429_s14 = int_to_ptr.hbm [resolvable:$true] %s428_s14 }
 0x1c1   :  { %p5838_p13 = pnand %p5837_p12, %p5833_p9 }
 0x1c3   :  { %5841 = shalt.err (!%p5838_p13)
}
 0x1c4   :  { %411 = dma.hbm_to_vmem [thread:$0]  %s407_s22, 16, %s409_s28, [#allocation35]  }
 0x1c5   :  { %s7460_s17 = sld [smem:[#allocation94_spill]]  ;;  %s6092_s7 = smov [#allocation39]  }
 0x1c6   :  { %s430_s6 = sshll.u32 %s6092_s7, 4  ;;  %s5854_s8 = sshra.s32 %s429_s14, 4  ;;  %s431_s6 = int_to_ptr.vmem [resolvable:$true] %s430_s6  ;;  %s5855_s8 = int_to_ptr.hbm [resolvable:$true] %s5854_s8 }
 0x1c7   :  { %s5856_s10 = scalar_lea.hbm %s5855_s8, 1  ;;  %s5858_s25 = scalar_lea.hbm %s7459_s23, 1 }
 0x1c8   :  { %p5857_p0 = scmp.ne.s32.totalorder %s5855_s8, %s5856_s10  ;;  %p5859_p1 = scmp.lt.s32.totalorder %s5855_s8, %s7459_s23 }
 0x1c9   :  { %p5860_p2 = scmp.lt.s32.totalorder %s5858_s25, %s5856_s10 }
 0x1cb   :  { %s450_s1 = sshll.u32 %s7460_s17, 4  ;;  %p5861_p3 = por %p5860_p2, %p5859_p1  ;;  %s451_s1 = int_to_ptr.hbm [resolvable:$true] %s450_s1 }
 0x1cd   :  { %p5862_p4 = pnand %p5861_p3, %p5857_p0 }
 0x1cf   :  { %5865 = shalt.err (!%p5862_p4)
}
 0x1d0   :  { %433 = dma.hbm_to_vmem [thread:$0]  %s429_s14, 16, %s431_s6, [#allocation38]  }
 0x1d1   :  { %s7461_s12 = sld [smem:[#allocation99_spill]]  ;;  %s6093_s2 = smov [#allocation42]  }
 0x1d2   :  { %s452_s11 = sshll.u32 %s6093_s2, 4  ;;  %s5878_s5 = sshra.s32 %s451_s1, 4  ;;  %s453_s11 = int_to_ptr.vmem [resolvable:$true] %s452_s11  ;;  %s5879_s5 = int_to_ptr.hbm [resolvable:$true] %s5878_s5 }
 0x1d3   :  { %s5880_s15 = scalar_lea.hbm %s5879_s5, 1  ;;  %s5882_s16 = scalar_lea.hbm %s7460_s17, 1 }
 0x1d4   :  { %p5881_p5 = scmp.ne.s32.totalorder %s5879_s5, %s5880_s15  ;;  %p5883_p6 = scmp.lt.s32.totalorder %s5879_s5, %s7460_s17 }
 0x1d5   :  { %p5884_p7 = scmp.lt.s32.totalorder %s5882_s16, %s5880_s15 }
 0x1d7   :  { %s480_s24 = sshll.u32 %s7461_s12, 4  ;;  %p5885_p8 = por %p5884_p7, %p5883_p6  ;;  %s481_s24 = int_to_ptr.hbm [resolvable:$true] %s480_s24 }
 0x1d9   :  { %p5886_p9 = pnand %p5885_p8, %p5881_p5 }
 0x1db   :  { %5889 = shalt.err (!%p5886_p9)
}
 0x1dc   :  { %455 = dma.hbm_to_vmem [thread:$0]  %s451_s1, 16, %s453_s11, [#allocation41]  }
 0x1dd   :  { %s7462_s22 = sld [smem:[#allocation101_spill]]  ;;  %s6094_s3 = smov [#allocation45]  }
 0x1de   :  { %s482_s29 = sshll.u32 %s6094_s3, 4  ;;  %s5902_s19 = sshra.s32 %s481_s24, 4  ;;  %s483_s29 = int_to_ptr.vmem [resolvable:$true] %s482_s29  ;;  %s5903_s19 = int_to_ptr.hbm [resolvable:$true] %s5902_s19 }
 0x1df   :  { %s5904_s18 = scalar_lea.hbm %s5903_s19, 1  ;;  %s5906_s23 = scalar_lea.hbm %s7461_s12, 1 }
 0x1e0   :  { %p5905_p10 = scmp.ne.s32.totalorder %s5903_s19, %s5904_s18  ;;  %p5907_p11 = scmp.lt.s32.totalorder %s5903_s19, %s7461_s12 }
 0x1e1   :  { %p5908_p12 = scmp.lt.s32.totalorder %s5906_s23, %s5904_s18 }
 0x1e3   :  { %s502_s27 = sshll.u32 %s7462_s22, 4  ;;  %p5909_p13 = por %p5908_p12, %p5907_p11  ;;  %s503_s27 = int_to_ptr.hbm [resolvable:$true] %s502_s27 }
 0x1e5   :  { %p5910_p0 = pnand %p5909_p13, %p5905_p10 }
 0x1e7   :  { %5913 = shalt.err (!%p5910_p0)
}
 0x1e8   :  { %485 = dma.hbm_to_vmem [thread:$0]  %s481_s24, 16, %s483_s29, [#allocation44]  }
 0x1e9   :  { %s7463_s26 = sld [smem:[#allocation103_spill]]  ;;  %s6095_s28 = smov [#allocation48]  }
 0x1ea   :  { %s504_s14 = sshll.u32 %s6095_s28, 4  ;;  %s5926_s0 = sshra.s32 %s503_s27, 4  ;;  %s505_s14 = int_to_ptr.vmem [resolvable:$true] %s504_s14  ;;  %s5927_s0 = int_to_ptr.hbm [resolvable:$true] %s5926_s0 }
 0x1eb   :  { %s5928_s30 = scalar_lea.hbm %s5927_s0, 1  ;;  %s5930_s17 = scalar_lea.hbm %s7462_s22, 1 }
 0x1ec   :  { %p5929_p1 = scmp.ne.s32.totalorder %s5927_s0, %s5928_s30  ;;  %p5931_p2 = scmp.lt.s32.totalorder %s5927_s0, %s7462_s22 }
 0x1ed   :  { %p5932_p3 = scmp.lt.s32.totalorder %s5930_s17, %s5928_s30 }
 0x1ef   :  { %s524_s9 = sshll.u32 %s7463_s26, 4  ;;  %p5933_p4 = por %p5932_p3, %p5931_p2  ;;  %s525_s9 = int_to_ptr.hbm [resolvable:$true] %s524_s9 }
 0x1f1   :  { %p5934_p5 = pnand %p5933_p4, %p5929_p1 }
 0x1f3   :  { %5937 = shalt.err (!%p5934_p5)
}
 0x1f4   :  { %507 = dma.hbm_to_vmem [thread:$0]  %s503_s27, 16, %s505_s14, [#allocation47]  }
 0x1f5   :  { %s6096_s1 = smov [#allocation51]   ;;  %s5950_s6 = sshra.s32 %s525_s9, 4  ;;  %s5951_s6 = int_to_ptr.hbm [resolvable:$true] %s5950_s6 }
 0x1f6   :  { %s526_s7 = sshll.u32 %s6096_s1, 4  ;;  %s5952_s8 = scalar_lea.hbm %s5951_s6, 1  ;;  %s527_s7 = int_to_ptr.vmem [resolvable:$true] %s526_s7 }
 0x1f7   :  { %p5953_p6 = scmp.ne.s32.totalorder %s5951_s6, %s5952_s8  ;;  %s5954_s10 = scalar_lea.hbm %s7463_s26, 1 }
 0x1f8   :  { %p5955_p7 = scmp.lt.s32.totalorder %s5951_s6, %s7463_s26  ;;  %p5956_p8 = scmp.lt.s32.totalorder %s5954_s10, %s5952_s8 }
 0x1fa   :  { %p5957_p9 = por %p5956_p8, %p5955_p7 }
 0x1fc   :  { %p5958_p10 = pnand %p5957_p9, %p5953_p6 }
 0x1fe   :  { %5961 = shalt.err (!%p5958_p10)
}
 0x1ff   :  { %529 = dma.hbm_to_vmem [thread:$0]  %s525_s9, 16, %s527_s7, [#allocation50]  }
 0x200   :  { %5974 = dma.done.wait [#allocation3], 16  }
 0x201   :  { %5975 = vsyncadd [#allocation3], 4294967280 }
 0x202   :  { %5976 = dma.done.wait [#allocation5], 32  }
 0x203   :  { %5977 = vsyncadd [#allocation5], 4294967264 }
 0x204   :  { %5978 = dma.done.wait [#allocation8], 32  }
 0x205   :  { %5979 = vsyncadd [#allocation8], 4294967264 }
 0x206   :  { %5980 = dma.done.wait [#allocation11], 32  }
 0x207   :  { %5981 = vsyncadd [#allocation11], 4294967264 }
 0x208   :  { %5982 = dma.done.wait [#allocation14], 32  }
 0x209   :  { %5983 = vsyncadd [#allocation14], 4294967264 }
 0x20a   :  { %5984 = dma.done.wait [#allocation17], 32  }
 0x20b   :  { %5985 = vsyncadd [#allocation17], 4294967264 }
 0x20c   :  { %5986 = dma.done.wait [#allocation20], 32  }
 0x20d   :  { %5987 = vsyncadd [#allocation20], 4294967264 }
 0x20e   :  { %5988 = dma.done.wait [#allocation23], 32  }
 0x20f   :  { %5989 = vsyncadd [#allocation23], 4294967264 }
 0x210   :  { %5990 = dma.done.wait [#allocation26], 32  }
 0x211   :  { %5991 = vsyncadd [#allocation26], 4294967264 }
 0x212   :  { %5992 = dma.done.wait [#allocation29], 32  }
 0x213   :  { %5993 = vsyncadd [#allocation29], 4294967264 }
 0x214   :  { %5994 = dma.done.wait [#allocation32], 32  }
 0x215   :  { %5995 = vsyncadd [#allocation32], 4294967264 }
 0x216   :  { %5996 = dma.done.wait [#allocation35], 32  }
 0x217   :  { %5997 = vsyncadd [#allocation35], 4294967264 }
 0x218   :  { %5998 = dma.done.wait [#allocation38], 32  }
 0x219   :  { %5999 = vsyncadd [#allocation38], 4294967264 }
 0x21a   :  { %6000 = dma.done.wait [#allocation41], 32  }
 0x21b   :  { %6001 = vsyncadd [#allocation41], 4294967264 }
 0x21c   :  { %6002 = dma.done.wait [#allocation44], 32  }
 0x21d   :  { %6003 = vsyncadd [#allocation44], 4294967264 }
 0x21e   :  { %6004 = dma.done.wait [#allocation47], 32  }
 0x21f   :  { %6005 = vsyncadd [#allocation47], 4294967264 }
 0x220   :  { %6006 = dma.done.wait [#allocation50], 32  }
 0x221   :  { %6007 = vsyncadd [#allocation50], 4294967264  ;;  %s7464_s25 = sld [smem:[#allocation69_spill]]  ;;  %v794_v0 = vld [vmem:[%s6390_s20 + $0x18] sm:$0xff]  ;;  %v793_v1 = vld [vmem:[%s6390_s20 + $0x10] sm:$0xff]  ;;  %vm804_vm0 = vcmask 261120  }
 0x222   :  { %823 = vmatpush.msra.mxu0 %v794_v0  ;;  %v792_v2 = vld [vmem:[%s6390_s20 + $0x8] sm:$0xff]  ;;  %v791_v3 = vld [vmem:[%s6390_s20] sm:$0xff]  ;;  %v4953_v5 = vld [vmem:[#allocation48] ss:$0 sm:$0xff]  ;;  %s6097_s12 = smov 88   ;;  %s6098_s2 = smov 96  }
 0x223   :  { %s6099_s20 = smov 120   ;;  %s6100_s11 = smov 80   ;;  %vm837_vm1 = vcmask 64512   ;;  %vm1107_vm2 = vcmask 130048   ;;  %vm1109_vm3 = vcmask 195584   ;;  %vm1517_vm11 = vcmask 523264  }
 0x224   :  { %824 = vmatpush.msra.mxu0 %v793_v1  ;;  %s6101_s24 = smov 112   ;;  %s6102_s5 = smov 64  }
 0x225   :  { %s6103_s15 = smov 48   ;;  %s6104_s16 = smov 56  }
 0x226   :  { %825 = vmatpush.msra.mxu0 %v792_v2  ;;  %s6105_s22 = smov 104   ;;  %s6106_s27 = smov 72  }
 0x227   :  { %v6506_v4 = vld [vmem:[%s7464_s25] sm:$0xff]  ;;  %v6532_v20 = vld [vmem:[%s7464_s25 + $0x8] sm:$0xff]  ;;  %s6107_s3 = smov 40   ;;  %s6108_s29 = smov 16  }
 0x228   :  { %826 = vmatpush.msra.mxu0 %v791_v3  ;;  %s6109_s19 = smov 8   ;;  %s7465_s18 = sld [smem:[#allocation82_spill]] }
 0x229   :  { %4686 = vmatmul.msk.f32.vlgmr.msra.gmra.mxu0 %vm804_vm0, %v6506_v4  ;;  %s7466_s23 = sld [smem:[#allocation70_spill]]  ;;  %s6110_s26 = smov 24  }
 0x22a   :  { %s7468_s28 = sld [smem:[#allocation107_spill]] }
 0x22b   :  { %s7469_s14 = sld [smem:[#allocation81_spill]] }
 0x22c   :  { %s7470_s9 = sld [smem:[#allocation74_spill]] }
 0x22d   :  { %s7471_s0 = sld [smem:[#allocation105_spill]] }
 0x22e   :  { %s7472_s30 = sld [smem:[#allocation104_spill]] }
 0x22f   :  { %s7473_s17 = sld [smem:[#allocation76_spill]] }
 0x230   :  { %s7474_s1 = sld [smem:[#allocation75_spill]] }
 0x231   :  { %4687 = vmatmul.msk.f32.gmra.mxu0 %vm804_vm0, %v6532_v20  ;;  %s7475_s7 = sld [smem:[#allocation83_spill]] }
 0x232   :  { %s7476_s6 = sld [smem:[#allocation84_spill]] }
 0x233   :  { %s7477_s8 = sld [smem:[#allocation96_spill]] }
 0x234   :  { %s7478_s10 = sld [smem:[#allocation88_spill]] }
 0x235   :  { %s7479_s25 = sld [smem:[#allocation95_spill]] }
 0x2a6   :  { %v828_v6 = vpop.f32.mrf.mxu0 }
 0x2a7   :  { %v6510_v7 = vadd.f32 %v4953_v5, %v828_v6 }
 0x2a9   :  { %901 = vrot.lane.b32.xlu2 %v6510_v7, %s6097_s12  ;;  %835 = vrot.lane.b32.xlu0 %v6510_v7, %s6098_s2 }
 0x2ae   :  { %v831_v30 = vpop.f32.mrf.mxu0 }
 0x2af   :  { %v6542_v31 = vadd.f32 %v4953_v5, %v831_v30 }
 0x2b1   :  { %899 = vrot.lane.b32.xlu2 %v6510_v7, %s6099_s20 }
 0x2b9   :  { %966 = vrot.lane.b32.xlu2 %v6510_v7, %s6100_s11 }
 0x2c1   :  { %964 = vrot.lane.b32.xlu2 %v6510_v7, %s6101_s24 }
 0x303   :  { %v902_v8 = vpop.permute.xlu2 %901 }
 0x30b   :  { %v900_v9 = vpop.permute.xlu2 %899 }
 0x313   :  { %v967_v11 = vpop.permute.xlu2 %966 }
 0x31b   :  { %v836_v10 = vpop.permute.xlu0 %835  ;;  %v965_v12 = vpop.permute.xlu2 %964 }
 0x31c   :  { %4688 = vmatpush.xpose.msk.msra.mxu1 %vm837_vm1, %v836_v10 }
 0x31f   :  { %4689 = vmatmul.msk.f32.vlgmr.msra.gmra.mxu1 %vm837_vm1, %v6510_v7 }
 0x320   :  { %4694 = vmatpush.xpose.msk.msrb.mxu1 %vm837_vm1, %v967_v11 }
 0x327   :  { %4695 = vmatmul.msk.f32.vlgmr.msrb.gmra.mxu1 %vm837_vm1, %v965_v12 }
 0x39c   :  { %v859_v13 = vpop.f32.mrf.mxu1 }
 0x39d   :  { %v862_v14 = vsel %vm837_vm1, %v859_v13, -inf }
 0x39e   :  { %863 = vmax.xlane.f32.xlu0 %v862_v14 }
 0x3a4   :  { %v989_v21 = vpop.f32.mrf.mxu1 }
 0x3a5   :  { %v992_v22 = vsel %vm837_vm1, %v989_v21, -inf }
 0x411   :  { %v864_v15 = vpop.xlane.xlu0 %863 }
 0x412   :  { %v865_v16 = vsub.f32 %v859_v13, %v864_v15 }
 0x414   :  { %v866_v17 = vmul.f32 1.442695, %v865_v16 }
 0x416   :  { %4988 = vpow2.f32 %v866_v17 }
 0x41c   :  { %v4989_v18 = vpop.eup %4988 }
 0x41d   :  { %v868_v19 = vsel %vm837_vm1, %v4989_v18, 0.0 }
 0x41e   :  { %869 = vadd.xlane.f32.xlu1 %v868_v19 }
 0x437   :  { %873 = vrot.lane.b32.xlu1 %v6510_v7, %s6102_s5 }
 0x461   :  { %993 = vmax.xlane.f32.xlu1 %v992_v22 }
 0x47a   :  { %1003 = vrot.lane.b32.xlu1 %v6510_v7, %s6103_s15 }
 0x482   :  { %1175 = vrot.lane.b32.xlu1 %v6542_v31, %s6099_s20 }
 0x48a   :  { %1240 = vrot.lane.b32.xlu1 %v6542_v31, %s6101_s24 }
 0x491   :  { %v870_v23 = vpop.xlane.xlu1 %869 }
 0x492   :  { %4990 = vrcp.f32 %v870_v23 }
 0x498   :  { %v4991_v24 = vpop.eup %4990 }
 0x499   :  { %v872_v26 = vmul.f32 %v4991_v24, %v4989_v18 }
 0x4a9   :  { %v874_v25 = vpop.permute.xlu1 %873 }
 0x4aa   :  { %894 = vmatpush.msra.mxu2 %v874_v25 }
 0x4ab   :  { %4690 = vmatmul.msk.f32.vlgmr.msra.gmra.mxu2 %vm837_vm1, %v872_v26 }
 0x4ac   :  { %4691 = vmatpush.xpose.msk.msrb.mxu2 %vm837_vm1, %v902_v8 }
 0x4b3   :  { %4692 = vmatmul.msk.f32.vlgmr.msrb.gmra.mxu2 %vm837_vm1, %v900_v9 }
 0x4d4   :  { %v994_v27 = vpop.xlane.xlu1 %993 }
 0x4d5   :  { %v995_v28 = vsub.f32 %v989_v21, %v994_v27 }
 0x4d7   :  { %v996_v29 = vmul.f32 1.442695, %v995_v28 }
 0x4d9   :  { %4992 = vpow2.f32 %v996_v29 }
 0x4df   :  { %v4993_v32 = vpop.eup %4992 }
 0x4e0   :  { %v998_v33 = vsel %vm837_vm1, %v4993_v32, 0.0 }
 0x4e1   :  { %999 = vadd.xlane.f32.xlu0 %v998_v33 }
 0x4ec   :  { %v1004_v34 = vpop.permute.xlu1 %1003 }
 0x4ed   :  { %1024 = vmatpush.msra.mxu3 %v1004_v34 }
 0x4f4   :  { %v1176_v50 = vpop.permute.xlu1 %1175 }
 0x4f5   :  { %938 = vrot.lane.b32.xlu0 %v6510_v7, %s6104_s16 }
 0x4fc   :  { %v1241_v52 = vpop.permute.xlu1 %1240 }
 0x4fd   :  { %1029 = vrot.lane.b32.xlu0 %v6510_v7, %s6105_s22 }
 0x505   :  { %1112 = vrot.lane.b32.xlu0 %v6542_v31, %s6098_s2 }
 0x50d   :  { %1242 = vrot.lane.b32.xlu0 %v6542_v31, %s6100_s11 }
 0x52e   :  { %v6557_v35 = vpop.f32.mrf.mxu2 }
 0x536   :  { %v924_v36 = vpop.f32.mrf.mxu2 }
 0x537   :  { %v927_v37 = vsel %vm837_vm1, %v924_v36, -inf }
 0x538   :  { %928 = vmax.xlane.f32.xlu2 %v927_v37 }
 0x550   :  { %1031 = vrot.lane.b32.xlu2 %v6510_v7, %s6106_s27 }
 0x554   :  { %v1000_v38 = vpop.xlane.xlu0 %999 }
 0x555   :  { %4994 = vrcp.f32 %v1000_v38 }
 0x558   :  { %1177 = vrot.lane.b32.xlu2 %v6542_v31, %s6097_s12 }
 0x55b   :  { %v4995_v39 = vpop.eup %4994 }
 0x55c   :  { %v1002_v40 = vmul.f32 %v4995_v39, %v4993_v32 }
 0x55e   :  { %4696 = vmatmul.msk.f32.vlgmr.msra.gmra.mxu3 %vm837_vm1, %v1002_v40 }
 0x560   :  { %1307 = vrot.lane.b32.xlu2 %v6542_v31, %s6106_s27 }
 0x567   :  { %v939_v41 = vpop.permute.xlu0 %938 }
 0x568   :  { %959 = vmatpush.msra.mxu2 %v939_v41 }
 0x56f   :  { %v1030_v42 = vpop.permute.xlu0 %1029 }
 0x577   :  { %v1113_v43 = vpop.permute.xlu0 %1112 }
 0x578   :  { %4700 = vmatpush.xpose.msk.msrb.mxu3 %vm837_vm1, %v1113_v43 }
 0x57b   :  { %4701 = vmatmul.msk.f32.vlgmr.msrb.gmra.mxu3 %vm837_vm1, %v6542_v31 }
 0x57f   :  { %v1243_v51 = vpop.permute.xlu0 %1242 }
 0x580   :  { %4706 = vmatpush.xpose.msk.msra.mxu3 %vm837_vm1, %v1243_v51 }
 0x583   :  { %4707 = vmatmul.msk.f32.vlgmr.msra.gmra.mxu3 %vm837_vm1, %v1241_v52  ;;  %v707_v52 = vld [vmem:[%s7465_s18 + $0x8] sm:$0xff] }
 0x5ab   :  { %v929_v44 = vpop.xlane.xlu2 %928 }
 0x5ac   :  { %v930_v45 = vsub.f32 %v924_v36, %v929_v44 }
 0x5ae   :  { %v931_v46 = vmul.f32 1.442695, %v930_v45 }
 0x5b0   :  { %4996 = vpow2.f32 %v931_v46 }
 0x5b3   :  { %v1032_v47 = vpop.permute.xlu2 %1031 }
 0x5b4   :  { %4697 = vmatpush.xpose.msk.msrb.mxu2 %vm837_vm1, %v1032_v47  ;;  %v709_v47 = vld [vmem:[%s7465_s18 + $0x18] sm:$0xff] }
 0x5b6   :  { %v4997_v48 = vpop.eup %4996 }
 0x5b7   :  { %v933_v49 = vsel %vm837_vm1, %v4997_v48, 0.0 }
 0x5b8   :  { %934 = vadd.xlane.f32.xlu0 %v933_v49  ;;  %v708_v49 = vld [vmem:[%s7465_s18 + $0x10] sm:$0xff] }
 0x5bb   :  { %v1178_v58 = vpop.permute.xlu2 %1177 }
 0x5c3   :  { %v1308_v60 = vpop.permute.xlu2 %1307 }
 0x5cc   :  { %1305 = vrot.lane.b32.xlu0 %v6542_v31, %s6105_s22 }
 0x5e1   :  { %v6576_v53 = vpop.f32.mrf.mxu3 }
 0x5fe   :  { %v1135_v54 = vpop.f32.mrf.mxu3 }
 0x5ff   :  { %v1138_v55 = vsel %vm837_vm1, %v1135_v54, -inf }
 0x600   :  { %1139 = vmax.xlane.f32.xlu1 %v1138_v55 }
 0x606   :  { %v1265_v5 = vpop.f32.mrf.mxu3 }
 0x607   :  { %v1268_v9 = vsel %vm837_vm1, %v1265_v5, -inf }
 0x62b   :  { %v935_v56 = vpop.xlane.xlu0 %934 }
 0x62c   :  { %4998 = vrcp.f32 %v935_v56  ;;  %v706_v56 = vld [vmem:[%s7465_s18] sm:$0xff] }
 0x632   :  { %v4999_v57 = vpop.eup %4998 }
 0x633   :  { %v937_v59 = vmul.f32 %v4999_v57, %v4997_v48 }
 0x635   :  { %4693 = vmatmul.msk.f32.vlgmr.msra.gmra.mxu2 %vm837_vm1, %v937_v59  ;;  %v6620_v59 = vld [vmem:[%s7466_s23] sm:$0xff] }
 0x636   :  { %4703 = vmatpush.xpose.msk.msra.mxu2 %vm837_vm1, %v1178_v58 }
 0x63d   :  { %4698 = vmatmul.msk.f32.vlgmr.msrb.gmra.mxu2 %vm837_vm1, %v1030_v42 }
 0x63e   :  { %4709 = vmatpush.xpose.msk.msrb.mxu2 %vm837_vm1, %v1308_v60  ;;  %v1306_v61 = vpop.permute.xlu0 %1305 }
 0x645   :  { %4704 = vmatmul.msk.f32.vlgmr.msra.gmra.mxu2 %vm837_vm1, %v1176_v50 }
 0x64d   :  { %4710 = vmatmul.msk.f32.vlgmr.msrb.gmra.mxu2 %vm837_vm1, %v1306_v61 }
 0x673   :  { %v1140_v63 = vpop.xlane.xlu1 %1139 }
 0x674   :  { %v1141_v0 = vsub.f32 %v1135_v54, %v1140_v63 }
 0x676   :  { %v1142_v3 = vmul.f32 1.442695, %v1141_v0  ;;  %v6628_v0 = vld [vmem:[#allocation22] ss:$0 sm:$0xff] }
 0x678   :  { %5000 = vpow2.f32 %v1142_v3 }
 0x67e   :  { %v6588_v10 = vpop.eup %5000 }
 0x67f   :  { %v1144_v13 = vsel %vm837_vm1, %v6588_v10, 0.0 }
 0x6b8   :  { %v961_v62 = vpop.f32.mrf.mxu2 }
 0x6c0   :  { %v1054_v1 = vpop.f32.mrf.mxu2 }
 0x6c1   :  { %v1057_v2 = vsel %vm837_vm1, %v1054_v1, -inf }
 0x6c2   :  { %1058 = vmax.xlane.f32.xlu2 %v1057_v2 }
 0x6c8   :  { %v1200_v6 = vpop.f32.mrf.mxu2 }
 0x6c9   :  { %v1203_v8 = vsel %vm837_vm1, %v1200_v6, -inf }
 0x6ca   :  { %1204 = vmax.xlane.f32.xlu0 %v1203_v8  ;;  %1269 = vmax.xlane.f32.xlu2 %v1268_v9  ;;  %v788_v8 = vld [vmem:[%s6385_s21 + $0x8] sm:$0xff]  ;;  %v787_v9 = vld [vmem:[%s6385_s21] sm:$0xff] }
 0x6d0   :  { %v1330_v11 = vpop.f32.mrf.mxu2 }
 0x6d1   :  { %v1333_v12 = vsel %vm837_vm1, %v1330_v11, -inf }
 0x6d2   :  { %1334 = vmax.xlane.f32.xlu1 %v1333_v12  ;;  %1145 = vadd.xlane.f32.xlu2 %v1144_v13 }
 0x6de   :  { %1068 = vrot.lane.b32.xlu0 %v6510_v7, %s6107_s3 }
 0x735   :  { %v1059_v14 = vpop.xlane.xlu2 %1058 }
 0x736   :  { %v1060_v15 = vsub.f32 %v1054_v1, %v1059_v14 }
 0x738   :  { %v1061_v16 = vmul.f32 1.442695, %v1060_v15 }
 0x73a   :  { %5002 = vpow2.f32 %v1061_v16 }
 0x73d   :  { %v1205_v17 = vpop.xlane.xlu0 %1204  ;;  %v1270_v18 = vpop.xlane.xlu2 %1269 }
 0x73e   :  { %v1206_v19 = vsub.f32 %v1200_v6, %v1205_v17  ;;  %v1271_v21 = vsub.f32 %v1265_v5, %v1270_v18  ;;  %v790_v5 = vld [vmem:[%s6385_s21 + $0x18] sm:$0xff]  ;;  %v789_v6 = vld [vmem:[%s6385_s21 + $0x10] sm:$0xff]  ;;  %s7467_s21 = sld [smem:[#allocation106_spill]] }
 0x73f   :  { %1406 = vmatpush.msrb.mxu3 %v790_v5 }
 0x740   :  { %v5003_v22 = vpop.eup %5002  ;;  %v1207_v23 = vmul.f32 1.442695, %v1206_v19  ;;  %v1272_v24 = vmul.f32 1.442695, %v1271_v21 }
 0x741   :  { %v1063_v25 = vsel %vm837_vm1, %v5003_v22, 0.0  ;;  %1407 = vmatpush.msrb.mxu3 %v789_v6 }
 0x742   :  { %5004 = vpow2.f32 %v1207_v23  ;;  %1064 = vadd.xlane.f32.xlu0 %v1063_v25  ;;  %v4955_v23 = vld [vmem:[#allocation46] ss:$0 sm:$0xff] }
 0x743   :  { %5006 = vpow2.f32 %v1272_v24  ;;  %1408 = vmatpush.msrb.mxu3 %v788_v8 }
 0x745   :  { %v1335_v26 = vpop.xlane.xlu1 %1334  ;;  %v1146_v38 = vpop.xlane.xlu2 %1145  ;;  %1409 = vmatpush.msrb.mxu3 %v787_v9 }
 0x746   :  { %v1336_v27 = vsub.f32 %v1330_v11, %v1335_v26 }
 0x748   :  { %v5005_v28 = vpop.eup %5004  ;;  %v1337_v7 = vmul.f32 1.442695, %v1336_v27 }
 0x749   :  { %v5007_v29 = vpop.eup %5006  ;;  %v1209_v30 = vsel %vm837_vm1, %v5005_v28, 0.0 }
 0x74a   :  { %5008 = vpow2.f32 %v1337_v7  ;;  %1210 = vadd.xlane.f32.xlu1 %v1209_v30  ;;  %v1274_v32 = vsel %vm837_vm1, %v5007_v29, 0.0 }
 0x74b   :  { %1275 = vadd.xlane.f32.xlu2 %v1274_v32 }
 0x750   :  { %v5009_v33 = vpop.eup %5008  ;;  %v1069_v34 = vpop.permute.xlu0 %1068 }
 0x751   :  { %1089 = vmatpush.msra.mxu1 %v1069_v34  ;;  %v1339_v36 = vsel %vm837_vm1, %v5009_v33, 0.0  ;;  %v6111_v34 = vmov 32.0  }
 0x753   :  { %1340 = vadd.xlane.f32.xlu2 %v1339_v36 }
 0x756   :  { %1279 = vrot.lane.b32.xlu0 %v6542_v31, %s6103_s15 }
 0x75e   :  { %1344 = vrot.lane.b32.xlu0 %v6542_v31, %s6107_s3 }
 0x763   :  { %1149 = vrot.lane.b32.xlu1 %v6542_v31, %s6102_s5 }
 0x766   :  { %1099 = vrot.lane.b32.xlu0 %v6576_v53, %s6108_s29 }
 0x76b   :  { %1214 = vrot.lane.b32.xlu2 %v6542_v31, %s6104_s16  ;;  %1095 = vrot.lane.b32.xlu1 %v961_v62, %s6109_s19 }
 0x7b5   :  { %v1065_v37 = vpop.xlane.xlu0 %1064 }
 0x7b6   :  { %5010 = vrcp.f32 %v1065_v37 }
 0x7bc   :  { %v5011_v39 = vpop.eup %5010 }
 0x7bd   :  { %v1067_v40 = vmul.f32 %v5011_v39, %v5003_v22  ;;  %v1211_v42 = vpop.xlane.xlu1 %1210 }
 0x7be   :  { %v1276_v41 = vpop.xlane.xlu2 %1275  ;;  %5012 = vrcp.f32 %v1211_v42 }
 0x7bf   :  { %4699 = vmatmul.msk.f32.vlgmr.msra.gmra.mxu1 %vm837_vm1, %v1067_v40  ;;  %5014 = vrcp.f32 %v1146_v38 }
 0x7c4   :  { %v5013_v45 = vpop.eup %5012 }
 0x7c5   :  { %v1213_v31 = vmul.f32 %v5013_v45, %v5005_v28  ;;  %v5015_v50 = vpop.eup %5014 }
 0x7c6   :  { %v1341_v43 = vpop.xlane.xlu2 %1340  ;;  %v1148_v54 = vmul.f32 %v5015_v50, %v6588_v10 }
 0x7c7   :  { %5016 = vrcp.f32 %v1341_v43 }
 0x7c8   :  { %v1280_v44 = vpop.permute.xlu0 %1279  ;;  %5018 = vrcp.f32 %v1276_v41 }
 0x7c9   :  { %5020 = vrcp.f32 %v6111_v34 }
 0x7cd   :  { %v5017_v51 = vpop.eup %5016 }
 0x7ce   :  { %v1215_v46 = vpop.permute.xlu2 %1214  ;;  %v1343_v55 = vmul.f32 %v5017_v51, %v5009_v33  ;;  %v5019_v57 = vpop.eup %5018 }
 0x7cf   :  { %1235 = vmatpush.msrb.mxu1 %v1215_v46  ;;  %v1278_v58 = vmul.f32 %v5019_v57, %v5007_v29  ;;  %v776_v57 = vld [vmem:[%s7467_s21 + $0x8] sm:$0xff] }
 0x7d0   :  { %4705 = vmatmul.msk.f32.vlgmr.msrb.gmra.mxu1 %vm837_vm1, %v1213_v31  ;;  %v1345_v48 = vpop.permute.xlu0 %1344 }
 0x7d1   :  { %1365 = vmatpush.msra.mxu1 %v1345_v48 }
 0x7d3   :  { %1626 = vmatpush.msrb.mxu1 %v709_v47 }
 0x7d5   :  { %1627 = vmatpush.msrb.mxu1 %v708_v49  ;;  %v1150_v53 = vpop.permute.xlu1 %1149 }
 0x7d6   :  { %1170 = vmatpush.msrb.mxu0 %v1150_v53 }
 0x7d7   :  { %1628 = vmatpush.msrb.mxu1 %v707_v52  ;;  %4702 = vmatmul.msk.f32.vlgmr.msrb.gmra.mxu0 %vm837_vm1, %v1148_v54  ;;  %v6688_v54 = vld [vmem:[%s7466_s23 + $0x8] sm:$0xff] }
 0x7d8   :  { %1300 = vmatpush.msra.mxu0 %v1280_v44  ;;  %4711 = vmatmul.msk.f32.vlgmr.msra.gmra.mxu1 %vm837_vm1, %v1343_v55  ;;  %v1100_v12 = vpop.permute.xlu0 %1099  ;;  %v778_v55 = vld [vmem:[%s7467_s21 + $0x18] sm:$0xff] }
 0x7d9   :  { %1629 = vmatpush.msrb.mxu1 %v706_v56  ;;  %v777_v56 = vld [vmem:[%s7467_s21 + $0x10] sm:$0xff] }
 0x7da   :  { %1501 = vmatpush.msrb.mxu0 %v778_v55 }
 0x7dc   :  { %1502 = vmatpush.msrb.mxu0 %v777_v56 }
 0x7dd   :  { %v1096_v10 = vpop.permute.xlu1 %1095 }
 0x7de   :  { %v1106_v11 = vsel %vm837_vm1, %v6557_v35, %v1096_v10  ;;  %1503 = vmatpush.msrb.mxu0 %v776_v57  ;;  %v4956_v10 = vld [vmem:[#allocation51] ss:$0 sm:$0xff] }
 0x7df   :  { %4708 = vmatmul.msk.f32.vlgmr.msra.gmra.mxu0 %vm837_vm1, %v1278_v58  ;;  %v1108_v13 = vsel %vm1107_vm2, %v1106_v11, %v1100_v12  ;;  %v775_v58 = vld [vmem:[%s7467_s21] sm:$0xff] }
 0x7e0   :  { %4718 = vmatmul.msk.f32.vlgmr.msrb.gmra.mxu1 %vm804_vm0, %v6620_v59  ;;  %1504 = vmatpush.msrb.mxu0 %v775_v58 }
 0x7e8   :  { %4719 = vmatmul.msk.f32.gmra.mxu1 %vm804_vm0, %v6688_v54 }
 0x83c   :  { %v1091_v60 = vpop.f32.mrf.mxu1 }
 0x83d   :  { %1103 = vrot.lane.b32.xlu1 %v1091_v60, %s6110_s26 }
 0x84d   :  { %v1237_v61 = vpop.f32.mrf.mxu1 }
 0x84e   :  { %1371 = vrot.lane.b32.xlu2 %v1237_v61, %s6109_s19 }
 0x854   :  { %v1172_v62 = vpop.f32.mrf.mxu0 }
 0x855   :  { %v1367_v63 = vpop.f32.mrf.mxu1 }
 0x856   :  { %1379 = vrot.lane.b32.xlu1 %v1367_v63, %s6110_s26 }
 0x85c   :  { %v1302_v1 = vpop.f32.mrf.mxu0 }
 0x85d   :  { %1375 = vrot.lane.b32.xlu0 %v1302_v1, %s6108_s29  ;;  %v1631_v2 = vpop.f32.mrf.mxu1 }
 0x85e   :  { %v6632_v3 = vadd.f32 %v6628_v0, %v1631_v2 }
 0x860   :  { %1638 = vrot.lane.b32.xlu2 %v6632_v3, %s6098_s2 }
 0x8a8   :  { %v1372_v16 = vpop.permute.xlu2 %1371 }
 0x8a9   :  { %v1382_v18 = vsel %vm837_vm1, %v1172_v62, %v1372_v16  ;;  %v786_v16 = vld [vmem:[%s7468_s28 + $0x38] sm:$0xff] }
 0x8aa   :  { %1532 = vmatpush.msra.mxu2 %v786_v16 }
 0x8af   :  { %v1104_v14 = vpop.permute.xlu1 %1103 }
 0x8b0   :  { %v1110_v15 = vsel %vm1109_vm3, %v1108_v13, %v1104_v14  ;;  %v4957_v14 = vld [vmem:[#allocation49] ss:$0 sm:$0xff] }
 0x8b1   :  { %4712 = vmatmul.msk.f32.vlgmr.msrb.gmra.mxu3 %vm804_vm0, %v1110_v15 }
 0x8ba   :  { %v1639_v17 = vpop.permute.xlu2 %1638 }
 0x8bb   :  { %4720 = vmatpush.xpose.msk.msra.mxu3 %vm837_vm1, %v1639_v17 }
 0x8c8   :  { %v1380_v21 = vpop.permute.xlu1 %1379 }
 0x8cf   :  { %v1376_v19 = vpop.permute.xlu0 %1375 }
 0x8d0   :  { %v1383_v35 = vsel %vm1107_vm2, %v1382_v18, %v1376_v19  ;;  %v785_v19 = vld [vmem:[%s7468_s28 + $0x30] sm:$0xff] }
 0x8d1   :  { %v1384_v22 = vsel %vm1109_vm3, %v1383_v35, %v1380_v21  ;;  %1533 = vmatpush.msra.mxu2 %v785_v19  ;;  %v784_v21 = vld [vmem:[%s7468_s28 + $0x28] sm:$0xff]  ;;  %v783_v35 = vld [vmem:[%s7468_s28 + $0x20] sm:$0xff] }
 0x8d2   :  { %4713 = vmatmul.msk.f32.gmra.mxu3 %vm804_vm0, %v1384_v22 }
 0x8d3   :  { %1534 = vmatpush.msra.mxu2 %v784_v21 }
 0x8d5   :  { %1535 = vmatpush.msra.mxu2 %v783_v35 }
 0x8da   :  { %4721 = vmatmul.msk.f32.vlgmr.msra.gmra.mxu3 %vm837_vm1, %v6632_v3 }
 0x934   :  { %v1411_v24 = vpop.f32.mrf.mxu3 }
 0x935   :  { %v1412_v25 = vadd.f32 %v4955_v23, %v1411_v24 }
 0x937   :  { %v1417_v26 = vadd.f32 %v1412_v25, %v6506_v4  ;;  %v5021_v4 = vpop.eup %5020  ;;  %v781_v25 = vld [vmem:[%s7468_s28 + $0x10] sm:$0xff] }
 0x938   :  { %v1426_v36 = vmul.f32 32.0, %v5021_v4  ;;  %vm1430_vm4 = vweird.f32 %v5021_v4 }
 0x939   :  { %v1419_v27 = vsel %vm804_vm0, %v1417_v26, 0.0 }
 0x93a   :  { %1420 = vadd.xlane.f32.xlu0 %v1419_v27  ;;  %v1427_v37 = vsub.f32 1.0, %v1426_v36 }
 0x93c   :  { %v1428_v38 = vmul.f32 %v5021_v4, %v1427_v37 }
 0x93e   :  { %v1429_v39 = vadd.f32 %v5021_v4, %v1428_v38 }
 0x940   :  { %v6659_v40 = vsel %vm1430_vm4, %v5021_v4, %v1429_v39 }
 0x955   :  { %v1414_v28 = vpop.f32.mrf.mxu3 }
 0x956   :  { %v1415_v7 = vadd.f32 %v4955_v23, %v1414_v28  ;;  %v782_v23 = vld [vmem:[%s7468_s28 + $0x18] sm:$0xff]  ;;  %v780_v28 = vld [vmem:[%s7468_s28 + $0x8] sm:$0xff] }
 0x957   :  { %1536 = vmatpush.msra.mxu2 %v782_v23 }
 0x958   :  { %v1418_v29 = vadd.f32 %v1415_v7, %v6532_v20  ;;  %v779_v7 = vld [vmem:[%s7468_s28] sm:$0xff] }
 0x959   :  { %1537 = vmatpush.msra.mxu2 %v781_v25 }
 0x95a   :  { %v1422_v30 = vsel %vm804_vm0, %v1418_v29, 0.0 }
 0x95b   :  { %1423 = vadd.xlane.f32.xlu1 %v1422_v30  ;;  %1538 = vmatpush.msra.mxu2 %v780_v28 }
 0x95d   :  { %v1661_v32 = vpop.f32.mrf.mxu3  ;;  %1539 = vmatpush.msra.mxu2 %v779_v7 }
 0x95e   :  { %v1664_v33 = vsel %vm837_vm1, %v1661_v32, -inf }
 0x95f   :  { %1665 = vmax.xlane.f32.xlu2 %v1664_v33 }
 0x977   :  { %1701 = vrot.lane.b32.xlu2 %v6632_v3, %s6099_s20 }
 0x9ad   :  { %v1421_v20 = vpop.xlane.xlu0 %1420 }
 0x9ae   :  { %v1432_v41 = vmul.f32 %v6659_v40, %v1421_v20 }
 0x9b0   :  { %v1434_v42 = vsub.f32 %v1417_v26, %v1432_v41 }
 0x9b2   :  { %v1436_v43 = vmul.f32 %v1434_v42, %v1434_v42 }
 0x9b4   :  { %v1438_v44 = vsel %vm804_vm0, %v1436_v43, 0.0 }
 0x9b5   :  { %1439 = vadd.xlane.f32.xlu0 %v1438_v44 }
 0x9c9   :  { %1703 = vrot.lane.b32.xlu0 %v6632_v3, %s6097_s12 }
 0x9ce   :  { %v1424_v45 = vpop.xlane.xlu1 %1423 }
 0x9cf   :  { %v1433_v31 = vmul.f32 %v6659_v40, %v1424_v45 }
 0x9d1   :  { %v6666_v46 = vsub.f32 %v1418_v29, %v1433_v31  ;;  %1768 = vrot.lane.b32.xlu0 %v6632_v3, %s6100_s11 }
 0x9d2   :  { %v1666_v47 = vpop.xlane.xlu2 %1665 }
 0x9d3   :  { %v1667_v48 = vsub.f32 %v1661_v32, %v1666_v47  ;;  %v1437_v49 = vmul.f32 %v6666_v46, %v6666_v46 }
 0x9d5   :  { %v1668_v50 = vmul.f32 1.442695, %v1667_v48  ;;  %v1441_v51 = vsel %vm804_vm0, %v1437_v49, 0.0  ;;  %v4958_v49 = vld [vmem:[#allocation43] ss:$0 sm:$0xff] }
 0x9d6   :  { %1442 = vadd.xlane.f32.xlu1 %v1441_v51 }
 0x9d7   :  { %5022 = vpow2.f32 %v1668_v50 }
 0x9d9   :  { %1833 = vrot.lane.b32.xlu0 %v6632_v3, %s6106_s27 }
 0x9da   :  { %v1702_v11 = vpop.permute.xlu2 %1701 }
 0x9dd   :  { %v6675_v52 = vpop.eup %5022 }
 0x9de   :  { %v1670_v53 = vsel %vm837_vm1, %v6675_v52, 0.0 }
 0x9df   :  { %1671 = vadd.xlane.f32.xlu2 %v1670_v53 }
 0x9ef   :  { %1675 = vrot.lane.b32.xlu1 %v6632_v3, %s6102_s5 }
 0x9f7   :  { %1766 = vrot.lane.b32.xlu1 %v6632_v3, %s6101_s24  ;;  %1831 = vrot.lane.b32.xlu2 %v6632_v3, %s6105_s22 }
 0x9ff   :  { %1805 = vrot.lane.b32.xlu1 %v6632_v3, %s6103_s15 }
 0xa28   :  { %v1440_v60 = vpop.xlane.xlu0 %1439 }
 0xa29   :  { %v1444_v61 = vmul.f32 %v1440_v60, %v6659_v40 }
 0xa2b   :  { %v1446_v62 = vadd.f32 1e-05, %v1444_v61 }
 0xa2d   :  { %5024 = vrsqrt.f32 %v1446_v62  ;;  %vm1454_vm6 = vweird.f32 %v1446_v62 }
 0xa33   :  { %v5025_v63 = vpop.eup %5024 }
 0xa34   :  { %v1449_v1 = vmul.f32 %v5025_v63, %v1446_v62  ;;  %vm1455_vm5 = vweird.f32 %v5025_v63 }
 0xa35   :  { %vm1456_vm7 = vmor %vm1454_vm6, %vm1455_vm5 }
 0xa36   :  { %v1450_v2 = vmul.f32 %v5025_v63, %v1449_v1 }
 0xa38   :  { %v1451_v5 = vmul.f32 0.5, %v1450_v2 }
 0xa3a   :  { %v1452_v6 = vsub.f32 1.5, %v1451_v5 }
 0xa3b   :  { %v1704_v8 = vpop.permute.xlu0 %1703 }
 0xa3c   :  { %v1453_v9 = vmul.f32 %v5025_v63, %v1452_v6  ;;  %4723 = vmatpush.xpose.msk.msra.mxu1 %vm837_vm1, %v1704_v8 }
 0xa3e   :  { %v1457_v12 = vsel %vm1456_vm7, %v5025_v63, %v1453_v9 }
 0xa3f   :  { %v1468_v13 = vmul.f32 %v1457_v12, %v1434_v42  ;;  %4724 = vmatmul.msk.f32.vlgmr.msra.gmra.mxu1 %vm837_vm1, %v1702_v11 }
 0xa41   :  { %v1473_v15 = vmul.f32 %v4956_v10, %v1468_v13 }
 0xa43   :  { %v1769_v17 = vpop.permute.xlu0 %1768  ;;  %v6700_v18 = vadd.f32 %v4957_v14, %v1473_v15 }
 0xa45   :  { %4714 = vmatmul.msk.f32.vlgmr.msrb.gmra.mxu0 %vm804_vm0, %v6700_v18 }
 0xa49   :  { %v1443_v22 = vpop.xlane.xlu1 %1442 }
 0xa4a   :  { %v1445_v24 = vmul.f32 %v1443_v22, %v6659_v40 }
 0xa4b   :  { %v1834_v26 = vpop.permute.xlu0 %1833 }
 0xa4c   :  { %v1447_v27 = vadd.f32 1e-05, %v1445_v24  ;;  %4729 = vmatpush.xpose.msk.msrb.mxu1 %vm837_vm1, %v1834_v26 }
 0xa4e   :  { %5026 = vrsqrt.f32 %v1447_v27  ;;  %vm1464_vm9 = vweird.f32 %v1447_v27 }
 0xa52   :  { %v1672_v29 = vpop.xlane.xlu2 %1671 }
 0xa53   :  { %5028 = vrcp.f32 %v1672_v29 }
 0xa54   :  { %v5027_v30 = vpop.eup %5026 }
 0xa55   :  { %v1459_v32 = vmul.f32 %v5027_v30, %v1447_v27  ;;  %vm1465_vm8 = vweird.f32 %v5027_v30 }
 0xa56   :  { %vm1466_vm10 = vmor %vm1464_vm9, %vm1465_vm8 }
 0xa57   :  { %v1460_v33 = vmul.f32 %v5027_v30, %v1459_v32 }
 0xa59   :  { %v1461_v34 = vmul.f32 0.5, %v1460_v33  ;;  %v5029_v43 = vpop.eup %5028 }
 0xa5a   :  { %v1832_v4 = vpop.permute.xlu2 %1831  ;;  %v1674_v45 = vmul.f32 %v5029_v43, %v6675_v52 }
 0xa5b   :  { %v1462_v36 = vsub.f32 1.5, %v1461_v34  ;;  %4730 = vmatmul.msk.f32.vlgmr.msrb.gmra.mxu1 %vm837_vm1, %v1832_v4 }
 0xa5d   :  { %v1463_v37 = vmul.f32 %v5027_v30, %v1462_v36 }
 0xa5f   :  { %v1467_v38 = vsel %vm1466_vm10, %v5027_v30, %v1463_v37 }
 0xa60   :  { %v1469_v39 = vmul.f32 %v1467_v38, %v6666_v46  ;;  %v1634_v46 = vpop.f32.mrf.mxu1 }
 0xa61   :  { %v1676_v20 = vpop.permute.xlu1 %1675  ;;  %v6733_v63 = vadd.f32 %v6628_v0, %v1634_v46 }
 0xa62   :  { %1696 = vmatpush.msra.mxu0 %v1676_v20  ;;  %v1474_v41 = vmul.f32 %v4956_v10, %v1469_v39 }
 0xa64   :  { %4726 = vmatpush.xpose.msk.msrb.mxu0 %vm837_vm1, %v1769_v17  ;;  %v6716_v42 = vadd.f32 %v4957_v14, %v1474_v41 }
 0xa66   :  { %4715 = vmatmul.msk.f32.gmra.mxu0 %vm804_vm0, %v6716_v42 }
 0xa69   :  { %v1767_v44 = vpop.permute.xlu1 %1766 }
 0xa6e   :  { %4722 = vmatmul.msk.f32.vlgmr.msra.gmra.mxu0 %vm837_vm1, %v1674_v45 }
 0xa71   :  { %v1806_v31 = vpop.permute.xlu1 %1805 }
 0xa72   :  { %1826 = vmatpush.msrb.mxu2 %v1806_v31 }
 0xa76   :  { %4727 = vmatmul.msk.f32.vlgmr.msrb.gmra.mxu0 %vm837_vm1, %v1767_v44 }
 0xabc   :  { %v1726_v47 = vpop.f32.mrf.mxu1 }
 0xabd   :  { %v1729_v48 = vsel %vm837_vm1, %v1726_v47, -inf }
 0xabe   :  { %1730 = vmax.xlane.f32.xlu0 %v1729_v48 }
 0xac2   :  { %v1506_v50 = vpop.f32.mrf.mxu0 }
 0xac3   :  { %v1507_v51 = vadd.f32 %v4958_v49, %v1506_v50 }
 0xac5   :  { %v1512_v53 = vmax.f32 %v1507_v51, 0.0 }
 0xac7   :  { %4716 = vmatmul.msk.f32.vlgmr.msra.gmra.mxu2 %vm1517_vm11, %v1512_v53 }
 0xad8   :  { %v1856_v55 = vpop.f32.mrf.mxu1 }
 0xad9   :  { %v1859_v52 = vsel %vm837_vm1, %v1856_v55, -inf }
 0xada   :  { %1860 = vmax.xlane.f32.xlu2 %v1859_v52  ;;  %v705_v52 = vld [vmem:[%s7469_s14 + $0x18] sm:$0xff] }
 0xae3   :  { %v1509_v56 = vpop.f32.mrf.mxu0 }
 0xae4   :  { %v1510_v57 = vadd.f32 %v4958_v49, %v1509_v56  ;;  %v704_v56 = vld [vmem:[%s7469_s14 + $0x10] sm:$0xff] }
 0xae6   :  { %v1513_v58 = vmax.f32 %v1510_v57, 0.0  ;;  %v703_v57 = vld [vmem:[%s7469_s14 + $0x8] sm:$0xff] }
 0xae8   :  { %4717 = vmatmul.msk.f32.gmra.mxu2 %vm1517_vm11, %v1513_v58  ;;  %v702_v58 = vld [vmem:[%s7469_s14] sm:$0xff] }
 0xaeb   :  { %v6727_v60 = vpop.f32.mrf.mxu0 }
 0xaf2   :  { %1870 = vrot.lane.b32.xlu2 %v6632_v3, %s6107_s3 }
 0xaf3   :  { %v1791_v61 = vpop.f32.mrf.mxu0 }
 0xaf4   :  { %v1794_v62 = vsel %vm837_vm1, %v1791_v61, -inf }
 0xaf5   :  { %1795 = vmax.xlane.f32.xlu1 %v1794_v62 }
 0xafa   :  { %1977 = vrot.lane.b32.xlu2 %v6733_v63, %s6097_s12 }
 0xb0e   :  { %1975 = vrot.lane.b32.xlu1 %v6733_v63, %s6099_s20 }
 0xb31   :  { %v1731_v1 = vpop.xlane.xlu0 %1730 }
 0xb32   :  { %v1732_v2 = vsub.f32 %v1726_v47, %v1731_v1 }
 0xb34   :  { %v1733_v5 = vmul.f32 1.442695, %v1732_v2 }
 0xb36   :  { %5030 = vpow2.f32 %v1733_v5 }
 0xb3c   :  { %v5031_v6 = vpop.eup %5030 }
 0xb3d   :  { %v1735_v8 = vsel %vm837_vm1, %v5031_v6, 0.0 }
 0xb3e   :  { %1736 = vadd.xlane.f32.xlu0 %v1735_v8 }
 0xb4a   :  { %v1541_v20 = vpop.f32.mrf.mxu2 }
 0xb4d   :  { %v1861_v9 = vpop.xlane.xlu2 %1860 }
 0xb4e   :  { %v1862_v10 = vsub.f32 %v1856_v55, %v1861_v9 }
 0xb50   :  { %v1863_v11 = vmul.f32 1.442695, %v1862_v10 }
 0xb52   :  { %5032 = vpow2.f32 %v1863_v11  ;;  %1740 = vrot.lane.b32.xlu0 %v6632_v3, %s6104_s16 }
 0xb55   :  { %v1871_v0 = vpop.permute.xlu2 %1870 }
 0xb58   :  { %v5033_v12 = vpop.eup %5032 }
 0xb59   :  { %v1865_v13 = vsel %vm837_vm1, %v5033_v12, 0.0 }
 0xb5a   :  { %1912 = vrot.lane.b32.xlu0 %v6733_v63, %s6098_s2  ;;  %1866 = vadd.xlane.f32.xlu2 %v1865_v13 }
 0xb5d   :  { %v1978_v14 = vpop.permute.xlu2 %1977 }
 0xb5e   :  { %4735 = vmatpush.xpose.msk.msra.mxu1 %vm837_vm1, %v1978_v14 }
 0xb62   :  { %2042 = vrot.lane.b32.xlu0 %v6733_v63, %s6100_s11 }
 0xb68   :  { %v1796_v15 = vpop.xlane.xlu1 %1795 }
 0xb69   :  { %v1797_v16 = vsub.f32 %v1791_v61, %v1796_v15 }
 0xb6a   :  { %2105 = vrot.lane.b32.xlu0 %v6733_v63, %s6105_s22 }
 0xb6b   :  { %v1798_v3 = vmul.f32 1.442695, %v1797_v16  ;;  %v6769_v41 = vpop.f32.mrf.mxu2 }
 0xb6d   :  { %5034 = vpow2.f32 %v1798_v3 }
 0xb72   :  { %2107 = vrot.lane.b32.xlu2 %v6733_v63, %s6106_s27 }
 0xb73   :  { %v5035_v17 = vpop.eup %5034 }
 0xb74   :  { %v1800_v19 = vsel %vm837_vm1, %v5035_v17, 0.0 }
 0xb75   :  { %1801 = vadd.xlane.f32.xlu1 %v1800_v19 }
 0xb80   :  { %v1976_v21 = vpop.permute.xlu1 %1975 }
 0xb81   :  { %4736 = vmatmul.msk.f32.vlgmr.msra.gmra.mxu1 %vm837_vm1, %v1976_v21 }
 0xb8e   :  { %2040 = vrot.lane.b32.xlu1 %v6733_v63, %s6101_s24 }
 0xbb1   :  { %v1737_v35 = vpop.xlane.xlu0 %1736 }
 0xbb2   :  { %5036 = vrcp.f32 %v1737_v35  ;;  %v6799_v35 = vld [vmem:[#allocation45] ss:$0 sm:$0xff] }
 0xbb8   :  { %v5037_v22 = vpop.eup %5036 }
 0xbb9   :  { %v1739_v23 = vmul.f32 %v5037_v22, %v5031_v6  ;;  %v1542_v22 = vadd.f32 %v6799_v35, %v1541_v20 }
 0xbc4   :  { %v1741_v24 = vpop.permute.xlu0 %1740 }
 0xbc5   :  { %1761 = vmatpush.msrb.mxu3 %v1741_v24 }
 0xbc6   :  { %4725 = vmatmul.msk.f32.vlgmr.msrb.gmra.mxu3 %vm837_vm1, %v1739_v23  ;;  %v1547_v23 = vadd.f32 %v1542_v22, %v6700_v18  ;;  %v691_v22 = vld [vmem:[%s7473_s17 + $0x8] sm:$0xff] }
 0xbc7   :  { %1891 = vmatpush.msra.mxu3 %v1871_v0 }
 0xbc8   :  { %v1549_v24 = vsel %vm804_vm0, %v1547_v23, 0.0 }
 0xbcc   :  { %v1913_v25 = vpop.permute.xlu0 %1912 }
 0xbcd   :  { %4732 = vmatpush.xpose.msk.msra.mxu0 %vm837_vm1, %v1913_v25  ;;  %v1867_v26 = vpop.xlane.xlu2 %1866  ;;  %v6804_v25 = vld [vmem:[#allocation21] ss:$0 sm:$0xff] }
 0xbce   :  { %5038 = vrcp.f32 %v1867_v26 }
 0xbd0   :  { %4733 = vmatmul.msk.f32.vlgmr.msra.gmra.mxu0 %vm837_vm1, %v6733_v63 }
 0xbd4   :  { %v5039_v27 = vpop.eup %5038  ;;  %v2043_v28 = vpop.permute.xlu0 %2042 }
 0xbd5   :  { %v1869_v7 = vmul.f32 %v5039_v27, %v5033_v12  ;;  %4738 = vmatpush.xpose.msk.msrb.mxu0 %vm837_vm1, %v2043_v28  ;;  %v2108_v29 = vpop.permute.xlu2 %2107 }
 0xbd6   :  { %4741 = vmatpush.xpose.msk.msrb.mxu1 %vm837_vm1, %v2108_v29 }
 0xbd7   :  { %4731 = vmatmul.msk.f32.vlgmr.msra.gmra.mxu3 %vm837_vm1, %v1869_v7 }
 0xbd9   :  { %2206 = vmatpush.msra.mxu0 %v705_v52 }
 0xbdb   :  { %2207 = vmatpush.msra.mxu0 %v704_v56 }
 0xbdc   :  { %v2106_v30 = vpop.permute.xlu0 %2105 }
 0xbdd   :  { %4742 = vmatmul.msk.f32.vlgmr.msrb.gmra.mxu1 %vm837_vm1, %v2106_v30  ;;  %2208 = vmatpush.msra.mxu0 %v703_v57 }
 0xbdf   :  { %2209 = vmatpush.msra.mxu0 %v702_v58 }
 0xbe8   :  { %v1802_v32 = vpop.xlane.xlu1 %1801 }
 0xbe9   :  { %5040 = vrcp.f32 %v1802_v32 }
 0xbef   :  { %v5041_v33 = vpop.eup %5040 }
 0xbf0   :  { %v1804_v34 = vmul.f32 %v5041_v33, %v5035_v17 }
 0xbf2   :  { %4728 = vmatmul.msk.f32.vlgmr.msrb.gmra.mxu2 %vm837_vm1, %v1804_v34 }
 0xbfe   :  { %v2000_v4 = vpop.f32.mrf.mxu1 }
 0xbff   :  { %v2003_v36 = vsel %vm837_vm1, %v2000_v4, -inf }
 0xc00   :  { %v2041_v37 = vpop.permute.xlu1 %2040  ;;  %2004 = vmax.xlane.f32.xlu1 %v2003_v36 }
 0xc01   :  { %4739 = vmatmul.msk.f32.vlgmr.msrb.gmra.mxu0 %vm837_vm1, %v2041_v37 }
 0xc49   :  { %v1763_v38 = vpop.f32.mrf.mxu3 }
 0xc4a   :  { %1897 = vrot.lane.b32.xlu2 %v1763_v38, %s6109_s19 }
 0xc4d   :  { %v1935_v43 = vpop.f32.mrf.mxu0 }
 0xc4e   :  { %v1938_v44 = vsel %vm837_vm1, %v1935_v43, -inf }
 0xc5a   :  { %v1893_v39 = vpop.f32.mrf.mxu3  ;;  %v2130_v31 = vpop.f32.mrf.mxu1 }
 0xc5b   :  { %1905 = vrot.lane.b32.xlu0 %v1893_v39, %s6110_s26  ;;  %v2133_v47 = vsel %vm837_vm1, %v2130_v31, -inf }
 0xc73   :  { %1939 = vmax.xlane.f32.xlu2 %v1938_v44  ;;  %v2005_v46 = vpop.xlane.xlu1 %2004 }
 0xc74   :  { %v2006_v48 = vsub.f32 %v2000_v4, %v2005_v46 }
 0xc75   :  { %v1828_v45 = vpop.f32.mrf.mxu2 }
 0xc76   :  { %1901 = vrot.lane.b32.xlu1 %v1828_v45, %s6108_s29  ;;  %v2007_v49 = vmul.f32 1.442695, %v2006_v48 }
 0xc78   :  { %5042 = vpow2.f32 %v2007_v49 }
 0xc7b   :  { %2134 = vmax.xlane.f32.xlu2 %v2133_v47 }
 0xc7e   :  { %v2065_v50 = vpop.f32.mrf.mxu0  ;;  %v6775_v53 = vpop.eup %5042 }
 0xc7f   :  { %v2068_v51 = vsel %vm837_vm1, %v2065_v50, -inf  ;;  %v2009_v55 = vsel %vm837_vm1, %v6775_v53, 0.0 }
 0xc85   :  { %2069 = vmax.xlane.f32.xlu0 %v2068_v51 }
 0xc8d   :  { %2010 = vadd.xlane.f32.xlu0 %v2009_v55 }
 0xca4   :  { %v1898_v61 = vpop.permute.xlu2 %1897 }
 0xca5   :  { %v1908_v2 = vsel %vm837_vm1, %v6727_v60, %v1898_v61  ;;  %v685_v61 = vld [vmem:[%s7470_s9 + $0x18] sm:$0xff] }
 0xca6   :  { %2326 = vmatpush.msra.mxu1 %v685_v61 }
 0xccd   :  { %v1906_v6 = vpop.permute.xlu0 %1905 }
 0xce6   :  { %v1940_v62 = vpop.xlane.xlu2 %1939 }
 0xce7   :  { %v1941_v1 = vsub.f32 %v1935_v43, %v1940_v62  ;;  %v684_v62 = vld [vmem:[%s7470_s9 + $0x10] sm:$0xff] }
 0xce8   :  { %v1902_v5 = vpop.permute.xlu1 %1901  ;;  %2327 = vmatpush.msra.mxu1 %v684_v62 }
 0xce9   :  { %v1942_v8 = vmul.f32 1.442695, %v1941_v1  ;;  %v1909_v9 = vsel %vm1107_vm2, %v1908_v2, %v1902_v5  ;;  %v683_v1 = vld [vmem:[%s7470_s9 + $0x8] sm:$0xff]  ;;  %v682_v2 = vld [vmem:[%s7470_s9] sm:$0xff]  ;;  %v1545_v5 = vadd.f32 %v6799_v35, %v6769_v41  ;;  %v692_v35 = vld [vmem:[%s7473_s17 + $0x10] sm:$0xff] }
 0xcea   :  { %v1910_v10 = vsel %vm1109_vm3, %v1909_v9, %v1906_v6  ;;  %2328 = vmatpush.msra.mxu1 %v683_v1 }
 0xceb   :  { %5044 = vpow2.f32 %v1942_v8  ;;  %4744 = vmatmul.msk.f32.vlgmr.msra.gmra.mxu0 %vm804_vm0, %v1910_v10  ;;  %v1548_v10 = vadd.f32 %v1545_v5, %v6716_v42 }
 0xcec   :  { %2329 = vmatpush.msra.mxu1 %v682_v2 }
 0xcee   :  { %v2135_v11 = vpop.xlane.xlu2 %2134 }
 0xcef   :  { %v2136_v0 = vsub.f32 %v2130_v31, %v2135_v11  ;;  %v1552_v11 = vsel %vm804_vm0, %v1548_v10, 0.0 }
 0xcf1   :  { %v5045_v12 = vpop.eup %5044  ;;  %v2137_v13 = vmul.f32 1.442695, %v2136_v0 }
 0xcf2   :  { %v1944_v14 = vsel %vm837_vm1, %v5045_v12, 0.0 }
 0xcf3   :  { %5046 = vpow2.f32 %v2137_v13  ;;  %1945 = vadd.xlane.f32.xlu1 %v1944_v14 }
 0xcf8   :  { %v2070_v15 = vpop.xlane.xlu0 %2069 }
 0xcf9   :  { %v5047_v60 = vpop.eup %5046  ;;  %v2071_v16 = vsub.f32 %v2065_v50, %v2070_v15 }
 0xcfa   :  { %v2139_v3 = vsel %vm837_vm1, %v5047_v60, 0.0 }
 0xcfb   :  { %v2072_v17 = vmul.f32 1.442695, %v2071_v16  ;;  %2140 = vadd.xlane.f32.xlu0 %v2139_v3  ;;  %v6840_v3 = vld [vmem:[%s7472_s30] ss:$0 sm:$0xff] }
 0xcfd   :  { %5048 = vpow2.f32 %v2072_v17 }
 0xd03   :  { %v5049_v19 = vpop.eup %5048 }
 0xd04   :  { %v2074_v21 = vsel %vm837_vm1, %v5049_v19, 0.0 }
 0xd05   :  { %2075 = vadd.xlane.f32.xlu2 %v2074_v21  ;;  %v693_v21 = vld [vmem:[%s7473_s17 + $0x18] sm:$0xff] }
 0xd0c   :  { %1949 = vrot.lane.b32.xlu1 %v6733_v63, %s6102_s5 }
 0xd0f   :  { %2079 = vrot.lane.b32.xlu0 %v6733_v63, %s6103_s15 }
 0xd14   :  { %2144 = vrot.lane.b32.xlu1 %v6733_v63, %s6107_s3 }
 0xd1d   :  { %2014 = vrot.lane.b32.xlu2 %v6733_v63, %s6104_s16  ;;  %v2011_v63 = vpop.xlane.xlu0 %2010 }
 0xd39   :  { %1550 = vadd.xlane.f32.xlu0 %v1549_v24 }
 0xd66   :  { %v1946_v29 = vpop.xlane.xlu1 %1945 }
 0xd67   :  { %5050 = vrcp.f32 %v1946_v29 }
 0xd68   :  { %v2211_v26 = vpop.f32.mrf.mxu0  ;;  %5052 = vrcp.f32 %v2011_v63 }
 0xd69   :  { %v2212_v27 = vadd.f32 %v6804_v25, %v2211_v26 }
 0xd6b   :  { %v2217_v28 = vadd.f32 %v2212_v27, %v6620_v59 }
 0xd6d   :  { %v2219_v7 = vsel %vm804_vm0, %v2217_v28, 0.0  ;;  %v5051_v18 = vpop.eup %5050 }
 0xd6e   :  { %2220 = vadd.xlane.f32.xlu2 %v2219_v7  ;;  %v2141_v32 = vpop.xlane.xlu0 %2140  ;;  %v5053_v33 = vpop.eup %5052  ;;  %v1948_v34 = vmul.f32 %v5051_v18, %v5045_v12  ;;  %v6853_v18 = vld [vmem:[#allocation13] ss:$0 sm:$0xff] }
 0xd6f   :  { %v2013_v36 = vmul.f32 %v5053_v33, %v6775_v53 }
 0xd78   :  { %v2076_v30 = vpop.xlane.xlu2 %2075 }
 0xd79   :  { %5054 = vrcp.f32 %v2076_v30 }
 0xd7a   :  { %5056 = vrcp.f32 %v2141_v32 }
 0xd7e   :  { %v1950_v4 = vpop.permute.xlu1 %1949 }
 0xd7f   :  { %1970 = vmatpush.msra.mxu2 %v1950_v4  ;;  %v5055_v38 = vpop.eup %5054  ;;  %v6856_v4 = vld [vmem:[#allocation12] ss:$0 sm:$0xff] }
 0xd80   :  { %4734 = vmatmul.msk.f32.vlgmr.msra.gmra.mxu2 %vm837_vm1, %v1948_v34  ;;  %v2015_v59 = vpop.permute.xlu2 %2014  ;;  %v5057_v39 = vpop.eup %5056  ;;  %v2078_v20 = vmul.f32 %v5055_v38, %v5049_v19 }
 0xd81   :  { %v2080_v37 = vpop.permute.xlu0 %2079  ;;  %2035 = vmatpush.msrb.mxu3 %v2015_v59  ;;  %v2143_v44 = vmul.f32 %v5057_v39, %v5047_v60  ;;  %v6837_v60 = vld [vmem:[%s7471_s0] ss:$0 sm:$0xff] }
 0xd82   :  { %4737 = vmatmul.msk.f32.vlgmr.msrb.gmra.mxu3 %vm837_vm1, %v2013_v36  ;;  %2100 = vmatpush.msrb.mxu2 %v2080_v37 }
 0xd84   :  { %2294 = vmatpush.msra.mxu2 %v693_v21 }
 0xd86   :  { %v2145_v43 = vpop.permute.xlu1 %2144  ;;  %2295 = vmatpush.msra.mxu2 %v692_v35 }
 0xd87   :  { %2165 = vmatpush.msra.mxu3 %v2145_v43 }
 0xd88   :  { %4740 = vmatmul.msk.f32.vlgmr.msrb.gmra.mxu2 %vm837_vm1, %v2078_v20 }
 0xd89   :  { %2296 = vmatpush.msra.mxu2 %v691_v22 }
 0xd8a   :  { %4743 = vmatmul.msk.f32.vlgmr.msra.gmra.mxu3 %vm837_vm1, %v2143_v44 }
 0xdac   :  { %v1551_v45 = vpop.xlane.xlu0 %1550 }
 0xdad   :  { %v1555_v31 = vmul.f32 %v1551_v45, %v6659_v40 }
 0xdaf   :  { %v1557_v46 = vsub.f32 %v1547_v23, %v1555_v31  ;;  %v690_v23 = vld [vmem:[%s7473_s17] sm:$0xff] }
 0xdb0   :  { %2297 = vmatpush.msra.mxu2 %v690_v23 }
 0xdb1   :  { %v1559_v47 = vmul.f32 %v1557_v46, %v1557_v46 }
 0xdb3   :  { %v1561_v48 = vsel %vm804_vm0, %v1559_v47, 0.0 }
 0xdb4   :  { %1562 = vadd.xlane.f32.xlu2 %v1561_v48 }
 0xde1   :  { %v2221_v49 = vpop.xlane.xlu2 %2220 }
 0xde2   :  { %v2225_v50 = vmul.f32 %v2221_v49, %v6659_v40  ;;  %v6871_v49 = vld [vmem:[#allocation7] ss:$0 sm:$0xff] }
 0xde4   :  { %v6817_v51 = vsub.f32 %v2217_v28, %v2225_v50 }
 0xde6   :  { %v2229_v53 = vmul.f32 %v6817_v51, %v6817_v51 }
 0xde8   :  { %v2231_v55 = vsel %vm804_vm0, %v2229_v53, 0.0  ;;  %v6882_v53 = vld [vmem:[#allocation10] ss:$0 sm:$0xff] }
 0xde9   :  { %2232 = vadd.xlane.f32.xlu1 %v2231_v55 }
 0xe03   :  { %v6822_v52 = vpop.f32.mrf.mxu2 }
 0xe05   :  { %v2037_v56 = vpop.f32.mrf.mxu3 }
 0xe06   :  { %2171 = vrot.lane.b32.xlu0 %v2037_v56, %s6109_s19 }
 0xe0b   :  { %v2102_v57 = vpop.f32.mrf.mxu2 }
 0xe0c   :  { %2175 = vrot.lane.b32.xlu1 %v2102_v57, %s6108_s29 }
 0xe0d   :  { %v2167_v58 = vpop.f32.mrf.mxu3 }
 0xe0e   :  { %2179 = vrot.lane.b32.xlu2 %v2167_v58, %s6110_s26 }
 0xe27   :  { %v1563_v6 = vpop.xlane.xlu2 %1562 }
 0xe28   :  { %v1567_v8 = vmul.f32 %v1563_v6, %v6659_v40 }
 0xe2a   :  { %v1569_v9 = vadd.f32 1e-05, %v1567_v8 }
 0xe2c   :  { %5058 = vrsqrt.f32 %v1569_v9  ;;  %vm1577_vm13 = vweird.f32 %v1569_v9 }
 0xe30   :  { %1553 = vadd.xlane.f32.xlu0 %v1552_v11 }
 0xe32   :  { %v5059_v0 = vpop.eup %5058 }
 0xe33   :  { %v1572_v12 = vmul.f32 %v5059_v0, %v1569_v9  ;;  %vm1578_vm12 = vweird.f32 %v5059_v0 }
 0xe34   :  { %vm1579_vm14 = vmor %vm1577_vm13, %vm1578_vm12 }
 0xe35   :  { %v1573_v13 = vmul.f32 %v5059_v0, %v1572_v12 }
 0xe37   :  { %v1574_v14 = vmul.f32 0.5, %v1573_v13 }
 0xe39   :  { %v1575_v15 = vsub.f32 1.5, %v1574_v14 }
 0xe3b   :  { %v1576_v41 = vmul.f32 %v5059_v0, %v1575_v15 }
 0xe3d   :  { %v1580_v42 = vsel %vm1579_vm14, %v5059_v0, %v1576_v41 }
 0xe3e   :  { %v1591_v16 = vmul.f32 %v1580_v42, %v1557_v46 }
 0xe40   :  { %v1596_v17 = vmul.f32 %v6837_v60, %v1591_v16 }
 0xe42   :  { %v6844_v19 = vadd.f32 %v6840_v3, %v1596_v17 }
 0xe44   :  { %4748 = vmatmul.msk.f32.vlgmr.msra.gmra.mxu1 %vm804_vm0, %v6844_v19 }
 0xe5c   :  { %v2233_v24 = vpop.xlane.xlu1 %2232 }
 0xe5d   :  { %v2237_v26 = vmul.f32 %v2233_v24, %v6659_v40 }
 0xe5f   :  { %v2239_v27 = vadd.f32 1e-05, %v2237_v26 }
 0xe61   :  { %5060 = vrsqrt.f32 %v2239_v27  ;;  %vm2247_vm4 = vweird.f32 %v2239_v27 }
 0xe67   :  { %v5061_v28 = vpop.eup %5060 }
 0xe68   :  { %v2242_v7 = vmul.f32 %v5061_v28, %v2239_v27  ;;  %vm2248_vm15 = vweird.f32 %v5061_v28  ;;  %v2180_v20 = vpop.permute.xlu2 %2179 }
 0xe69   :  { %vm2249_vm5 = vmor %vm2247_vm4, %vm2248_vm15 }
 0xe6a   :  { %v2243_v63 = vmul.f32 %v5061_v28, %v2242_v7 }
 0xe6c   :  { %v2244_v29 = vmul.f32 0.5, %v2243_v63 }
 0xe6e   :  { %v2245_v30 = vsub.f32 1.5, %v2244_v29 }
 0xe70   :  { %v2246_v32 = vmul.f32 %v5061_v28, %v2245_v30 }
 0xe72   :  { %v2250_v33 = vsel %vm2249_vm5, %v5061_v28, %v2246_v32 }
 0xe73   :  { %v2261_v34 = vmul.f32 %v2250_v33, %v6817_v51 }
 0xe75   :  { %v2266_v36 = vmul.f32 %v6853_v18, %v2261_v34 }
 0xe77   :  { %v6860_v59 = vadd.f32 %v6856_v4, %v2266_v36 }
 0xe78   :  { %v2172_v37 = vpop.permute.xlu0 %2171 }
 0xe79   :  { %4746 = vmatmul.msk.f32.vlgmr.msra.gmra.mxu2 %vm804_vm0, %v6860_v59  ;;  %v2182_v38 = vsel %vm837_vm1, %v6822_v52, %v2172_v37 }
 0xe7e   :  { %v2176_v39 = vpop.permute.xlu1 %2175 }
 0xe7f   :  { %v2183_v43 = vsel %vm1107_vm2, %v2182_v38, %v2176_v39 }
 0xe80   :  { %v2184_v44 = vsel %vm1109_vm3, %v2183_v43, %v2180_v20 }
 0xe81   :  { %4745 = vmatmul.msk.f32.gmra.mxu0 %vm804_vm0, %v2184_v44 }
 0xea3   :  { %v1554_v45 = vpop.xlane.xlu0 %1553 }
 0xea4   :  { %v1556_v31 = vmul.f32 %v1554_v45, %v6659_v40 }
 0xea6   :  { %v1558_v46 = vsub.f32 %v1548_v10, %v1556_v31 }
 0xea8   :  { %v1560_v47 = vmul.f32 %v1558_v46, %v1558_v46 }
 0xeaa   :  { %v1564_v48 = vsel %vm804_vm0, %v1560_v47, 0.0 }
 0xeab   :  { %1565 = vadd.xlane.f32.xlu1 %v1564_v48 }
 0xec1   :  { %v2331_v50 = vpop.f32.mrf.mxu1 }
 0xec2   :  { %v6874_v51 = vadd.f32 %v6871_v49, %v2331_v50 }
 0xec4   :  { %2402 = vrot.lane.b32.xlu0 %v6874_v51, %s6099_s20  ;;  %4750 = vmatpush.xpose.msk.msrb.mxu3 %vm837_vm1, %v6874_v51 }
 0xecc   :  { %2532 = vrot.lane.b32.xlu0 %v6874_v51, %s6105_s22 }
 0xefc   :  { %v2299_v55 = vpop.f32.mrf.mxu2 }
 0xefd   :  { %v2300_v52 = vadd.f32 %v6882_v53, %v2299_v55 }
 0xefe   :  { %v2214_v56 = vpop.f32.mrf.mxu0 }
 0xeff   :  { %v2215_v57 = vadd.f32 %v6804_v25, %v2214_v56  ;;  %2400 = vrot.lane.b32.xlu1 %v2300_v52, %s6099_s20  ;;  %2465 = vrot.lane.b32.xlu0 %v2300_v52, %s6101_s24 }
 0xf00   :  { %4751 = vmatmul.msk.f32.vlgmr.msrb.gmra.mxu3 %vm837_vm1, %v2300_v52 }
 0xf01   :  { %v2218_v58 = vadd.f32 %v2215_v57, %v6688_v54 }
 0xf03   :  { %v2222_v61 = vsel %vm804_vm0, %v2218_v58, 0.0 }
 0xf04   :  { %2223 = vadd.xlane.f32.xlu2 %v2222_v61 }
 0xf07   :  { %2530 = vrot.lane.b32.xlu1 %v2300_v52, %s6105_s22  ;;  %2439 = vrot.lane.b32.xlu0 %v6874_v51, %s6097_s12 }
 0xf0f   :  { %2374 = vrot.lane.b32.xlu1 %v6874_v51, %s6098_s2  ;;  %2569 = vrot.lane.b32.xlu0 %v6874_v51, %s6106_s27 }
 0xf1c   :  { %2467 = vrot.lane.b32.xlu2 %v6874_v51, %s6101_s24 }
 0xf1e   :  { %v1566_v25 = vpop.xlane.xlu1 %1565 }
 0xf1f   :  { %v1568_v54 = vmul.f32 %v1566_v25, %v6659_v40 }
 0xf21   :  { %v1570_v62 = vadd.f32 1e-05, %v1568_v54 }
 0xf23   :  { %5062 = vrsqrt.f32 %v1570_v62  ;;  %vm1587_vm7 = vweird.f32 %v1570_v62 }
 0xf29   :  { %v5063_v1 = vpop.eup %5062 }
 0xf2a   :  { %v1582_v2 = vmul.f32 %v5063_v1, %v1570_v62  ;;  %vm1588_vm6 = vweird.f32 %v5063_v1 }
 0xf2b   :  { %vm1589_vm8 = vmor %vm1587_vm7, %vm1588_vm6 }
 0xf2c   :  { %v1583_v5 = vmul.f32 %v5063_v1, %v1582_v2 }
 0xf2e   :  { %v1584_v6 = vmul.f32 0.5, %v1583_v5 }
 0xf30   :  { %v1585_v8 = vsub.f32 1.5, %v1584_v6 }
 0xf32   :  { %v1586_v9 = vmul.f32 %v5063_v1, %v1585_v8 }
 0xf34   :  { %v1590_v10 = vsel %vm1589_vm8, %v5063_v1, %v1586_v9 }
 0xf35   :  { %v1592_v11 = vmul.f32 %v1590_v10, %v1558_v46 }
 0xf36   :  { %v2403_v0 = vpop.permute.xlu0 %2402 }
 0xf37   :  { %4753 = vmatpush.xpose.msk.msrb.mxu0 %vm837_vm1, %v2403_v0  ;;  %v1597_v12 = vmul.f32 %v6837_v60, %v1592_v11 }
 0xf39   :  { %v6904_v13 = vadd.f32 %v6840_v3, %v1597_v12 }
 0xf3b   :  { %4749 = vmatmul.msk.f32.gmra.mxu1 %vm804_vm0, %v6904_v13 }
 0xf3e   :  { %v2533_v14 = vpop.permute.xlu0 %2532 }
 0xf3f   :  { %4759 = vmatpush.xpose.msk.msra.mxu0 %vm837_vm1, %v2533_v14 }
 0xf71   :  { %v2401_v15 = vpop.permute.xlu1 %2400  ;;  %v2466_v41 = vpop.permute.xlu0 %2465 }
 0xf72   :  { %4754 = vmatmul.msk.f32.vlgmr.msrb.gmra.mxu0 %vm837_vm1, %v2401_v15 }
 0xf77   :  { %v2224_v42 = vpop.xlane.xlu2 %2223 }
 0xf78   :  { %v2226_v16 = vmul.f32 %v2224_v42, %v6659_v40 }
 0xf79   :  { %v2531_v17 = vpop.permute.xlu1 %2530  ;;  %v2440_v21 = vpop.permute.xlu0 %2439 }
 0xf7a   :  { %v2228_v35 = vsub.f32 %v2218_v58, %v2226_v16  ;;  %2460 = vmatpush.msrb.mxu2 %v2440_v21  ;;  %4760 = vmatmul.msk.f32.vlgmr.msra.gmra.mxu0 %vm837_vm1, %v2531_v17 }
 0xf7c   :  { %v2230_v60 = vmul.f32 %v2228_v35, %v2228_v35 }
 0xf7e   :  { %v2234_v3 = vsel %vm804_vm0, %v2230_v60, 0.0 }
 0xf7f   :  { %2235 = vadd.xlane.f32.xlu2 %v2234_v3  ;;  %v2468_v22 = vpop.permute.xlu2 %2467 }
 0xf80   :  { %4756 = vmatpush.xpose.msk.msrb.mxu1 %vm837_vm1, %v2468_v22 }
 0xf81   :  { %v2375_v23 = vpop.permute.xlu1 %2374  ;;  %v2570_v24 = vpop.permute.xlu0 %2569 }
 0xf82   :  { %2395 = vmatpush.msra.mxu3 %v2375_v23  ;;  %2590 = vmatpush.msra.mxu2 %v2570_v24 }
 0xf83   :  { %v2360_v26 = vpop.f32.mrf.mxu3  ;;  %4757 = vmatmul.msk.f32.vlgmr.msrb.gmra.mxu1 %vm837_vm1, %v2466_v41 }
 0xf84   :  { %v2363_v27 = vsel %vm837_vm1, %v2360_v26, -inf }
 0xf85   :  { %2364 = vmax.xlane.f32.xlu0 %v2363_v27 }
 0xf97   :  { %2504 = vrot.lane.b32.xlu2 %v6874_v51, %s6100_s11 }
 0xfb8   :  { %v2334_v28 = vpop.f32.mrf.mxu1 }
 0xfb9   :  { %v6919_v7 = vadd.f32 %v6871_v49, %v2334_v28 }
 0xfbb   :  { %4762 = vmatpush.xpose.msk.msra.mxu1 %vm837_vm1, %v6919_v7 }
 0xfef   :  { %v2425_v63 = vpop.f32.mrf.mxu0 }
 0xff0   :  { %v2428_v29 = vsel %vm837_vm1, %v2425_v63, -inf }
 0xff1   :  { %2429 = vmax.xlane.f32.xlu1 %v2428_v29 }
 0xff2   :  { %v2236_v30 = vpop.xlane.xlu2 %2235 }
 0xff3   :  { %v2238_v32 = vmul.f32 %v2236_v30, %v6659_v40 }
 0xff5   :  { %v2240_v33 = vadd.f32 1e-05, %v2238_v32 }
 0xff7   :  { %5064 = vrsqrt.f32 %v2240_v33  ;;  %v2555_v34 = vpop.f32.mrf.mxu0  ;;  %vm2257_vm10 = vweird.f32 %v2240_v33 }
 0xff8   :  { %v2558_v36 = vsel %vm837_vm1, %v2555_v34, -inf  ;;  %v2365_v51 = vpop.xlane.xlu0 %2364 }
 0xff9   :  { %2559 = vmax.xlane.f32.xlu0 %v2558_v36  ;;  %v2366_v55 = vsub.f32 %v2360_v26, %v2365_v51  ;;  %v688_v51 = vld [vmem:[%s7474_s1 + $0x10] sm:$0xff] }
 0xffa   :  { %v2505_v37 = vpop.permute.xlu2 %2504 }
 0xffb   :  { %2525 = vmatpush.msrb.mxu3 %v2505_v37  ;;  %v2367_v52 = vmul.f32 1.442695, %v2366_v55  ;;  %v687_v55 = vld [vmem:[%s7474_s1 + $0x8] sm:$0xff] }
 0xffd   :  { %v5065_v38 = vpop.eup %5064  ;;  %5066 = vpow2.f32 %v2367_v52  ;;  %v686_v52 = vld [vmem:[%s7474_s1] sm:$0xff] }
 0xffe   :  { %v2252_v39 = vmul.f32 %v5065_v38, %v2240_v33  ;;  %vm2258_vm9 = vweird.f32 %v5065_v38 }
 0xfff   :  { %vm2259_vm12 = vmor %vm2257_vm10, %vm2258_vm9 }
0x1000   :  { %v2253_v20 = vmul.f32 %v5065_v38, %v2252_v39  ;;  %v2490_v43 = vpop.f32.mrf.mxu1 }
0x1001   :  { %v2493_v44 = vsel %vm837_vm1, %v2490_v43, -inf }
0x1002   :  { %v2254_v45 = vmul.f32 0.5, %v2253_v20  ;;  %2494 = vmax.xlane.f32.xlu2 %v2493_v44 }
0x1003   :  { %v5067_v56 = vpop.eup %5066 }
0x1004   :  { %v2255_v31 = vsub.f32 1.5, %v2254_v45  ;;  %v2369_v57 = vsel %vm837_vm1, %v5067_v56, 0.0 }
0x1006   :  { %v2256_v46 = vmul.f32 %v5065_v38, %v2255_v31 }
0x1008   :  { %v2260_v47 = vsel %vm2259_vm12, %v5065_v38, %v2256_v46 }
0x1009   :  { %v2262_v48 = vmul.f32 %v2260_v47, %v2228_v35 }
0x100a   :  { %2675 = vrot.lane.b32.xlu1 %v6919_v7, %s6099_s20 }
0x100b   :  { %v2267_v49 = vmul.f32 %v6853_v18, %v2262_v48 }
0x100d   :  { %v6931_v50 = vadd.f32 %v6856_v4, %v2267_v49  ;;  %v689_v49 = vld [vmem:[%s7474_s1 + $0x18] sm:$0xff] }
0x100f   :  { %4747 = vmatmul.msk.f32.gmra.mxu2 %vm804_vm0, %v6931_v50 }
0x101a   :  { %2740 = vrot.lane.b32.xlu2 %v6919_v7, %s6101_s24 }
0x1034   :  { %2370 = vadd.xlane.f32.xlu1 %v2369_v57 }
0x104d   :  { %2805 = vrot.lane.b32.xlu1 %v6919_v7, %s6105_s22 }
0x1064   :  { %v2430_v18 = vpop.xlane.xlu1 %2429 }
0x1065   :  { %v2431_v4 = vsub.f32 %v2425_v63, %v2430_v18 }
0x1067   :  { %v2432_v58 = vmul.f32 1.442695, %v2431_v4 }
0x1069   :  { %5068 = vpow2.f32 %v2432_v58 }
0x106c   :  { %v2560_v61 = vpop.xlane.xlu0 %2559 }
0x106d   :  { %v2561_v25 = vsub.f32 %v2555_v34, %v2560_v61 }
0x106f   :  { %v5069_v54 = vpop.eup %5068  ;;  %v2562_v62 = vmul.f32 1.442695, %v2561_v25 }
0x1070   :  { %v2434_v1 = vsel %vm837_vm1, %v5069_v54, 0.0 }
0x1071   :  { %5070 = vpow2.f32 %v2562_v62  ;;  %2435 = vadd.xlane.f32.xlu2 %v2434_v1 }
0x1075   :  { %v2495_v2 = vpop.xlane.xlu2 %2494 }
0x1076   :  { %v2496_v12 = vsub.f32 %v2490_v43, %v2495_v2 }
0x1077   :  { %v5071_v5 = vpop.eup %5070 }
0x1078   :  { %v2564_v6 = vsel %vm837_vm1, %v5071_v5, 0.0  ;;  %v2497_v41 = vmul.f32 1.442695, %v2496_v12 }
0x1079   :  { %2565 = vadd.xlane.f32.xlu2 %v2564_v6 }
0x107c   :  { %v2676_v8 = vpop.permute.xlu1 %2675 }
0x107d   :  { %4765 = vmatpush.xpose.msk.msrb.mxu0 %vm837_vm1, %v2676_v8  ;;  %v2741_v9 = vpop.permute.xlu2 %2740 }
0x107e   :  { %4768 = vmatpush.xpose.msk.msrb.mxu1 %vm837_vm1, %v2741_v9 }
0x1092   :  { %v2302_v10 = vpop.f32.mrf.mxu2 }
0x1093   :  { %v2303_v11 = vadd.f32 %v6882_v53, %v2302_v10 }
0x1095   :  { %4763 = vmatmul.msk.f32.vlgmr.msra.gmra.mxu1 %vm837_vm1, %v2303_v11  ;;  %2673 = vrot.lane.b32.xlu0 %v2303_v11, %s6099_s20 }
0x1096   :  { %2803 = vrot.lane.b32.xlu2 %v2303_v11, %s6105_s22  ;;  %2904 = vmatpush.msra.mxu1 %v689_v49 }
0x1098   :  { %2905 = vmatpush.msra.mxu1 %v688_v51 }
0x109a   :  { %2906 = vmatpush.msra.mxu1 %v687_v55 }
0x109c   :  { %2907 = vmatpush.msra.mxu1 %v686_v52 }
0x10a7   :  { %v2371_v0 = vpop.xlane.xlu1 %2370 }
0x10a8   :  { %5072 = vrcp.f32 %v2371_v0 }
0x10a9   :  { %5074 = vpow2.f32 %v2497_v41 }
0x10ae   :  { %v5073_v14 = vpop.eup %5072 }
0x10af   :  { %v2373_v15 = vmul.f32 %v5073_v14, %v5067_v56  ;;  %v5075_v42 = vpop.eup %5074 }
0x10b0   :  { %v2499_v16 = vsel %vm837_vm1, %v5075_v42, 0.0 }
0x10b1   :  { %4752 = vmatmul.msk.f32.vlgmr.msra.gmra.mxu3 %vm837_vm1, %v2373_v15 }
0x10bf   :  { %2500 = vadd.xlane.f32.xlu0 %v2499_v16  ;;  %v2806_v53 = vpop.permute.xlu1 %2805 }
0x10c0   :  { %4771 = vmatpush.xpose.msk.msra.mxu0 %vm837_vm1, %v2806_v53 }
0x10d3   :  { %2738 = vrot.lane.b32.xlu0 %v2303_v11, %s6101_s24 }
0x10e4   :  { %v2436_v17 = vpop.xlane.xlu2 %2435 }
0x10e5   :  { %5076 = vrcp.f32 %v2436_v17  ;;  %v6986_v17 = vld [vmem:[#allocation9] ss:$0 sm:$0xff] }
0x10eb   :  { %v5077_v21 = vpop.eup %5076 }
0x10ec   :  { %v2438_v35 = vmul.f32 %v5077_v21, %v5069_v54  ;;  %v2566_v60 = vpop.xlane.xlu2 %2565 }
0x10ed   :  { %5078 = vrcp.f32 %v2566_v60 }
0x10ee   :  { %4755 = vmatmul.msk.f32.vlgmr.msrb.gmra.mxu2 %vm837_vm1, %v2438_v35 }
0x10f3   :  { %v5079_v3 = vpop.eup %5078 }
0x10f4   :  { %v2568_v22 = vmul.f32 %v5079_v3, %v5071_v5  ;;  %v2804_v24 = vpop.permute.xlu2 %2803 }
0x10f6   :  { %4761 = vmatmul.msk.f32.vlgmr.msra.gmra.mxu2 %vm837_vm1, %v2568_v22 }
0x1107   :  { %v2674_v23 = vpop.permute.xlu0 %2673 }
0x1108   :  { %4766 = vmatmul.msk.f32.vlgmr.msrb.gmra.mxu0 %vm837_vm1, %v2674_v23 }
0x1110   :  { %4772 = vmatmul.msk.f32.vlgmr.msra.gmra.mxu0 %vm837_vm1, %v2804_v24 }
0x1112   :  { %v2633_v26 = vpop.f32.mrf.mxu1 }
0x1113   :  { %v2636_v27 = vsel %vm837_vm1, %v2633_v26, -inf }
0x1114   :  { %2637 = vmax.xlane.f32.xlu1 %v2636_v27 }
0x1132   :  { %v2501_v28 = vpop.xlane.xlu0 %2500 }
0x1133   :  { %5080 = vrcp.f32 %v2501_v28 }
0x1134   :  { %v2397_v37 = vpop.f32.mrf.mxu3 }
0x1139   :  { %v5081_v63 = vpop.eup %5080 }
0x113a   :  { %v2503_v29 = vmul.f32 %v5081_v63, %v5075_v42 }
0x113c   :  { %4758 = vmatmul.msk.f32.vlgmr.msrb.gmra.mxu3 %vm837_vm1, %v2503_v29 }
0x1145   :  { %v2739_v30 = vpop.permute.xlu0 %2738 }
0x1146   :  { %4769 = vmatmul.msk.f32.vlgmr.msrb.gmra.mxu1 %vm837_vm1, %v2739_v30 }
0x1171   :  { %v2462_v32 = vpop.f32.mrf.mxu2 }
0x1172   :  { %2596 = vrot.lane.b32.xlu1 %v2462_v32, %s6109_s19 }
0x1179   :  { %v2592_v43 = vpop.f32.mrf.mxu2 }
0x1185   :  { %v2698_v33 = vpop.f32.mrf.mxu0 }
0x1186   :  { %v2701_v44 = vsel %vm837_vm1, %v2698_v33, -inf }
0x1187   :  { %v2638_v45 = vpop.xlane.xlu1 %2637 }
0x1188   :  { %v2639_v31 = vsub.f32 %v2633_v26, %v2638_v45  ;;  %v713_v45 = vld [vmem:[%s7475_s7 + $0x18] sm:$0xff] }
0x118a   :  { %v2640_v46 = vmul.f32 1.442695, %v2639_v31  ;;  %v712_v31 = vld [vmem:[%s7475_s7 + $0x10] sm:$0xff] }
0x118c   :  { %5082 = vpow2.f32 %v2640_v46  ;;  %v711_v46 = vld [vmem:[%s7475_s7 + $0x8] sm:$0xff] }
0x118d   :  { %v2828_v34 = vpop.f32.mrf.mxu0 }
0x118e   :  { %v2831_v36 = vsel %vm837_vm1, %v2828_v34, -inf }
0x1192   :  { %v5083_v47 = vpop.eup %5082 }
0x1193   :  { %v2642_v48 = vsel %vm837_vm1, %v5083_v47, 0.0 }
0x119c   :  { %2832 = vmax.xlane.f32.xlu1 %v2831_v36 }
0x11bf   :  { %v2527_v38 = vpop.f32.mrf.mxu3 }
0x11c0   :  { %2600 = vrot.lane.b32.xlu0 %v2527_v38, %s6108_s29 }
0x11c3   :  { %v2763_v39 = vpop.f32.mrf.mxu1 }
0x11c4   :  { %v2766_v20 = vsel %vm837_vm1, %v2763_v39, -inf }
0x11c5   :  { %2767 = vmax.xlane.f32.xlu2 %v2766_v20 }
0x11dd   :  { %2604 = vrot.lane.b32.xlu2 %v2592_v43, %s6110_s26 }
0x11e4   :  { %v2597_v4 = vpop.permute.xlu1 %2596 }
0x11e5   :  { %v2607_v61 = vsel %vm837_vm1, %v2397_v37, %v2597_v4 }
0x11ea   :  { %2702 = vmax.xlane.f32.xlu0 %v2701_v44 }
0x1206   :  { %2643 = vadd.xlane.f32.xlu2 %v2642_v48 }
0x120f   :  { %v2833_v5 = vpop.xlane.xlu1 %2832 }
0x1210   :  { %v2834_v9 = vsub.f32 %v2828_v34, %v2833_v5 }
0x1212   :  { %v2835_v11 = vmul.f32 1.442695, %v2834_v9 }
0x121e   :  { %2647 = vrot.lane.b32.xlu2 %v6919_v7, %s6098_s2 }
0x1226   :  { %2842 = vrot.lane.b32.xlu2 %v6919_v7, %s6106_s27 }
0x1232   :  { %v2601_v58 = vpop.permute.xlu0 %2600 }
0x1233   :  { %v2608_v25 = vsel %vm1107_vm2, %v2607_v61, %v2601_v58  ;;  %v719_v58 = vld [vmem:[%s7476_s6 + $0x28] sm:$0xff] }
0x1238   :  { %v2768_v56 = vpop.xlane.xlu2 %2767 }
0x1239   :  { %v2769_v57 = vsub.f32 %v2763_v39, %v2768_v56 }
0x123b   :  { %v2770_v18 = vmul.f32 1.442695, %v2769_v57  ;;  %v721_v57 = vld [vmem:[%s7476_s6 + $0x38] sm:$0xff] }
0x123c   :  { %3022 = vmatpush.msrb.mxu0 %v721_v57  ;;  %v752_v57 = vld [vmem:[%s7477_s8 + $0x8] sm:$0xff] }
0x123d   :  { %5084 = vpow2.f32 %v2770_v18  ;;  %v720_v18 = vld [vmem:[%s7476_s6 + $0x30] sm:$0xff] }
0x123e   :  { %3023 = vmatpush.msrb.mxu0 %v720_v18  ;;  %v751_v18 = vld [vmem:[%s7477_s8] sm:$0xff] }
0x1240   :  { %v2605_v54 = vpop.permute.xlu2 %2604  ;;  %3024 = vmatpush.msrb.mxu0 %v719_v58 }
0x1241   :  { %v2609_v62 = vsel %vm1109_vm3, %v2608_v25, %v2605_v54  ;;  %v718_v25 = vld [vmem:[%s7476_s6 + $0x20] sm:$0xff] }
0x1242   :  { %4774 = vmatmul.msk.f32.vlgmr.msra.gmra.mxu1 %vm804_vm0, %v2609_v62  ;;  %v7008_v62 = vld [vmem:[#allocation16] ss:$0 sm:$0xff]  ;;  %3025 = vmatpush.msrb.mxu0 %v718_v25 }
0x1243   :  { %v5085_v1 = vpop.eup %5084 }
0x1244   :  { %v2772_v2 = vsel %vm837_vm1, %v5085_v1, 0.0 }
0x1245   :  { %2773 = vadd.xlane.f32.xlu1 %v2772_v2 }
0x125d   :  { %v2703_v6 = vpop.xlane.xlu0 %2702 }
0x125e   :  { %v2704_v8 = vsub.f32 %v2698_v33, %v2703_v6  ;;  %2712 = vrot.lane.b32.xlu1 %v6919_v7, %s6097_s12  ;;  %v4969_v6 = vld [vmem:[#allocation15] ss:$0 sm:$0xff] }
0x1260   :  { %v2705_v10 = vmul.f32 1.442695, %v2704_v8 }
0x1262   :  { %5086 = vpow2.f32 %v2705_v10 }
0x1263   :  { %5088 = vpow2.f32 %v2835_v11 }
0x1268   :  { %v5087_v0 = vpop.eup %5086 }
0x1269   :  { %v2707_v12 = vsel %vm837_vm1, %v5087_v0, 0.0  ;;  %v5089_v14 = vpop.eup %5088 }
0x126a   :  { %2708 = vadd.xlane.f32.xlu0 %v2707_v12  ;;  %v2837_v15 = vsel %vm837_vm1, %v5089_v14, 0.0 }
0x1272   :  { %2838 = vadd.xlane.f32.xlu0 %v2837_v15 }
0x1279   :  { %v2644_v41 = vpop.xlane.xlu2 %2643 }
0x127a   :  { %5090 = vrcp.f32 %v2644_v41  ;;  %v716_v41 = vld [vmem:[%s7476_s6 + $0x10] sm:$0xff] }
0x1280   :  { %v5091_v42 = vpop.eup %5090 }
0x1281   :  { %v2646_v16 = vmul.f32 %v5091_v42, %v5083_v47  ;;  %v2648_v53 = vpop.permute.xlu2 %2647  ;;  %v710_v47 = vld [vmem:[%s7475_s7] sm:$0xff]  ;;  %v715_v42 = vld [vmem:[%s7476_s6 + $0x8] sm:$0xff] }
0x1282   :  { %2668 = vmatpush.msra.mxu3 %v2648_v53  ;;  %v7020_v53 = vld [vmem:[#allocation4] ss:$0 sm:$0xff] }
0x1283   :  { %4764 = vmatmul.msk.f32.vlgmr.msra.gmra.mxu3 %vm837_vm1, %v2646_v16  ;;  %v714_v16 = vld [vmem:[%s7476_s6] sm:$0xff] }
0x1286   :  { %2777 = vrot.lane.b32.xlu0 %v6919_v7, %s6100_s11 }
0x1289   :  { %v2843_v24 = vpop.permute.xlu2 %2842 }
0x12b8   :  { %v2774_v22 = vpop.xlane.xlu1 %2773 }
0x12bf   :  { %v2909_v21 = vpop.f32.mrf.mxu1 }
0x12c0   :  { %v2910_v35 = vadd.f32 %v6986_v17, %v2909_v21 }
0x12c2   :  { %v2915_v60 = vadd.f32 %v2910_v35, %v6860_v59 }
0x12c4   :  { %v2917_v3 = vsel %vm804_vm0, %v2915_v60, 0.0 }
0x12c5   :  { %2918 = vadd.xlane.f32.xlu1 %v2917_v3 }
0x12d0   :  { %v2713_v23 = vpop.permute.xlu1 %2712 }
0x12d1   :  { %2733 = vmatpush.msrb.mxu2 %v2713_v23 }
0x12d3   :  { %2863 = vmatpush.msra.mxu2 %v2843_v24 }
0x12dd   :  { %v2709_v26 = vpop.xlane.xlu0 %2708 }
0x12de   :  { %5092 = vrcp.f32 %v2709_v26  ;;  %v7027_v26 = vld [vmem:[#allocation6] ss:$0 sm:$0xff] }
0x12e4   :  { %v5093_v27 = vpop.eup %5092 }
0x12e5   :  { %v2711_v28 = vmul.f32 %v5093_v27, %v5087_v0  ;;  %v2839_v7 = vpop.xlane.xlu0 %2838 }
0x12e6   :  { %5094 = vrcp.f32 %v2839_v7 }
0x12e7   :  { %4767 = vmatmul.msk.f32.vlgmr.msrb.gmra.mxu2 %vm837_vm1, %v2711_v28  ;;  %5096 = vrcp.f32 %v2774_v22 }
0x12ec   :  { %v5095_v63 = vpop.eup %5094 }
0x12ed   :  { %v2841_v29 = vmul.f32 %v5095_v63, %v5089_v14  ;;  %v5097_v59 = vpop.eup %5096 }
0x12ee   :  { %v2776_v30 = vmul.f32 %v5097_v59, %v5085_v1  ;;  %v717_v1 = vld [vmem:[%s7476_s6 + $0x18] sm:$0xff] }
0x12ef   :  { %4773 = vmatmul.msk.f32.vlgmr.msra.gmra.mxu2 %vm837_vm1, %v2841_v29  ;;  %3026 = vmatpush.msrb.mxu0 %v717_v1 }
0x12f1   :  { %3027 = vmatpush.msrb.mxu0 %v716_v41  ;;  %v4974_v41 = vld [vmem:[#allocation42] ss:$0 sm:$0xff] }
0x12f3   :  { %3028 = vmatpush.msrb.mxu0 %v715_v42 }
0x12f5   :  { %3029 = vmatpush.msrb.mxu0 %v714_v16 }
0x12f8   :  { %v2778_v32 = vpop.permute.xlu0 %2777 }
0x12f9   :  { %2798 = vmatpush.msrb.mxu3 %v2778_v32 }
0x12fa   :  { %4770 = vmatmul.msk.f32.vlgmr.msrb.gmra.mxu3 %vm837_vm1, %v2776_v30 }
0x12fb   :  { %2992 = vmatpush.msra.mxu3 %v713_v45 }
0x12fd   :  { %2993 = vmatpush.msra.mxu3 %v712_v31 }
0x12ff   :  { %2994 = vmatpush.msra.mxu3 %v711_v46 }
0x1301   :  { %2995 = vmatpush.msra.mxu3 %v710_v47 }
0x1306   :  { %v2670_v20 = vpop.f32.mrf.mxu3 }
0x1338   :  { %v2919_v33 = vpop.xlane.xlu1 %2918 }
0x1339   :  { %v2923_v34 = vmul.f32 %v2919_v33, %v6659_v40 }
0x133b   :  { %v2925_v36 = vsub.f32 %v2915_v60, %v2923_v34 }
0x133d   :  { %v2927_v37 = vmul.f32 %v2925_v36, %v2925_v36 }
0x133f   :  { %v2929_v38 = vsel %vm804_vm0, %v2927_v37, 0.0 }
0x1340   :  { %2930 = vadd.xlane.f32.xlu0 %v2929_v38 }
0x136a   :  { %v2735_v39 = vpop.f32.mrf.mxu2 }
0x136b   :  { %2869 = vrot.lane.b32.xlu2 %v2735_v39, %s6109_s19 }
0x1372   :  { %v2865_v44 = vpop.f32.mrf.mxu2 }
0x137d   :  { %v2800_v43 = vpop.f32.mrf.mxu3 }
0x137e   :  { %2873 = vrot.lane.b32.xlu2 %v2800_v43, %s6108_s29 }
0x1386   :  { %2877 = vrot.lane.b32.xlu2 %v2865_v44, %s6110_s26 }
0x13b3   :  { %v2931_v48 = vpop.xlane.xlu0 %2930 }
0x13b4   :  { %v2935_v49 = vmul.f32 %v2931_v48, %v6659_v40 }
0x13b6   :  { %v2937_v51 = vadd.f32 1e-05, %v2935_v49 }
0x13b8   :  { %5098 = vrsqrt.f32 %v2937_v51  ;;  %vm2945_vm14 = vweird.f32 %v2937_v51 }
0x13be   :  { %v5099_v55 = vpop.eup %5098 }
0x13bf   :  { %v2940_v52 = vmul.f32 %v5099_v55, %v2937_v51  ;;  %vm2946_vm13 = vweird.f32 %v5099_v55 }
0x13c0   :  { %vm2947_vm15 = vmor %vm2945_vm14, %vm2946_vm13 }
0x13c1   :  { %v2941_v56 = vmul.f32 %v5099_v55, %v2940_v52  ;;  %v754_v52 = vld [vmem:[%s7477_s8 + $0x18] sm:$0xff] }
0x13c2   :  { %3114 = vmatpush.msrb.mxu2 %v754_v52 }
0x13c3   :  { %v2942_v4 = vmul.f32 0.5, %v2941_v56  ;;  %v753_v56 = vld [vmem:[%s7477_s8 + $0x10] sm:$0xff] }
0x13c4   :  { %3115 = vmatpush.msrb.mxu2 %v753_v56 }
0x13c5   :  { %v2943_v61 = vsub.f32 1.5, %v2942_v4  ;;  %v2870_v10 = vpop.permute.xlu2 %2869 }
0x13c6   :  { %v2880_v0 = vsel %vm837_vm1, %v2670_v20, %v2870_v10  ;;  %3116 = vmatpush.msrb.mxu2 %v752_v57  ;;  %v4973_v10 = vld [vmem:[#allocation18] ss:$0 sm:$0xff] }
0x13c7   :  { %v2944_v54 = vmul.f32 %v5099_v55, %v2943_v61 }
0x13c8   :  { %3117 = vmatpush.msrb.mxu2 %v751_v18 }
0x13c9   :  { %v2948_v2 = vsel %vm2947_vm15, %v5099_v55, %v2944_v54 }
0x13ca   :  { %v2959_v5 = vmul.f32 %v2948_v2, %v2925_v36 }
0x13cc   :  { %v2964_v8 = vmul.f32 %v7008_v62, %v2959_v5 }
0x13ce   :  { %v2969_v9 = vadd.f32 %v4969_v6, %v2964_v8 }
0x13d0   :  { %4776 = vmatmul.msk.f32.vlgmr.msra.gmra.mxu3 %vm804_vm0, %v2969_v9 }
0x13d8   :  { %v2874_v11 = vpop.permute.xlu2 %2873 }
0x13d9   :  { %v2881_v12 = vsel %vm1107_vm2, %v2880_v0, %v2874_v11 }
0x13e0   :  { %v2878_v14 = vpop.permute.xlu2 %2877 }
0x13e1   :  { %v2882_v15 = vsel %vm1109_vm3, %v2881_v12, %v2878_v14 }
0x13e2   :  { %4775 = vmatmul.msk.f32.gmra.mxu1 %vm804_vm0, %v2882_v15 }
0x1453   :  { %v2997_v21 = vpop.f32.mrf.mxu3 }
0x1454   :  { %v2998_v35 = vadd.f32 %v7020_v53, %v2997_v21 }
0x1456   :  { %v3003_v60 = vmax.f32 %v2998_v35, 0.0 }
0x1458   :  { %4778 = vmatmul.msk.f32.vlgmr.msrb.gmra.mxu0 %vm1517_vm11, %v3003_v60 }
0x145f   :  { %v2912_v3 = vpop.f32.mrf.mxu1 }
0x1460   :  { %v2913_v22 = vadd.f32 %v6986_v17, %v2912_v3 }
0x1462   :  { %v2916_v23 = vadd.f32 %v2913_v22, %v6931_v50 }
0x1464   :  { %v2920_v24 = vsel %vm804_vm0, %v2916_v23, 0.0 }
0x1465   :  { %2921 = vadd.xlane.f32.xlu2 %v2920_v24 }
0x14d5   :  { %v3031_v27 = vpop.f32.mrf.mxu0 }
0x14d6   :  { %v3032_v28 = vadd.f32 %v7027_v26, %v3031_v27 }
0x14d8   :  { %v3037_v7 = vadd.f32 %v3032_v28, %v2969_v9  ;;  %v2922_v63 = vpop.xlane.xlu2 %2921 }
0x14d9   :  { %v2924_v29 = vmul.f32 %v2922_v63, %v6659_v40 }
0x14da   :  { %v3039_v59 = vsel %vm804_vm0, %v3037_v7, 0.0 }
0x14db   :  { %v2926_v30 = vsub.f32 %v2916_v23, %v2924_v29  ;;  %3040 = vadd.xlane.f32.xlu0 %v3039_v59 }
0x14dd   :  { %v2928_v32 = vmul.f32 %v2926_v30, %v2926_v30 }
0x14df   :  { %v2932_v17 = vsel %vm804_vm0, %v2928_v32, 0.0 }
0x14e0   :  { %2933 = vadd.xlane.f32.xlu1 %v2932_v17 }
0x154e   :  { %v3041_v50 = vpop.xlane.xlu0 %3040 }
0x154f   :  { %v3045_v33 = vmul.f32 %v3041_v50, %v6659_v40 }
0x1551   :  { %v3047_v34 = vsub.f32 %v3037_v7, %v3045_v33 }
0x1553   :  { %v2934_v36 = vpop.xlane.xlu1 %2933  ;;  %v3049_v37 = vmul.f32 %v3047_v34, %v3047_v34 }
0x1554   :  { %v2936_v38 = vmul.f32 %v2934_v36, %v6659_v40 }
0x1555   :  { %v3051_v39 = vsel %vm804_vm0, %v3049_v37, 0.0 }
0x1556   :  { %v2938_v20 = vadd.f32 1e-05, %v2936_v38  ;;  %3052 = vadd.xlane.f32.xlu1 %v3051_v39 }
0x1558   :  { %5100 = vrsqrt.f32 %v2938_v20  ;;  %vm2955_vm5 = vweird.f32 %v2938_v20 }
0x155e   :  { %v5101_v43 = vpop.eup %5100 }
0x155f   :  { %v2950_v44 = vmul.f32 %v5101_v43, %v2938_v20  ;;  %vm2956_vm4 = vweird.f32 %v5101_v43 }
0x1560   :  { %vm2957_vm6 = vmor %vm2955_vm5, %vm2956_vm4 }
0x1561   :  { %v2951_v45 = vmul.f32 %v5101_v43, %v2950_v44 }
0x1563   :  { %v2952_v31 = vmul.f32 0.5, %v2951_v45 }
0x1565   :  { %v2953_v46 = vsub.f32 1.5, %v2952_v31 }
0x1567   :  { %v2954_v47 = vmul.f32 %v5101_v43, %v2953_v46 }
0x1569   :  { %v2958_v48 = vsel %vm2957_vm6, %v5101_v43, %v2954_v47 }
0x156a   :  { %v2960_v49 = vmul.f32 %v2958_v48, %v2926_v30 }
0x156c   :  { %v2965_v51 = vmul.f32 %v7008_v62, %v2960_v49 }
0x156e   :  { %v2970_v55 = vadd.f32 %v4969_v6, %v2965_v51  ;;  %v4972_v6 = vld [vmem:[#allocation19] ss:$0 sm:$0xff] }
0x1570   :  { %4777 = vmatmul.msk.f32.gmra.mxu3 %vm804_vm0, %v2970_v55 }
0x15c9   :  { %v3053_v4 = vpop.xlane.xlu1 %3052 }
0x15ca   :  { %v3057_v58 = vmul.f32 %v3053_v4, %v6659_v40 }
0x15cc   :  { %v3059_v61 = vadd.f32 1e-05, %v3057_v58 }
0x15ce   :  { %5102 = vrsqrt.f32 %v3059_v61  ;;  %vm3067_vm8 = vweird.f32 %v3059_v61 }
0x15d4   :  { %v5103_v25 = vpop.eup %5102 }
0x15d5   :  { %v3062_v54 = vmul.f32 %v5103_v25, %v3059_v61  ;;  %vm3068_vm7 = vweird.f32 %v5103_v25 }
0x15d6   :  { %vm3069_vm9 = vmor %vm3067_vm8, %vm3068_vm7 }
0x15d7   :  { %v3063_v1 = vmul.f32 %v5103_v25, %v3062_v54 }
0x15d9   :  { %v3064_v62 = vmul.f32 0.5, %v3063_v1 }
0x15db   :  { %v3065_v2 = vsub.f32 1.5, %v3064_v62  ;;  %v730_v62 = vld [vmem:[%s7478_s10 + $0x18] sm:$0xff] }
0x15dd   :  { %v3066_v5 = vmul.f32 %v5103_v25, %v3065_v2 }
0x15df   :  { %v3070_v8 = vsel %vm3069_vm9, %v5103_v25, %v3066_v5 }
0x15e0   :  { %v3081_v9 = vmul.f32 %v3070_v8, %v3047_v34  ;;  %v728_v8 = vld [vmem:[%s7478_s10 + $0x8] sm:$0xff] }
0x15e2   :  { %v3086_v11 = vmul.f32 %v4972_v6, %v3081_v9  ;;  %v727_v9 = vld [vmem:[%s7478_s10] sm:$0xff] }
0x15e4   :  { %v7043_v0 = vadd.f32 %v4973_v10, %v3086_v11 }
0x15e6   :  { %4780 = vmatmul.msk.f32.vlgmr.msrb.gmra.mxu2 %vm804_vm0, %v7043_v0 }
0x15f3   :  { %v3000_v12 = vpop.f32.mrf.mxu3 }
0x15f4   :  { %v3001_v14 = vadd.f32 %v7020_v53, %v3000_v12 }
0x15f6   :  { %v3004_v15 = vmax.f32 %v3001_v14, 0.0 }
0x15f8   :  { %4779 = vmatmul.msk.f32.gmra.mxu0 %vm1517_vm11, %v3004_v15 }
0x1669   :  { %v3119_v42 = vpop.f32.mrf.mxu2 }
0x166a   :  { %v7049_v16 = vadd.f32 %v4974_v41, %v3119_v42 }
0x166c   :  { %3163 = vrot.lane.b32.xlu2 %v7049_v16, %s6102_s5  ;;  %3126 = vrot.lane.b32.xlu1 %v7049_v16, %s6098_s2 }
0x1674   :  { %3319 = vrot.lane.b32.xlu2 %v7049_v16, %s6105_s22  ;;  %3189 = vrot.lane.b32.xlu1 %v7049_v16, %s6099_s20 }
0x1675   :  { %v3034_v53 = vpop.f32.mrf.mxu0 }
0x1676   :  { %v3035_v21 = vadd.f32 %v7027_v26, %v3034_v53 }
0x1678   :  { %v3038_v35 = vadd.f32 %v3035_v21, %v2970_v55 }
0x167a   :  { %v3042_v60 = vsel %vm804_vm0, %v3038_v35, 0.0 }
0x167b   :  { %3043 = vadd.xlane.f32.xlu0 %v3042_v60 }
0x167c   :  { %3256 = vrot.lane.b32.xlu1 %v7049_v16, %s6100_s11 }
0x1684   :  { %3254 = vrot.lane.b32.xlu1 %v7049_v16, %s6101_s24 }
0x16c6   :  { %v3164_v3 = vpop.permute.xlu2 %3163 }
0x16c7   :  { %3184 = vmatpush.msrb.mxu3 %v3164_v3 }
0x16ce   :  { %v3320_v47 = vpop.permute.xlu2 %3319 }
0x16de   :  { %v3127_v22 = vpop.permute.xlu1 %3126 }
0x16df   :  { %4782 = vmatpush.xpose.msk.msrb.mxu1 %vm837_vm1, %v3127_v22 }
0x16e2   :  { %4783 = vmatmul.msk.f32.vlgmr.msrb.gmra.mxu1 %vm837_vm1, %v7049_v16 }
0x16e6   :  { %v3190_v23 = vpop.permute.xlu1 %3189 }
0x16ee   :  { %v3257_v24 = vpop.permute.xlu1 %3256  ;;  %v3044_v26 = vpop.xlane.xlu0 %3043 }
0x16ef   :  { %v3046_v27 = vmul.f32 %v3044_v26, %v6659_v40  ;;  %4788 = vmatpush.xpose.msk.msra.mxu3 %vm837_vm1, %v3257_v24 }
0x16f1   :  { %v3048_v28 = vsub.f32 %v3038_v35, %v3046_v27 }
0x16f3   :  { %v3050_v7 = vmul.f32 %v3048_v28, %v3048_v28 }
0x16f5   :  { %v3054_v63 = vsel %vm804_vm0, %v3050_v7, 0.0 }
0x16f6   :  { %3055 = vadd.xlane.f32.xlu0 %v3054_v63  ;;  %v3255_v4 = vpop.permute.xlu1 %3254 }
0x175f   :  { %v3149_v29 = vpop.f32.mrf.mxu1 }
0x1760   :  { %v3152_v59 = vsel %vm837_vm1, %v3149_v29, -inf }
0x1761   :  { %3153 = vmax.xlane.f32.xlu0 %v3152_v59 }
0x1769   :  { %v3056_v30 = vpop.xlane.xlu0 %3055 }
0x176a   :  { %v3058_v32 = vmul.f32 %v3056_v30, %v6659_v40 }
0x176c   :  { %v3060_v17 = vadd.f32 1e-05, %v3058_v32 }
0x176e   :  { %5104 = vrsqrt.f32 %v3060_v17  ;;  %vm3077_vm12 = vweird.f32 %v3060_v17 }
0x1774   :  { %v5105_v50 = vpop.eup %5104 }
0x1775   :  { %v3072_v33 = vmul.f32 %v5105_v50, %v3060_v17  ;;  %3191 = vrot.lane.b32.xlu0 %v7049_v16, %s6097_s12  ;;  %vm3078_vm10 = vweird.f32 %v5105_v50 }
0x1776   :  { %vm3079_vm13 = vmor %vm3077_vm12, %vm3078_vm10 }
0x1777   :  { %v3073_v34 = vmul.f32 %v5105_v50, %v3072_v33 }
0x1779   :  { %v3074_v36 = vmul.f32 0.5, %v3073_v34 }
0x177b   :  { %v3075_v37 = vsub.f32 1.5, %v3074_v36 }
0x177d   :  { %v3076_v38 = vmul.f32 %v5105_v50, %v3075_v37  ;;  %3321 = vrot.lane.b32.xlu0 %v7049_v16, %s6106_s27 }
0x177f   :  { %v3080_v39 = vsel %vm3079_vm13, %v5105_v50, %v3076_v38 }
0x1780   :  { %v3082_v20 = vmul.f32 %v3080_v39, %v3048_v28 }
0x1782   :  { %v3087_v43 = vmul.f32 %v4972_v6, %v3082_v20  ;;  %v729_v6 = vld [vmem:[%s7478_s10 + $0x10] sm:$0xff] }
0x1784   :  { %v7077_v44 = vadd.f32 %v4973_v10, %v3087_v43 }
0x1786   :  { %4781 = vmatmul.msk.f32.gmra.mxu2 %vm804_vm0, %v7077_v44 }
0x17d4   :  { %v3154_v45 = vpop.xlane.xlu0 %3153 }
0x17d5   :  { %v3155_v51 = vsub.f32 %v3149_v29, %v3154_v45 }
0x17d7   :  { %v3156_v55 = vmul.f32 1.442695, %v3155_v51 }
0x17d9   :  { %5106 = vpow2.f32 %v3156_v55 }
0x17df   :  { %v5107_v52 = vpop.eup %5106 }
0x17e0   :  { %v3158_v56 = vsel %vm837_vm1, %v5107_v52, 0.0 }
0x17e7   :  { %v3192_v31 = vpop.permute.xlu0 %3191 }
0x17e8   :  { %4785 = vmatpush.xpose.msk.msra.mxu2 %vm837_vm1, %v3192_v31 }
0x17eb   :  { %4786 = vmatmul.msk.f32.vlgmr.msra.gmra.mxu2 %vm837_vm1, %v3190_v23 }
0x17ef   :  { %v3322_v46 = vpop.permute.xlu0 %3321 }
0x17f0   :  { %4791 = vmatpush.xpose.msk.msrb.mxu2 %vm837_vm1, %v3322_v46 }
0x17f3   :  { %4792 = vmatmul.msk.f32.vlgmr.msrb.gmra.mxu2 %vm837_vm1, %v3320_v47 }
0x1809   :  { %v3122_v48 = vpop.f32.mrf.mxu2 }
0x180a   :  { %v7085_v49 = vadd.f32 %v4974_v41, %v3122_v48 }
0x180c   :  { %3463 = vrot.lane.b32.xlu2 %v7085_v49, %s6099_s20  ;;  %3465 = vrot.lane.b32.xlu1 %v7085_v49, %s6097_s12 }
0x180d   :  { %3400 = vrot.lane.b32.xlu0 %v7085_v49, %s6098_s2 }
0x1814   :  { %3595 = vrot.lane.b32.xlu1 %v7085_v49, %s6106_s27 }
0x1815   :  { %3530 = vrot.lane.b32.xlu0 %v7085_v49, %s6100_s11 }
0x181d   :  { %3593 = vrot.lane.b32.xlu0 %v7085_v49, %s6105_s22 }
0x1835   :  { %3159 = vadd.xlane.f32.xlu2 %v3158_v56 }
0x184d   :  { %3528 = vrot.lane.b32.xlu2 %v7085_v49, %s6101_s24 }
0x1866   :  { %v3464_v1 = vpop.permute.xlu2 %3463 }
0x186e   :  { %v3214_v57 = vpop.f32.mrf.mxu2 }
0x186f   :  { %v3217_v18 = vsel %vm837_vm1, %v3214_v57, -inf }
0x1870   :  { %3218 = vmax.xlane.f32.xlu1 %v3217_v18 }
0x1876   :  { %v3344_v58 = vpop.f32.mrf.mxu2 }
0x1877   :  { %v3347_v61 = vsel %vm837_vm1, %v3344_v58, -inf }
0x1878   :  { %3348 = vmax.xlane.f32.xlu0 %v3347_v61 }
0x187e   :  { %v3466_v25 = vpop.permute.xlu1 %3465 }
0x187f   :  { %v3401_v54 = vpop.permute.xlu0 %3400  ;;  %4797 = vmatpush.xpose.msk.msra.mxu2 %vm837_vm1, %v3466_v25 }
0x1882   :  { %4798 = vmatmul.msk.f32.vlgmr.msra.gmra.mxu2 %vm837_vm1, %v3464_v1 }
0x1886   :  { %v3596_v2 = vpop.permute.xlu1 %3595 }
0x1887   :  { %v3531_v5 = vpop.permute.xlu0 %3530  ;;  %4803 = vmatpush.xpose.msk.msrb.mxu2 %vm837_vm1, %v3596_v2 }
0x188b   :  { %3808 = vmatpush.msra.mxu2 %v730_v62 }
0x188d   :  { %3809 = vmatpush.msra.mxu2 %v729_v6 }
0x188f   :  { %3810 = vmatpush.msra.mxu2 %v728_v8  ;;  %v3594_v10 = vpop.permute.xlu0 %3593 }
0x1890   :  { %4804 = vmatmul.msk.f32.vlgmr.msrb.gmra.mxu2 %vm837_vm1, %v3594_v10 }
0x1891   :  { %3811 = vmatpush.msra.mxu2 %v727_v9 }
0x1898   :  { %4810 = vmatmul.msk.f32.vlgmr.msra.gmra.mxu2 %vm804_vm0, %v6844_v19 }
0x18a0   :  { %4811 = vmatmul.msk.f32.gmra.mxu2 %vm804_vm0, %v6904_v13 }
0x18a8   :  { %v3160_v11 = vpop.xlane.xlu2 %3159 }
0x18a9   :  { %5108 = vrcp.f32 %v3160_v11 }
0x18af   :  { %v5109_v12 = vpop.eup %5108 }
0x18b0   :  { %v3162_v14 = vmul.f32 %v5109_v12, %v5107_v52  ;;  %v3529_v15 = vpop.permute.xlu2 %3528 }
0x18b2   :  { %4784 = vmatmul.msk.f32.vlgmr.msrb.gmra.mxu3 %vm837_vm1, %v3162_v14 }
0x18b3   :  { %4794 = vmatpush.xpose.msk.msrb.mxu3 %vm837_vm1, %v3401_v54 }
0x18ba   :  { %4789 = vmatmul.msk.f32.vlgmr.msra.gmra.mxu3 %vm837_vm1, %v3255_v4 }
0x18bb   :  { %4800 = vmatpush.xpose.msk.msra.mxu3 %vm837_vm1, %v3531_v5 }
0x18c2   :  { %4795 = vmatmul.msk.f32.vlgmr.msrb.gmra.mxu3 %vm837_vm1, %v7085_v49 }
0x18ca   :  { %4801 = vmatmul.msk.f32.vlgmr.msra.gmra.mxu3 %vm837_vm1, %v3529_v15 }
0x18e3   :  { %v3219_v22 = vpop.xlane.xlu1 %3218 }
0x18e4   :  { %v3220_v23 = vsub.f32 %v3214_v57, %v3219_v22 }
0x18e6   :  { %v3221_v26 = vmul.f32 1.442695, %v3220_v23 }
0x18eb   :  { %v3349_v41 = vpop.xlane.xlu0 %3348 }
0x18ec   :  { %v3350_v42 = vsub.f32 %v3344_v58, %v3349_v41 }
0x18ee   :  { %v3351_v53 = vmul.f32 1.442695, %v3350_v42 }
0x18f0   :  { %5110 = vpow2.f32 %v3351_v53 }
0x18f1   :  { %5112 = vpow2.f32 %v3221_v26 }
0x18f6   :  { %v7128_v60 = vpop.eup %5110 }
0x18f7   :  { %v3353_v3 = vsel %vm837_vm1, %v7128_v60, 0.0  ;;  %v5113_v7 = vpop.eup %5112 }
0x18f8   :  { %v3223_v29 = vsel %vm837_vm1, %v5113_v7, 0.0 }
0x1905   :  { %v3488_v19 = vpop.f32.mrf.mxu2 }
0x1906   :  { %v3491_v13 = vsel %vm837_vm1, %v3488_v19, -inf }
0x1907   :  { %3492 = vmax.xlane.f32.xlu2 %v3491_v13 }
0x1913   :  { %v7124_v21 = vpop.f32.mrf.mxu2 }
0x1914   :  { %v3621_v35 = vsel %vm837_vm1, %v7124_v21, -inf }
0x1915   :  { %3622 = vmax.xlane.f32.xlu1 %v3621_v35 }
0x191b   :  { %v3813_v22 = vpop.f32.mrf.mxu2 }
0x191d   :  { %3354 = vadd.xlane.f32.xlu1 %v3353_v3  ;;  %v7167_v3 = vld [vmem:[#allocation27] ss:$0 sm:$0xff] }
0x191e   :  { %v7171_v26 = vadd.f32 %v7167_v3, %v3813_v22 }
0x1935   :  { %v7132_v24 = vpop.f32.mrf.mxu3 }
0x193d   :  { %v3279_v27 = vpop.f32.mrf.mxu3 }
0x193e   :  { %v3282_v28 = vsel %vm837_vm1, %v3279_v27, -inf }
0x193f   :  { %3283 = vmax.xlane.f32.xlu2 %v3282_v28 }
0x1945   :  { %v3423_v63 = vpop.f32.mrf.mxu3 }
0x1946   :  { %v3426_v59 = vsel %vm837_vm1, %v3423_v63, -inf }
0x1947   :  { %3224 = vadd.xlane.f32.xlu2 %v3223_v29  ;;  %3427 = vmax.xlane.f32.xlu1 %v3426_v59 }
0x194d   :  { %v3553_v34 = vpop.f32.mrf.mxu3 }
0x194e   :  { %v3556_v36 = vsel %vm837_vm1, %v3553_v34, -inf }
0x195f   :  { %3228 = vrot.lane.b32.xlu2 %v7049_v16, %s6104_s16 }
0x1960   :  { %3293 = vrot.lane.b32.xlu1 %v7049_v16, %s6103_s15 }
0x1968   :  { %3437 = vrot.lane.b32.xlu1 %v7085_v49, %s6102_s5  ;;  %s7480_s5 = sld [smem:[#allocation90_spill]] }
0x1970   :  { %3502 = vrot.lane.b32.xlu1 %v7085_v49, %s6104_s16 }
0x1978   :  { %3567 = vrot.lane.b32.xlu1 %v7085_v49, %s6103_s15 }
0x197a   :  { %v3493_v30 = vpop.xlane.xlu2 %3492 }
0x197b   :  { %v3494_v32 = vsub.f32 %v3488_v19, %v3493_v30 }
0x197d   :  { %v3495_v17 = vmul.f32 1.442695, %v3494_v32 }
0x197f   :  { %5114 = vpow2.f32 %v3495_v17  ;;  %v750_v17 = vld [vmem:[%s7479_s25 + $0x18] sm:$0xff] }
0x1980   :  { %3632 = vrot.lane.b32.xlu1 %v7085_v49, %s6107_s3  ;;  %3694 = vmatpush.msrb.mxu3 %v750_v17 }
0x1985   :  { %v7149_v50 = vpop.eup %5114 }
0x1986   :  { %v3497_v33 = vsel %vm837_vm1, %v7149_v50, 0.0 }
0x1987   :  { %3498 = vadd.xlane.f32.xlu0 %v3497_v33  ;;  %v748_v33 = vld [vmem:[%s7479_s25 + $0x8] sm:$0xff] }
0x1988   :  { %v3623_v37 = vpop.xlane.xlu1 %3622 }
0x1989   :  { %v3624_v58 = vsub.f32 %v7124_v21, %v3623_v37 }
0x198b   :  { %v3625_v61 = vmul.f32 1.442695, %v3624_v58 }
0x198f   :  { %3557 = vmax.xlane.f32.xlu0 %v3556_v36 }
0x1990   :  { %v3355_v38 = vpop.xlane.xlu1 %3354 }
0x19b2   :  { %v3284_v39 = vpop.xlane.xlu2 %3283 }
0x19b3   :  { %v3285_v20 = vsub.f32 %v3279_v27, %v3284_v39 }
0x19b5   :  { %v3286_v43 = vmul.f32 1.442695, %v3285_v20 }
0x19b7   :  { %5116 = vpow2.f32 %v3286_v43 }
0x19ba   :  { %v3225_v45 = vpop.xlane.xlu2 %3224  ;;  %v3428_v31 = vpop.xlane.xlu1 %3427 }
0x19bb   :  { %5118 = vrcp.f32 %v3225_v45  ;;  %v3429_v46 = vsub.f32 %v3423_v63, %v3428_v31 }
0x19bd   :  { %v5117_v47 = vpop.eup %5116  ;;  %v3430_v48 = vmul.f32 1.442695, %v3429_v46 }
0x19be   :  { %v3288_v49 = vsel %vm837_vm1, %v5117_v47, 0.0 }
0x19bf   :  { %5120 = vpow2.f32 %v3430_v48  ;;  %3289 = vadd.xlane.f32.xlu0 %v3288_v49 }
0x19c0   :  { %5122 = vpow2.f32 %v3625_v61 }
0x19c1   :  { %v5119_v51 = vpop.eup %5118 }
0x19c2   :  { %v3227_v55 = vmul.f32 %v5119_v51, %v5113_v7  ;;  %v3229_v52 = vpop.permute.xlu2 %3228 }
0x19c3   :  { %3249 = vmatpush.msra.mxu1 %v3229_v52 }
0x19c4   :  { %4787 = vmatmul.msk.f32.vlgmr.msra.gmra.mxu1 %vm837_vm1, %v3227_v55 }
0x19c5   :  { %v5121_v56 = vpop.eup %5120 }
0x19c6   :  { %v3432_v57 = vsel %vm837_vm1, %v5121_v56, 0.0  ;;  %v5123_v54 = vpop.eup %5122 }
0x19c7   :  { %3433 = vadd.xlane.f32.xlu0 %v3432_v57  ;;  %v3627_v2 = vsel %vm837_vm1, %v5123_v54, 0.0 }
0x19d2   :  { %v3294_v18 = vpop.permute.xlu1 %3293 }
0x19d3   :  { %3314 = vmatpush.msra.mxu0 %v3294_v18 }
0x19da   :  { %v3438_v4 = vpop.permute.xlu1 %3437 }
0x19db   :  { %3358 = vrot.lane.b32.xlu0 %v7049_v16, %s6107_s3  ;;  %3458 = vmatpush.msrb.mxu0 %v3438_v4 }
0x19e2   :  { %v3503_v9 = vpop.permute.xlu1 %3502 }
0x19ea   :  { %v3568_v14 = vpop.permute.xlu1 %3567 }
0x19f2   :  { %v3633_v21 = vpop.permute.xlu1 %3632 }
0x19fa   :  { %v3499_v25 = vpop.xlane.xlu0 %3498 }
0x1a02   :  { %v3558_v1 = vpop.xlane.xlu0 %3557 }
0x1a03   :  { %v3559_v62 = vsub.f32 %v3553_v34, %v3558_v1  ;;  %v3816_v1 = vpop.f32.mrf.mxu2 }
0x1a05   :  { %v3560_v5 = vmul.f32 1.442695, %v3559_v62  ;;  %3628 = vadd.xlane.f32.xlu0 %v3627_v2  ;;  %v7205_v62 = vadd.f32 %v7167_v3, %v3816_v1 }
0x1a07   :  { %5124 = vpow2.f32 %v3560_v5 }
0x1a0d   :  { %v5125_v6 = vpop.eup %5124 }
0x1a0e   :  { %v3562_v8 = vsel %vm837_vm1, %v5125_v6, 0.0 }
0x1a0f   :  { %3563 = vadd.xlane.f32.xlu2 %v3562_v8 }
0x1a32   :  { %v3290_v16 = vpop.xlane.xlu0 %3289 }
0x1a33   :  { %5126 = vrcp.f32 %v3290_v16 }
0x1a39   :  { %v5127_v10 = vpop.eup %5126 }
0x1a3a   :  { %v3292_v11 = vmul.f32 %v5127_v10, %v5117_v47  ;;  %v3434_v12 = vpop.xlane.xlu0 %3433 }
0x1a3b   :  { %5128 = vrcp.f32 %v3434_v12 }
0x1a3c   :  { %4790 = vmatmul.msk.f32.vlgmr.msra.gmra.mxu0 %vm837_vm1, %v3292_v11  ;;  %5130 = vrcp.f32 %v3355_v38  ;;  %v747_v38 = vld [vmem:[%s7479_s25] sm:$0xff] }
0x1a3d   :  { %3588 = vmatpush.msra.mxu0 %v3568_v14  ;;  %5132 = vrcp.f32 %v3499_v25 }
0x1a41   :  { %v5129_v15 = vpop.eup %5128  ;;  %v3251_v19 = vpop.f32.mrf.mxu1 }
0x1a42   :  { %v3436_v13 = vmul.f32 %v5129_v15, %v5121_v56  ;;  %3385 = vrot.lane.b32.xlu1 %v3251_v19, %s6109_s19  ;;  %v5131_v41 = vpop.eup %5130  ;;  %v4976_v56 = vld [vmem:[#allocation40] ss:$0 sm:$0xff]  ;;  %v738_v15 = vld [vmem:[%s7480_s5 + $0x18] sm:$0xff] }
0x1a43   :  { %v3357_v42 = vmul.f32 %v5131_v41, %v7128_v60  ;;  %v5133_v35 = vpop.eup %5132  ;;  %v737_v19 = vld [vmem:[%s7480_s5 + $0x10] sm:$0xff]  ;;  %v735_v41 = vld [vmem:[%s7480_s5] sm:$0xff] }
0x1a44   :  { %4796 = vmatmul.msk.f32.vlgmr.msrb.gmra.mxu0 %vm837_vm1, %v3436_v13  ;;  %v3501_v23 = vmul.f32 %v5133_v35, %v7149_v50  ;;  %v749_v50 = vld [vmem:[%s7479_s25 + $0x10] sm:$0xff]  ;;  %v736_v13 = vld [vmem:[%s7480_s5 + $0x8] sm:$0xff] }
0x1a45   :  { %3695 = vmatpush.msrb.mxu3 %v749_v50  ;;  %3782 = vmatpush.msrb.mxu0 %v738_v15 }
0x1a47   :  { %3696 = vmatpush.msrb.mxu3 %v748_v33  ;;  %3783 = vmatpush.msrb.mxu0 %v737_v19 }
0x1a49   :  { %3697 = vmatpush.msrb.mxu3 %v747_v38  ;;  %3784 = vmatpush.msrb.mxu0 %v736_v13 }
0x1a4b   :  { %3785 = vmatpush.msrb.mxu0 %v735_v41 }
0x1a4d   :  { %v3359_v53 = vpop.permute.xlu0 %3358 }
0x1a4e   :  { %3379 = vmatpush.msrb.mxu1 %v3359_v53 }
0x1a4f   :  { %4793 = vmatmul.msk.f32.vlgmr.msrb.gmra.mxu1 %vm837_vm1, %v3357_v42 }
0x1a50   :  { %3523 = vmatpush.msra.mxu1 %v3503_v9 }
0x1a52   :  { %3653 = vmatpush.msrb.mxu1 %v3633_v21 }
0x1a57   :  { %4799 = vmatmul.msk.f32.vlgmr.msra.gmra.mxu1 %vm837_vm1, %v3501_v23 }
0x1a58   :  { %4812 = vmatpush.xpose.msk.msra.mxu1 %vm837_vm1, %v7171_v26 }
0x1a78   :  { %v3629_v60 = vpop.xlane.xlu0 %3628 }
0x1a79   :  { %5134 = vrcp.f32 %v3629_v60 }
0x1a7f   :  { %v5135_v27 = vpop.eup %5134 }
0x1a80   :  { %v3631_v28 = vmul.f32 %v5135_v27, %v5123_v54 }
0x1a82   :  { %v3564_v7 = vpop.xlane.xlu2 %3563  ;;  %4805 = vmatmul.msk.f32.vlgmr.msrb.gmra.mxu1 %vm837_vm1, %v3631_v28 }
0x1a83   :  { %5136 = vrcp.f32 %v3564_v7  ;;  %v4977_v7 = vld [vmem:[#allocation33] ss:$0 sm:$0xff] }
0x1a89   :  { %v5137_v63 = vpop.eup %5136 }
0x1a8a   :  { %v3566_v29 = vmul.f32 %v5137_v63, %v5125_v6 }
0x1a8c   :  { %4802 = vmatmul.msk.f32.vlgmr.msra.gmra.mxu0 %vm837_vm1, %v3566_v29 }
0x1ab4   :  { %v3386_v39 = vpop.permute.xlu1 %3385 }
0x1ab5   :  { %v3396_v43 = vsel %vm837_vm1, %v7132_v24, %v3386_v39 }
0x1ab9   :  { %v3316_v59 = vpop.f32.mrf.mxu0 }
0x1aba   :  { %3389 = vrot.lane.b32.xlu2 %v3316_v59, %s6108_s29  ;;  %v4978_v59 = vld [vmem:[#allocation31] ss:$0 sm:$0xff] }
0x1ac1   :  { %v3460_v36 = vpop.f32.mrf.mxu0 }
0x1acc   :  { %v3381_v30 = vpop.f32.mrf.mxu1 }
0x1acd   :  { %3393 = vrot.lane.b32.xlu1 %v3381_v30, %s6110_s26 }
0x1ad4   :  { %v3525_v32 = vpop.f32.mrf.mxu1 }
0x1ad5   :  { %3659 = vrot.lane.b32.xlu1 %v3525_v32, %s6109_s19 }
0x1aff   :  { %v3655_v34 = vpop.f32.mrf.mxu1 }
0x1b00   :  { %3667 = vrot.lane.b32.xlu1 %v3655_v34, %s6110_s26 }
0x1b09   :  { %v3590_v37 = vpop.f32.mrf.mxu0 }
0x1b0a   :  { %3663 = vrot.lane.b32.xlu0 %v3590_v37, %s6108_s29 }
0x1b14   :  { %v3390_v20 = vpop.permute.xlu2 %3389 }
0x1b15   :  { %v3397_v45 = vsel %vm1107_vm2, %v3396_v43, %v3390_v20 }
0x1b3f   :  { %v3394_v31 = vpop.permute.xlu1 %3393 }
0x1b40   :  { %v3398_v46 = vsel %vm1109_vm3, %v3397_v45, %v3394_v31 }
0x1b41   :  { %4806 = vmatmul.msk.f32.vlgmr.msrb.gmra.mxu3 %vm804_vm0, %v3398_v46 }
0x1b47   :  { %v3660_v47 = vpop.permute.xlu1 %3659 }
0x1b48   :  { %v3670_v48 = vsel %vm837_vm1, %v3460_v36, %v3660_v47  ;;  %v4979_v47 = vld [vmem:[#allocation30] ss:$0 sm:$0xff] }
0x1b72   :  { %v3668_v51 = vpop.permute.xlu1 %3667 }
0x1b7c   :  { %v3664_v49 = vpop.permute.xlu0 %3663 }
0x1b7d   :  { %v3671_v55 = vsel %vm1107_vm2, %v3670_v48, %v3664_v49 }
0x1b7e   :  { %v3672_v52 = vsel %vm1109_vm3, %v3671_v55, %v3668_v51 }
0x1b7f   :  { %4807 = vmatmul.msk.f32.gmra.mxu3 %vm804_vm0, %v3672_v52 }
0x1bc4   :  { %v3699_v24 = vpop.f32.mrf.mxu3 }
0x1bc5   :  { %v3700_v57 = vadd.f32 %v4976_v56, %v3699_v24 }
0x1bc7   :  { %v3705_v18 = vadd.f32 %v3700_v57, %v7043_v0 }
0x1bc9   :  { %v3707_v4 = vsel %vm804_vm0, %v3705_v18, 0.0 }
0x1bca   :  { %3708 = vadd.xlane.f32.xlu2 %v3707_v4 }
0x1c02   :  { %v3702_v58 = vpop.f32.mrf.mxu3 }
0x1c03   :  { %v3703_v61 = vadd.f32 %v4976_v56, %v3702_v58 }
0x1c05   :  { %v3706_v25 = vadd.f32 %v3703_v61, %v7077_v44 }
0x1c07   :  { %v3710_v54 = vsel %vm804_vm0, %v3706_v25, 0.0 }
0x1c08   :  { %3711 = vadd.xlane.f32.xlu1 %v3710_v54 }
0x1c21   :  { %3884 = vrot.lane.b32.xlu1 %v7171_v26, %s6099_s20 }
0x1c29   :  { %4014 = vrot.lane.b32.xlu1 %v7171_v26, %s6105_s22 }
0x1c31   :  { %4157 = vrot.lane.b32.xlu1 %v7205_v62, %s6099_s20 }
0x1c39   :  { %4287 = vrot.lane.b32.xlu1 %v7205_v62, %s6105_s22 }
0x1c3d   :  { %v3709_v0 = vpop.xlane.xlu2 %3708 }
0x1c3e   :  { %v3713_v44 = vmul.f32 %v3709_v0, %v6659_v40 }
0x1c40   :  { %v3715_v2 = vsub.f32 %v3705_v18, %v3713_v44 }
0x1c42   :  { %v3717_v5 = vmul.f32 %v3715_v2, %v3715_v2 }
0x1c44   :  { %v3719_v6 = vsel %vm804_vm0, %v3717_v5, 0.0 }
0x1c45   :  { %3720 = vadd.xlane.f32.xlu0 %v3719_v6 }
0x1c59   :  { %3949 = vrot.lane.b32.xlu0 %v7171_v26, %s6101_s24 }
0x1c7b   :  { %v3712_v8 = vpop.xlane.xlu1 %3711 }
0x1c7c   :  { %v3714_v9 = vmul.f32 %v3712_v8, %v6659_v40 }
0x1c7e   :  { %v3716_v16 = vsub.f32 %v3706_v25, %v3714_v9 }
0x1c80   :  { %v3718_v10 = vmul.f32 %v3716_v16, %v3716_v16 }
0x1c82   :  { %v3722_v11 = vsel %vm804_vm0, %v3718_v10, 0.0 }
0x1c83   :  { %3723 = vadd.xlane.f32.xlu2 %v3722_v11 }
0x1c93   :  { %v3885_v12 = vpop.permute.xlu1 %3884 }
0x1c94   :  { %4815 = vmatpush.xpose.msk.msra.mxu3 %vm837_vm1, %v3885_v12 }
0x1c9b   :  { %v4015_v14 = vpop.permute.xlu1 %4014 }
0x1c9c   :  { %4821 = vmatpush.xpose.msk.msrb.mxu3 %vm837_vm1, %v4015_v14 }
0x1ca3   :  { %v4158_v56 = vpop.permute.xlu1 %4157 }
0x1cab   :  { %v4288_v18 = vpop.permute.xlu1 %4287 }
0x1cb8   :  { %v3721_v42 = vpop.xlane.xlu0 %3720 }
0x1cb9   :  { %v3725_v53 = vmul.f32 %v3721_v42, %v6659_v40 }
0x1cbb   :  { %v3727_v21 = vadd.f32 1e-05, %v3725_v53  ;;  %v4948_v53 = vpack.i.bf16 %v7205_v62, %v7171_v26 }
0x1cbd   :  { %5138 = vrsqrt.f32 %v3727_v21  ;;  %vm3735_vm15 = vweird.f32 %v3727_v21 }
0x1cc3   :  { %v5139_v35 = vpop.eup %5138 }
0x1cc4   :  { %v3730_v3 = vmul.f32 %v5139_v35, %v3727_v21  ;;  %vm3736_vm14 = vweird.f32 %v5139_v35 }
0x1cc5   :  { %vm3737_vm4 = vmor %vm3735_vm15, %vm3736_vm14 }
0x1cc6   :  { %v3731_v22 = vmul.f32 %v5139_v35, %v3730_v3 }
0x1cc8   :  { %v3732_v23 = vmul.f32 0.5, %v3731_v22 }
0x1cca   :  { %v3733_v60 = vsub.f32 1.5, %v3732_v23 }
0x1ccb   :  { %v3950_v27 = vpop.permute.xlu0 %3949 }
0x1ccc   :  { %v3734_v28 = vmul.f32 %v5139_v35, %v3733_v60  ;;  %4818 = vmatpush.xpose.msk.msrb.mxu2 %vm837_vm1, %v3950_v27 }
0x1cce   :  { %v3738_v63 = vsel %vm3737_vm4, %v5139_v35, %v3734_v28 }
0x1ccf   :  { %v3749_v29 = vmul.f32 %v3738_v63, %v3715_v2 }
0x1cd0   :  { %4824 = vmatpush.xpose.msk.msra.mxu2 %vm837_vm1, %v7205_v62 }
0x1cd1   :  { %v3754_v30 = vmul.f32 %v4977_v7, %v3749_v29 }
0x1cd3   :  { %v7227_v32 = vadd.f32 %v4978_v59, %v3754_v30 }
0x1cd5   :  { %4808 = vmatmul.msk.f32.vlgmr.msrb.gmra.mxu0 %vm804_vm0, %v7227_v32 }
0x1cf6   :  { %v3724_v17 = vpop.xlane.xlu2 %3723 }
0x1cf7   :  { %v3726_v50 = vmul.f32 %v3724_v17, %v6659_v40 }
0x1cf9   :  { %v3728_v33 = vadd.f32 1e-05, %v3726_v50 }
0x1cfb   :  { %5140 = vrsqrt.f32 %v3728_v33  ;;  %vm3745_vm6 = vweird.f32 %v3728_v33 }
0x1d01   :  { %v5141_v34 = vpop.eup %5140 }
0x1d02   :  { %v3740_v36 = vmul.f32 %v5141_v34, %v3728_v33  ;;  %vm3746_vm5 = vweird.f32 %v5141_v34 }
0x1d03   :  { %vm3747_vm7 = vmor %vm3745_vm6, %vm3746_vm5 }
0x1d04   :  { %v3741_v37 = vmul.f32 %v5141_v34, %v3740_v36 }
0x1d06   :  { %v3742_v38 = vmul.f32 0.5, %v3741_v37 }
0x1d08   :  { %v3743_v39 = vsub.f32 1.5, %v3742_v38 }
0x1d0a   :  { %v3744_v20 = vmul.f32 %v5141_v34, %v3743_v39 }
0x1d0c   :  { %v3748_v43 = vsel %vm3747_vm7, %v5141_v34, %v3744_v20 }
0x1d0d   :  { %v3750_v45 = vmul.f32 %v3748_v43, %v3716_v16 }
0x1d0f   :  { %v3755_v31 = vmul.f32 %v4977_v7, %v3750_v45 }
0x1d11   :  { %v7232_v46 = vadd.f32 %v4978_v59, %v3755_v31 }
0x1d13   :  { %4809 = vmatmul.msk.f32.gmra.mxu0 %vm804_vm0, %v7232_v46 }
0x1d52   :  { %v3787_v48 = vpop.f32.mrf.mxu0 }
0x1d53   :  { %v3788_v49 = vadd.f32 %v4979_v47, %v3787_v48 }
0x1d55   :  { %4012 = vrot.lane.b32.xlu0 %v3788_v49, %s6105_s22  ;;  %3882 = vrot.lane.b32.xlu2 %v3788_v49, %s6099_s20 }
0x1d56   :  { %4813 = vmatmul.msk.f32.vlgmr.msra.gmra.mxu1 %vm837_vm1, %v3788_v49 }
0x1d5d   :  { %4222 = vrot.lane.b32.xlu0 %v7205_v62, %s6101_s24  ;;  %3947 = vrot.lane.b32.xlu2 %v3788_v49, %s6101_s24 }
0x1d90   :  { %v3790_v51 = vpop.f32.mrf.mxu0 }
0x1d91   :  { %v3791_v55 = vadd.f32 %v4979_v47, %v3790_v51 }
0x1d93   :  { %4285 = vrot.lane.b32.xlu0 %v3791_v55, %s6105_s22  ;;  %4155 = vrot.lane.b32.xlu2 %v3791_v55, %s6099_s20  ;;  %s7483_s20 = sld [smem:[#allocation98_spill]] }
0x1d9b   :  { %4220 = vrot.lane.b32.xlu2 %v3791_v55, %s6101_s24 }
0x1daf   :  { %v3883_v52 = vpop.permute.xlu2 %3882 }
0x1db0   :  { %4816 = vmatmul.msk.f32.vlgmr.msra.gmra.mxu3 %vm837_vm1, %v3883_v52 }
0x1db1   :  { %4827 = vmatpush.xpose.msk.msra.mxu3 %vm837_vm1, %v4158_v56 }
0x1db7   :  { %v3948_v24 = vpop.permute.xlu2 %3947 }
0x1db8   :  { %4819 = vmatmul.msk.f32.vlgmr.msrb.gmra.mxu2 %vm837_vm1, %v3948_v24 }
0x1dc0   :  { %4825 = vmatmul.msk.f32.vlgmr.msra.gmra.mxu2 %vm837_vm1, %v3791_v55 }
0x1dc7   :  { %v4013_v57 = vpop.permute.xlu0 %4012 }
0x1dc8   :  { %4822 = vmatmul.msk.f32.vlgmr.msrb.gmra.mxu3 %vm837_vm1, %v4013_v57 }
0x1dc9   :  { %4833 = vmatpush.xpose.msk.msrb.mxu3 %vm837_vm1, %v4288_v18 }
0x1dcf   :  { %v4223_v4 = vpop.permute.xlu0 %4222 }
0x1dd0   :  { %4830 = vmatpush.xpose.msk.msrb.mxu2 %vm837_vm1, %v4223_v4 }
0x1dd3   :  { %v3842_v58 = vpop.f32.mrf.mxu1 }
0x1dd4   :  { %v3845_v61 = vsel %vm837_vm1, %v3842_v58, -inf }
0x1dd5   :  { %3846 = vmax.xlane.f32.xlu1 %v3845_v61 }
0x1ded   :  { %v4156_v25 = vpop.permute.xlu2 %4155 }
0x1dee   :  { %4828 = vmatmul.msk.f32.vlgmr.msra.gmra.mxu3 %vm837_vm1, %v4156_v25 }
0x1df5   :  { %v4221_v54 = vpop.permute.xlu2 %4220 }
0x1df6   :  { %4831 = vmatmul.msk.f32.vlgmr.msrb.gmra.mxu2 %vm837_vm1, %v4221_v54 }
0x1e05   :  { %v4286_v1 = vpop.permute.xlu0 %4285 }
0x1e06   :  { %4834 = vmatmul.msk.f32.vlgmr.msrb.gmra.mxu3 %vm837_vm1, %v4286_v1 }
0x1e33   :  { %v3907_v0 = vpop.f32.mrf.mxu3 }
0x1e34   :  { %v3910_v44 = vsel %vm837_vm1, %v3907_v0, -inf }
0x1e35   :  { %3911 = vmax.xlane.f32.xlu2 %v3910_v44 }
0x1e3b   :  { %v3972_v2 = vpop.f32.mrf.mxu2 }
0x1e3c   :  { %v3975_v5 = vsel %vm837_vm1, %v3972_v2, -inf }
0x1e3d   :  { %3976 = vmax.xlane.f32.xlu0 %v3975_v5 }
0x1e43   :  { %v4115_v6 = vpop.f32.mrf.mxu2 }
0x1e44   :  { %v4118_v8 = vsel %vm837_vm1, %v4115_v6, -inf }
0x1e45   :  { %4119 = vmax.xlane.f32.xlu1 %v4118_v8 }
0x1e48   :  { %v3847_v9 = vpop.xlane.xlu1 %3846 }
0x1e49   :  { %v3848_v16 = vsub.f32 %v3842_v58, %v3847_v9 }
0x1e4b   :  { %v3849_v10 = vmul.f32 1.442695, %v3848_v16  ;;  %v4037_v11 = vpop.f32.mrf.mxu3 }
0x1e4c   :  { %v4040_v12 = vsel %vm837_vm1, %v4037_v11, -inf }
0x1e4d   :  { %5142 = vpow2.f32 %v3849_v10  ;;  %4041 = vmax.xlane.f32.xlu2 %v4040_v12 }
0x1e53   :  { %v7260_v14 = vpop.eup %5142 }
0x1e54   :  { %v3851_v15 = vsel %vm837_vm1, %v7260_v14, 0.0 }
0x1e55   :  { %3852 = vadd.xlane.f32.xlu0 %v3851_v15 }
0x1e71   :  { %v4180_v19 = vpop.f32.mrf.mxu3 }
0x1e72   :  { %v4183_v13 = vsel %vm837_vm1, %v4180_v19, -inf }
0x1e73   :  { %4184 = vmax.xlane.f32.xlu0 %v4183_v13 }
0x1e79   :  { %v4245_v41 = vpop.f32.mrf.mxu2 }
0x1e7a   :  { %v4248_v42 = vsel %vm837_vm1, %v4245_v41, -inf }
0x1e7b   :  { %4249 = vmax.xlane.f32.xlu2 %v4248_v42 }
0x1e87   :  { %4949 = vrot.lane.b32.xlu0 %v4948_v53, %s6098_s2  ;;  %s7482_s2 = sld [smem:[#allocation97_spill]] }
0x1e89   :  { %v4310_v21 = vpop.f32.mrf.mxu3 }
0x1e8a   :  { %v4313_v35 = vsel %vm837_vm1, %v4310_v21, -inf }
0x1e8b   :  { %4314 = vmax.xlane.f32.xlu1 %v4313_v35 }
0x1e8f   :  { %3986 = vrot.lane.b32.xlu0 %v7171_v26, %s6100_s11 }
0x1e97   :  { %4051 = vrot.lane.b32.xlu0 %v7171_v26, %s6106_s27 }
0x1e9f   :  { %4194 = vrot.lane.b32.xlu0 %v7205_v62, %s6097_s12 }
0x1ea7   :  { %4324 = vrot.lane.b32.xlu0 %v7205_v62, %s6106_s27 }
0x1ea8   :  { %v3912_v3 = vpop.xlane.xlu2 %3911 }
0x1ea9   :  { %v3913_v22 = vsub.f32 %v3907_v0, %v3912_v3 }
0x1eab   :  { %v3914_v23 = vmul.f32 1.442695, %v3913_v22 }
0x1ead   :  { %5144 = vpow2.f32 %v3914_v23 }
0x1eb0   :  { %v3977_v60 = vpop.xlane.xlu0 %3976 }
0x1eb1   :  { %v3978_v27 = vsub.f32 %v3972_v2, %v3977_v60 }
0x1eb3   :  { %v7278_v28 = vpop.eup %5144  ;;  %v3979_v7 = vmul.f32 1.442695, %v3978_v27 }
0x1eb4   :  { %v3916_v63 = vsel %vm837_vm1, %v7278_v28, 0.0 }
0x1eb5   :  { %5146 = vpow2.f32 %v3979_v7  ;;  %3917 = vadd.xlane.f32.xlu2 %v3916_v63 }
0x1eb8   :  { %v4120_v30 = vpop.xlane.xlu1 %4119 }
0x1eb9   :  { %v4121_v33 = vsub.f32 %v4115_v6, %v4120_v30 }
0x1ebb   :  { %v5147_v29 = vpop.eup %5146  ;;  %v4122_v36 = vmul.f32 1.442695, %v4121_v33 }
0x1ebc   :  { %v3981_v59 = vsel %vm837_vm1, %v5147_v29, 0.0 }
0x1ebd   :  { %3982 = vadd.xlane.f32.xlu1 %v3981_v59 }
0x1ec0   :  { %v4042_v17 = vpop.xlane.xlu2 %4041 }
0x1ec1   :  { %v4043_v50 = vsub.f32 %v4037_v11, %v4042_v17 }
0x1ec3   :  { %v4044_v34 = vmul.f32 1.442695, %v4043_v50 }
0x1ec5   :  { %5148 = vpow2.f32 %v4044_v34 }
0x1ec6   :  { %5150 = vpow2.f32 %v4122_v36 }
0x1ec8   :  { %v3853_v43 = vpop.xlane.xlu0 %3852 }
0x1ecb   :  { %v7283_v37 = vpop.eup %5148 }
0x1ecc   :  { %v4046_v38 = vsel %vm837_vm1, %v7283_v37, 0.0  ;;  %v5151_v39 = vpop.eup %5150 }
0x1ecd   :  { %4047 = vadd.xlane.f32.xlu2 %v4046_v38  ;;  %v4124_v20 = vsel %vm837_vm1, %v5151_v39, 0.0 }
0x1ed5   :  { %4125 = vadd.xlane.f32.xlu2 %v4124_v20 }
0x1ed6   :  { %3921 = vrot.lane.b32.xlu1 %v7171_v26, %s6097_s12  ;;  %s7481_s12 = sld [smem:[#allocation89_spill]] }
0x1edc   :  { %v734_v36 = vld [vmem:[%s7481_s12 + $0x18] sm:$0xff]  ;;  %v732_v38 = vld [vmem:[%s7481_s12 + $0x8] sm:$0xff] }
0x1edd   :  { %4386 = vmatpush.msra.mxu2 %v734_v36 }
0x1ee6   :  { %v4185_v45 = vpop.xlane.xlu0 %4184 }
0x1ee7   :  { %v4186_v31 = vsub.f32 %v4180_v19, %v4185_v45 }
0x1ee9   :  { %v4187_v47 = vmul.f32 1.442695, %v4186_v31 }
0x1eeb   :  { %5152 = vpow2.f32 %v4187_v47 }
0x1eec   :  { %5154 = vrcp.f32 %v3853_v43 }
0x1eee   :  { %v4250_v48 = vpop.xlane.xlu2 %4249 }
0x1eef   :  { %v4251_v49 = vsub.f32 %v4245_v41, %v4250_v48 }
0x1ef1   :  { %v5153_v51 = vpop.eup %5152  ;;  %v4252_v55 = vmul.f32 1.442695, %v4251_v49 }
0x1ef2   :  { %v4189_v52 = vsel %vm837_vm1, %v5153_v51, 0.0  ;;  %v5155_v56 = vpop.eup %5154 }
0x1ef3   :  { %5156 = vpow2.f32 %v4252_v55  ;;  %4190 = vadd.xlane.f32.xlu2 %v4189_v52  ;;  %v3855_v4 = vmul.f32 %v5155_v56, %v7260_v14 }
0x1ef9   :  { %v5157_v24 = vpop.eup %5156  ;;  %v4950_v57 = vpop.permute.xlu0 %4949 }
0x1efa   :  { %v4951_v18 = vunpack.i.l.bf16 %v4950_v57  ;;  %v4254_v26 = vsel %vm837_vm1, %v5157_v24, 0.0  ;;  %v4952_v25 = vunpack.i.h.bf16 %v4950_v57  ;;  %v4980_v57 = vld [vmem:[#allocation28] ss:$0 sm:$0xff] }
0x1efb   :  { %4255 = vadd.xlane.f32.xlu2 %v4254_v26 }
0x1efc   :  { %3877 = vmatpush.msrb.mxu1 %v4951_v18 }
0x1efd   :  { %4814 = vmatmul.msk.f32.vlgmr.msrb.gmra.mxu1 %vm837_vm1, %v3855_v4 }
0x1efe   :  { %v4315_v58 = vpop.xlane.xlu1 %4314 }
0x1eff   :  { %v4316_v61 = vsub.f32 %v4310_v21, %v4315_v58 }
0x1f01   :  { %v4317_v54 = vmul.f32 1.442695, %v4316_v61  ;;  %v3987_v1 = vpop.permute.xlu0 %3986 }
0x1f02   :  { %4007 = vmatpush.msra.mxu1 %v3987_v1 }
0x1f03   :  { %5158 = vpow2.f32 %v4317_v54 }
0x1f04   :  { %4150 = vmatpush.msrb.mxu1 %v4952_v25 }
0x1f09   :  { %v5159_v0 = vpop.eup %5158  ;;  %v4052_v9 = vpop.permute.xlu0 %4051 }
0x1f0a   :  { %v4319_v44 = vsel %vm837_vm1, %v5159_v0, 0.0 }
0x1f0b   :  { %4320 = vadd.xlane.f32.xlu1 %v4319_v44 }
0x1f11   :  { %v4195_v11 = vpop.permute.xlu0 %4194 }
0x1f13   :  { %4259 = vrot.lane.b32.xlu2 %v7205_v62, %s6100_s11 }
0x1f19   :  { %v4325_v42 = vpop.permute.xlu0 %4324 }
0x1f28   :  { %v3918_v6 = vpop.xlane.xlu2 %3917 }
0x1f30   :  { %v3983_v2 = vpop.xlane.xlu1 %3982 }
0x1f31   :  { %5160 = vrcp.f32 %v3983_v2 }
0x1f32   :  { %5162 = vrcp.f32 %v3918_v6 }
0x1f37   :  { %v5161_v5 = vpop.eup %5160 }
0x1f38   :  { %v3985_v8 = vmul.f32 %v5161_v5, %v5147_v29  ;;  %v5163_v10 = vpop.eup %5162 }
0x1f39   :  { %v3920_v12 = vmul.f32 %v5163_v10, %v7278_v28  ;;  %v758_v10 = vld [vmem:[%s7482_s2 + $0x18] sm:$0xff] }
0x1f3a   :  { %4820 = vmatmul.msk.f32.vlgmr.msra.gmra.mxu1 %vm837_vm1, %v3985_v8 }
0x1f40   :  { %v4048_v16 = vpop.xlane.xlu2 %4047 }
0x1f41   :  { %5164 = vrcp.f32 %v4048_v16 }
0x1f47   :  { %v5165_v62 = vpop.eup %5164 }
0x1f48   :  { %v4126_v14 = vpop.xlane.xlu2 %4125  ;;  %v3922_v15 = vpop.permute.xlu1 %3921  ;;  %v4050_v13 = vmul.f32 %v5165_v62, %v7283_v37  ;;  %v733_v37 = vld [vmem:[%s7481_s12 + $0x10] sm:$0xff] }
0x1f49   :  { %5166 = vrcp.f32 %v4126_v14  ;;  %3942 = vmatpush.msra.mxu0 %v3922_v15  ;;  %4387 = vmatpush.msra.mxu2 %v733_v37  ;;  %v755_v14 = vld [vmem:[%s7482_s2] sm:$0xff] }
0x1f4a   :  { %4817 = vmatmul.msk.f32.vlgmr.msra.gmra.mxu0 %vm837_vm1, %v3920_v12  ;;  %v756_v12 = vld [vmem:[%s7482_s2 + $0x8] sm:$0xff] }
0x1f4b   :  { %4072 = vmatpush.msrb.mxu0 %v4052_v9  ;;  %4388 = vmatpush.msra.mxu2 %v732_v38 }
0x1f4d   :  { %4215 = vmatpush.msra.mxu0 %v4195_v11  ;;  %v757_v11 = vld [vmem:[%s7482_s2 + $0x10] sm:$0xff] }
0x1f4f   :  { %v5167_v19 = vpop.eup %5166 }
0x1f50   :  { %v4128_v41 = vmul.f32 %v5167_v19, %v5151_v39  ;;  %v731_v39 = vld [vmem:[%s7481_s12] sm:$0xff] }
0x1f51   :  { %4389 = vmatpush.msra.mxu2 %v731_v39 }
0x1f52   :  { %4823 = vmatmul.msk.f32.vlgmr.msrb.gmra.mxu0 %vm837_vm1, %v4050_v13  ;;  %4826 = vmatmul.msk.f32.vlgmr.msrb.gmra.mxu1 %vm837_vm1, %v4128_v41 }
0x1f53   :  { %4345 = vmatpush.msrb.mxu0 %v4325_v42 }
0x1f66   :  { %v4191_v53 = vpop.xlane.xlu2 %4190 }
0x1f67   :  { %5168 = vrcp.f32 %v4191_v53 }
0x1f6d   :  { %v5169_v21 = vpop.eup %5168 }
0x1f6e   :  { %v4193_v35 = vmul.f32 %v5169_v21, %v5153_v51  ;;  %v4256_v3 = vpop.xlane.xlu2 %4255 }
0x1f6f   :  { %5170 = vrcp.f32 %v4256_v3  ;;  %v4981_v3 = vld [vmem:[#allocation36] ss:$0 sm:$0xff] }
0x1f70   :  { %4829 = vmatmul.msk.f32.vlgmr.msra.gmra.mxu0 %vm837_vm1, %v4193_v35 }
0x1f75   :  { %v5171_v22 = vpop.eup %5170 }
0x1f76   :  { %v4258_v23 = vmul.f32 %v5171_v22, %v5157_v24  ;;  %v4260_v60 = vpop.permute.xlu2 %4259 }
0x1f77   :  { %4280 = vmatpush.msra.mxu1 %v4260_v60 }
0x1f78   :  { %4832 = vmatmul.msk.f32.vlgmr.msra.gmra.mxu1 %vm837_vm1, %v4258_v23  ;;  %v4982_v23 = vld [vmem:[#allocation34] ss:$0 sm:$0xff] }
0x1f79   :  { %4474 = vmatpush.msrb.mxu1 %v758_v10 }
0x1f7a   :  { %v3879_v63 = vpop.f32.mrf.mxu1 }
0x1f7b   :  { %4475 = vmatpush.msrb.mxu1 %v757_v11 }
0x1f7d   :  { %4476 = vmatpush.msrb.mxu1 %v756_v12 }
0x1f7e   :  { %v4321_v27 = vpop.xlane.xlu1 %4320 }
0x1f7f   :  { %5172 = vrcp.f32 %v4321_v27  ;;  %4477 = vmatpush.msrb.mxu1 %v755_v14  ;;  %v798_v14 = vld [vmem:[%s6395_s13 + $0x18] sm:$0xff] }
0x1f80   :  { %4596 = vmatpush.msra.mxu0 %v798_v14 }
0x1f85   :  { %v5173_v28 = vpop.eup %5172 }
0x1f86   :  { %v4323_v7 = vmul.f32 %v5173_v28, %v5159_v0 }
0x1f88   :  { %4835 = vmatmul.msk.f32.vlgmr.msrb.gmra.mxu0 %vm837_vm1, %v4323_v7  ;;  %v766_v7 = vld [vmem:[%s7483_s20 + $0x38] sm:$0xff] }
0x1f89   :  { %4504 = vmatpush.msra.mxu3 %v766_v7 }
0x1fb7   :  { %v4009_v59 = vpop.f32.mrf.mxu1 }
0x1fc7   :  { %v3944_v29 = vpop.f32.mrf.mxu0 }
0x1fc8   :  { %4078 = vrot.lane.b32.xlu0 %v3944_v29, %s6109_s19  ;;  %v764_v29 = vld [vmem:[%s7483_s20 + $0x28] sm:$0xff] }
0x1fcf   :  { %v4074_v30 = vpop.f32.mrf.mxu0  ;;  %v4152_v17 = vpop.f32.mrf.mxu1 }
0x1fd0   :  { %4086 = vrot.lane.b32.xlu2 %v4074_v30, %s6110_s26  ;;  %4082 = vrot.lane.b32.xlu0 %v4009_v59, %s6108_s29 }
0x1fed   :  { %v4217_v50 = vpop.f32.mrf.mxu0 }
0x1fee   :  { %4351 = vrot.lane.b32.xlu0 %v4217_v50, %s6109_s19 }
0x1ff5   :  { %v4282_v33 = vpop.f32.mrf.mxu1 }
0x1ff6   :  { %4355 = vrot.lane.b32.xlu2 %v4282_v33, %s6108_s29  ;;  %v762_v33 = vld [vmem:[%s7483_s20 + $0x18] sm:$0xff] }
0x2005   :  { %v4347_v34 = vpop.f32.mrf.mxu0 }
0x2006   :  { %4359 = vrot.lane.b32.xlu1 %v4347_v34, %s6110_s26 }
0x202a   :  { %v4087_v31 = vpop.permute.xlu2 %4086 }
0x203a   :  { %v4079_v20 = vpop.permute.xlu0 %4078 }
0x203b   :  { %v4089_v43 = vsel %vm837_vm1, %v3879_v63, %v4079_v20  ;;  %v765_v63 = vld [vmem:[%s7483_s20 + $0x30] sm:$0xff] }
0x203c   :  { %4505 = vmatpush.msra.mxu3 %v765_v63 }
0x203e   :  { %4506 = vmatpush.msra.mxu3 %v764_v29 }
0x2042   :  { %v4083_v45 = vpop.permute.xlu0 %4082 }
0x2043   :  { %v4090_v47 = vsel %vm1107_vm2, %v4089_v43, %v4083_v45 }
0x2044   :  { %v4091_v48 = vsel %vm1109_vm3, %v4090_v47, %v4087_v31 }
0x2045   :  { %4836 = vmatmul.msk.f32.vlgmr.msra.gmra.mxu2 %vm804_vm0, %v4091_v48  ;;  %v761_v48 = vld [vmem:[%s7483_s20 + $0x10] sm:$0xff] }
0x2050   :  { %v4356_v55 = vpop.permute.xlu2 %4355 }
0x2060   :  { %v4352_v49 = vpop.permute.xlu0 %4351 }
0x2061   :  { %v4362_v51 = vsel %vm837_vm1, %v4152_v17, %v4352_v49  ;;  %v763_v17 = vld [vmem:[%s7483_s20 + $0x20] sm:$0xff]  ;;  %v760_v49 = vld [vmem:[%s7483_s20 + $0x8] sm:$0xff] }
0x2062   :  { %v4363_v56 = vsel %vm1107_vm2, %v4362_v51, %v4356_v55  ;;  %4507 = vmatpush.msra.mxu3 %v763_v17  ;;  %v759_v51 = vld [vmem:[%s7483_s20] sm:$0xff]  ;;  %v4983_v55 = vld [vmem:[#allocation24] ss:$0 sm:$0xff] }
0x2064   :  { %4508 = vmatpush.msra.mxu3 %v762_v33 }
0x2066   :  { %4509 = vmatpush.msra.mxu3 %v761_v48 }
0x2068   :  { %4510 = vmatpush.msra.mxu3 %v760_v49 }
0x206a   :  { %4511 = vmatpush.msra.mxu3 %v759_v51 }
0x2078   :  { %v4360_v52 = vpop.permute.xlu1 %4359 }
0x2079   :  { %v4364_v24 = vsel %vm1109_vm3, %v4363_v56, %v4360_v52 }
0x207a   :  { %4837 = vmatmul.msk.f32.gmra.mxu2 %vm804_vm0, %v4364_v24 }
0x20c8   :  { %v4391_v18 = vpop.f32.mrf.mxu2 }
0x20c9   :  { %v4392_v26 = vadd.f32 %v4980_v57, %v4391_v18 }
0x20cb   :  { %v4397_v4 = vadd.f32 %v4392_v26, %v7227_v32 }
0x20cd   :  { %v4399_v58 = vsel %vm804_vm0, %v4397_v4, 0.0 }
0x20ce   :  { %4400 = vadd.xlane.f32.xlu0 %v4399_v58 }
0x20fd   :  { %v4394_v61 = vpop.f32.mrf.mxu2 }
0x20fe   :  { %v4395_v25 = vadd.f32 %v4980_v57, %v4394_v61 }
0x2100   :  { %v4398_v54 = vadd.f32 %v4395_v25, %v7232_v46 }
0x2102   :  { %v4402_v1 = vsel %vm804_vm0, %v4398_v54, 0.0 }
0x2103   :  { %4403 = vadd.xlane.f32.xlu2 %v4402_v1 }
0x2141   :  { %v4401_v0 = vpop.xlane.xlu0 %4400 }
0x2142   :  { %v4405_v44 = vmul.f32 %v4401_v0, %v6659_v40 }
0x2144   :  { %v4407_v2 = vsub.f32 %v4397_v4, %v4405_v44  ;;  %v4984_v4 = vld [vmem:[#allocation25] ss:$0 sm:$0xff] }
0x2146   :  { %v4409_v5 = vmul.f32 %v4407_v2, %v4407_v2 }
0x2148   :  { %v4411_v32 = vsel %vm804_vm0, %v4409_v5, 0.0 }
0x2149   :  { %4412 = vadd.xlane.f32.xlu1 %v4411_v32 }
0x2176   :  { %v4404_v6 = vpop.xlane.xlu2 %4403 }
0x2177   :  { %v4406_v8 = vmul.f32 %v4404_v6, %v6659_v40 }
0x2179   :  { %v4408_v9 = vsub.f32 %v4398_v54, %v4406_v8 }
0x217b   :  { %v4410_v16 = vmul.f32 %v4408_v9, %v4408_v9 }
0x217d   :  { %v4414_v46 = vsel %vm804_vm0, %v4410_v16, 0.0 }
0x217e   :  { %4415 = vadd.xlane.f32.xlu0 %v4414_v46 }
0x21bc   :  { %v4413_v15 = vpop.xlane.xlu1 %4412 }
0x21bd   :  { %v4417_v62 = vmul.f32 %v4413_v15, %v6659_v40  ;;  %v797_v15 = vld [vmem:[%s6395_s13 + $0x10] sm:$0xff] }
0x21be   :  { %4597 = vmatpush.msra.mxu0 %v797_v15 }
0x21bf   :  { %v4419_v19 = vadd.f32 1e-05, %v4417_v62  ;;  %v796_v62 = vld [vmem:[%s6395_s13 + $0x8] sm:$0xff] }
0x21c0   :  { %4598 = vmatpush.msra.mxu0 %v796_v62 }
0x21c1   :  { %5174 = vrsqrt.f32 %v4419_v19  ;;  %vm4427_vm3 = vweird.f32 %v4419_v19 }
0x21c7   :  { %v5175_v13 = vpop.eup %5174 }
0x21c8   :  { %v4422_v41 = vmul.f32 %v5175_v13, %v4419_v19  ;;  %vm4428_vm1 = vweird.f32 %v5175_v13  ;;  %v795_v19 = vld [vmem:[%s6395_s13] sm:$0xff] }
0x21c9   :  { %vm4429_vm8 = vmor %vm4427_vm3, %vm4428_vm1  ;;  %4599 = vmatpush.msra.mxu0 %v795_v19 }
0x21ca   :  { %v4423_v42 = vmul.f32 %v5175_v13, %v4422_v41 }
0x21cc   :  { %v4424_v53 = vmul.f32 0.5, %v4423_v42 }
0x21ce   :  { %v4425_v21 = vsub.f32 1.5, %v4424_v53 }
0x21d0   :  { %v4426_v35 = vmul.f32 %v5175_v13, %v4425_v21 }
0x21d2   :  { %v4430_v22 = vsel %vm4429_vm8, %v5175_v13, %v4426_v35 }
0x21d3   :  { %v4441_v60 = vmul.f32 %v4430_v22, %v4407_v2 }
0x21d5   :  { %v4446_v27 = vmul.f32 %v4981_v3, %v4441_v60  ;;  %v4985_v60 = vld [vmem:[#allocation39] ss:$0 sm:$0xff] }
0x21d7   :  { %v4451_v28 = vadd.f32 %v4982_v23, %v4446_v27 }
0x21d9   :  { %4838 = vmatmul.msk.f32.vlgmr.msrb.gmra.mxu1 %vm804_vm0, %v4451_v28 }
0x21f1   :  { %v4416_v59 = vpop.xlane.xlu0 %4415 }
0x21f2   :  { %v4418_v30 = vmul.f32 %v4416_v59, %v6659_v40 }
0x21f4   :  { %v4420_v50 = vadd.f32 1e-05, %v4418_v30 }
0x21f6   :  { %5176 = vrsqrt.f32 %v4420_v50  ;;  %vm4437_vm10 = vweird.f32 %v4420_v50 }
0x21fc   :  { %v5177_v34 = vpop.eup %5176 }
0x21fd   :  { %v4432_v36 = vmul.f32 %v5177_v34, %v4420_v50  ;;  %vm4438_vm9 = vweird.f32 %v5177_v34 }
0x21fe   :  { %vm4439_vm12 = vmor %vm4437_vm10, %vm4438_vm9 }
0x21ff   :  { %v4433_v37 = vmul.f32 %v5177_v34, %v4432_v36 }
0x2201   :  { %v4434_v38 = vmul.f32 0.5, %v4433_v37 }
0x2203   :  { %v4435_v39 = vsub.f32 1.5, %v4434_v38 }
0x2205   :  { %v4436_v20 = vmul.f32 %v5177_v34, %v4435_v39 }
0x2207   :  { %v4440_v43 = vsel %vm4439_vm12, %v5177_v34, %v4436_v20 }
0x2208   :  { %v4442_v45 = vmul.f32 %v4440_v43, %v4408_v9 }
0x220a   :  { %v4447_v31 = vmul.f32 %v4981_v3, %v4442_v45 }
0x220c   :  { %v4452_v47 = vadd.f32 %v4982_v23, %v4447_v31 }
0x220e   :  { %4839 = vmatmul.msk.f32.gmra.mxu1 %vm804_vm0, %v4452_v47 }
0x2256   :  { %v4479_v52 = vpop.f32.mrf.mxu1 }
0x2257   :  { %v4480_v56 = vadd.f32 %v4983_v55, %v4479_v52 }
0x2259   :  { %v4485_v24 = vmax.f32 %v4480_v56, 0.0 }
0x225b   :  { %4840 = vmatmul.msk.f32.vlgmr.msra.gmra.mxu3 %vm1517_vm11, %v4485_v24 }
0x228b   :  { %v4482_v57 = vpop.f32.mrf.mxu1 }
0x228c   :  { %v4483_v18 = vadd.f32 %v4983_v55, %v4482_v57 }
0x228e   :  { %v4486_v26 = vmax.f32 %v4483_v18, 0.0 }
0x2290   :  { %4841 = vmatmul.msk.f32.gmra.mxu3 %vm1517_vm11, %v4486_v26 }
0x22de   :  { %v4513_v58 = vpop.f32.mrf.mxu3 }
0x22df   :  { %v4514_v61 = vadd.f32 %v4984_v4, %v4513_v58 }
0x22e1   :  { %v4519_v25 = vadd.f32 %v4514_v61, %v4451_v28  ;;  %v4986_v28 = vld [vmem:[#allocation37] ss:$0 sm:$0xff] }
0x22e3   :  { %v4521_v54 = vsel %vm804_vm0, %v4519_v25, 0.0 }
0x22e4   :  { %4522 = vadd.xlane.f32.xlu2 %v4521_v54 }
0x2313   :  { %v4516_v1 = vpop.f32.mrf.mxu3 }
0x2314   :  { %v4517_v0 = vadd.f32 %v4984_v4, %v4516_v1 }
0x2316   :  { %v4520_v44 = vadd.f32 %v4517_v0, %v4452_v47 }
0x2318   :  { %v4524_v2 = vsel %vm804_vm0, %v4520_v44, 0.0 }
0x2319   :  { %4525 = vadd.xlane.f32.xlu0 %v4524_v2 }
0x2357   :  { %v4523_v5 = vpop.xlane.xlu2 %4522 }
0x2358   :  { %v4527_v32 = vmul.f32 %v4523_v5, %v6659_v40 }
0x235a   :  { %v4529_v6 = vsub.f32 %v4519_v25, %v4527_v32 }
0x235c   :  { %v4531_v8 = vmul.f32 %v4529_v6, %v4529_v6 }
0x235e   :  { %v4533_v9 = vsel %vm804_vm0, %v4531_v8, 0.0 }
0x235f   :  { %4534 = vadd.xlane.f32.xlu2 %v4533_v9 }
0x238c   :  { %v4526_v16 = vpop.xlane.xlu0 %4525 }
0x238d   :  { %v4528_v46 = vmul.f32 %v4526_v16, %v6659_v40 }
0x238f   :  { %v4530_v10 = vsub.f32 %v4520_v44, %v4528_v46 }
0x2391   :  { %v4532_v11 = vmul.f32 %v4530_v10, %v4530_v10 }
0x2393   :  { %v4536_v12 = vsel %vm804_vm0, %v4532_v11, 0.0 }
0x2394   :  { %4537 = vadd.xlane.f32.xlu0 %v4536_v12 }
0x23d2   :  { %v4535_v13 = vpop.xlane.xlu2 %4534 }
0x23d3   :  { %v4539_v41 = vmul.f32 %v4535_v13, %v6659_v40 }
0x23d5   :  { %v4541_v42 = vadd.f32 1e-05, %v4539_v41 }
0x23d7   :  { %5178 = vrsqrt.f32 %v4541_v42  ;;  %vm4549_vm13 = vweird.f32 %v4541_v42 }
0x23dd   :  { %v5179_v53 = vpop.eup %5178 }
0x23de   :  { %v4544_v21 = vmul.f32 %v5179_v53, %v4541_v42  ;;  %vm4550_vm11 = vweird.f32 %v5179_v53 }
0x23df   :  { %vm4551_vm14 = vmor %vm4549_vm13, %vm4550_vm11 }
0x23e0   :  { %v4545_v35 = vmul.f32 %v5179_v53, %v4544_v21 }
0x23e2   :  { %v4546_v3 = vmul.f32 0.5, %v4545_v35 }
0x23e4   :  { %v4547_v22 = vsub.f32 1.5, %v4546_v3 }
0x23e6   :  { %v4548_v23 = vmul.f32 %v5179_v53, %v4547_v22 }
0x23e8   :  { %v4552_v27 = vsel %vm4551_vm14, %v5179_v53, %v4548_v23 }
0x23e9   :  { %v4563_v7 = vmul.f32 %v4552_v27, %v4529_v6 }
0x23eb   :  { %v4568_v63 = vmul.f32 %v4985_v60, %v4563_v7 }
0x23ed   :  { %v4573_v29 = vadd.f32 %v4986_v28, %v4568_v63 }
0x23ef   :  { %4842 = vmatmul.msk.f32.vlgmr.msra.gmra.mxu0 %vm804_vm0, %v4573_v29 }
0x2407   :  { %v4538_v59 = vpop.xlane.xlu0 %4537 }
0x2408   :  { %v4540_v30 = vmul.f32 %v4538_v59, %v6659_v40  ;;  %v4987_v40 = vld [vmem:[#allocation2] ss:$0 sm:$0xff] }
0x240a   :  { %v4542_v17 = vadd.f32 1e-05, %v4540_v30 }
0x240c   :  { %5180 = vrsqrt.f32 %v4542_v17  ;;  %vm4559_vm4 = vweird.f32 %v4542_v17 }
0x2412   :  { %v5181_v50 = vpop.eup %5180 }
0x2413   :  { %v4554_v33 = vmul.f32 %v5181_v50, %v4542_v17  ;;  %vm4560_vm15 = vweird.f32 %v5181_v50 }
0x2414   :  { %vm4561_vm5 = vmor %vm4559_vm4, %vm4560_vm15 }
0x2415   :  { %v4555_v34 = vmul.f32 %v5181_v50, %v4554_v33 }
0x2417   :  { %v4556_v36 = vmul.f32 0.5, %v4555_v34 }
0x2419   :  { %v4557_v37 = vsub.f32 1.5, %v4556_v36 }
0x241b   :  { %v4558_v38 = vmul.f32 %v5181_v50, %v4557_v37 }
0x241d   :  { %v4562_v39 = vsel %vm4561_vm5, %v5181_v50, %v4558_v38 }
0x241e   :  { %v4564_v20 = vmul.f32 %v4562_v39, %v4530_v10 }
0x2420   :  { %v4569_v43 = vmul.f32 %v4985_v60, %v4564_v20 }
0x2422   :  { %v4574_v45 = vadd.f32 %v4986_v28, %v4569_v43 }
0x2424   :  { %4843 = vmatmul.msk.f32.gmra.mxu0 %vm804_vm0, %v4574_v45 }
0x246c   :  { %v4601_v31 = vpop.f32.mrf.mxu0 }
0x246d   :  { %v4602_v47 = vadd.f32 %v4987_v40, %v4601_v31 }
0x246f   :  { %4607 = vst.msk [vmem:[%s6400_s4] sm:$0xff] %vm1107_vm2, %v4602_v47 }
0x24a1   :  { %v4604_v48 = vpop.f32.mrf.mxu0 }
0x24a2   :  { %v4605_v49 = vadd.f32 %v4987_v40, %v4604_v48 }
0x24a4   :  { %4608 = vst.msk [vmem:[%s6400_s4 + $0x8] sm:$0xff] %vm1107_vm2, %v4605_v49 }
0x24a5   :  { %4613 = vsyncpa [#allocation3], 1 }
0x24a6   :  { %4614 = vsyncpa [#allocation5], 1 }
0x24a7   :  { %4615 = vsyncpa [#allocation8], 1 }
0x24a8   :  { %4616 = vsyncpa [#allocation11], 1 }
0x24a9   :  { %4617 = vsyncpa [#allocation14], 1 }
0x24aa   :  { %4618 = vsyncpa [#allocation17], 1 }
0x24ab   :  { %4619 = vsyncpa [#allocation20], 1 }
0x24ac   :  { %4620 = vsyncpa [#allocation23], 1 }
0x24ad   :  { %4621 = vsyncpa [#allocation26], 1 }
0x24ae   :  { %4622 = vsyncpa [#allocation29], 1 }
0x24af   :  { %4623 = vsyncpa [#allocation32], 1 }
0x24b0   :  { %4624 = vsyncpa [#allocation35], 1 }
0x24b1   :  { %4625 = vsyncpa [#allocation38], 1 }
0x24b2   :  { %4626 = vsyncpa [#allocation41], 1 }
0x24b3   :  { %4627 = vsyncpa [#allocation44], 1 }
0x24b4   :  { %4628 = vsyncpa [#allocation47], 1 }
0x24b5   :  { %4629 = vsyncpa [#allocation50], 1 }

</bundles_post_ra>
